<compile_context>
chip_gen: v7x
topology: tpu7x:2x2x1
jax: 0.10.0
libtpu: 0.0.40
codegen_flags: <defaults>
</compile_context>

<pallas_src>
import jax
import jax.numpy as jnp
from jax import lax
from jax.experimental import pallas as pl
from jax.experimental.pallas import tpu as pltpu


def _round_up(x, m):
    return ((x + m - 1) // m) * m


def _cdiv(a, b):
    return (a + b - 1) // b


def _choose_tn(n, tn_max):
    """Batch-tile size: multiple of 8, <= tn_max, >= 2 grid steps when possible
    (v7x megacore), preferring a tile that divides n exactly so the remainder
    jnp.pad copy (extra HBM traffic) is skipped entirely."""
    if n <= 8:
        return 8
    cap = max(8, min(_round_up(tn_max, 8), _round_up(_cdiv(n, 2), 8)))
    # Exact multiple-of-8 divisor of n (no padding, no tail-tile waste), but not
    # so small that per-step grid overhead dominates.
    tn = cap
    while tn >= max(cap // 4, 8):
        if n % tn == 0:
            return tn
        tn -= 8
    # Otherwise balance the tiles so the tail block is nearly full.
    steps = _cdiv(n, cap)
    return _round_up(_cdiv(n, steps), 8)


def cifar_conv_kernel(x_ref, wconv_ref, bconv_ref, w1_ref, b1_ref, w2_ref, b2_ref,
                      out_ref):
    # x: (TN, 3072) VMEM  (x.reshape(N,3072) slab, NCHW row-major flatten)
    # wconv: (3072, 512) VMEM resident  (im2col permutation + conv taps folded in)
    # bconv: (1, 512)   w1: (512, 32)   b1: (1, 32)
    # w2: (32, 128) zero-padded         b2: (1, 128) zero-padded
    # out: (TN, 128) VMEM

    # Conv2d(3,2,2,stride=2) + bias + ReLU as one MXU dot; the folded weight's
    # column order (c*256 + H*16 + W) reproduces PyTorch's channel-major Flatten,
    # so the first Linear needs no further permutation.
    conv = jnp.dot(x_ref[...], wconv_ref[...], preferred_element_type=jnp.float32)
    conv = jnp.maximum(conv + bconv_ref[...], 0.0)

    # Linear(512, 32) + ReLU.
    h = jnp.dot(conv, w1_ref[...], preferred_element_type=jnp.float32)
    h = jnp.maximum(h + b1_ref[...], 0.0)

    # Linear(32, 10), padded to 128 output lanes for full-lane (unmasked) stores.
    out_ref[...] = (jnp.dot(h, w2_ref[...], preferred_element_type=jnp.float32)
                    + b2_ref[...])


def cifar_conv_forward(x, params, *, tn=1024):
    """x: (N, 3, 32, 32) float32 NCHW. Returns logits (N, 10)."""
    wc_t, bc, w1_t, b1, w2_t, b2 = params
    N = x.shape[0]

    # --- input: free metadata reshape; NO transpose / im2col HBM round trip ---
    x2d = x.reshape(N, 3 * 32 * 32).astype(jnp.float32)

    # --- fold conv (im2col permutation + taps) into a dense (3072, 512) weight -
    # W[ci*1024 + h*32 + w, c*256 + (h//2)*16 + (w//2)] = wc[c, ci, h%2, w%2]
    hh = jnp.arange(32)
    ww = jnp.arange(32)
    p_idx = (hh[:, None] // 2) * 16 + (ww[None, :] // 2)            # (32, 32)
    pix_onehot = jax.nn.one_hot(p_idx, 256, dtype=jnp.float32)      # (32, 32, 256)
    taps = wc_t.astype(jnp.float32)[:, :, hh % 2, :][:, :, :, ww % 2]  # (2,3,32,32)
    wconv = jnp.einsum('cihw,hwp->ihwcp', taps, pix_onehot).reshape(3072, 512)
    bconv = jnp.repeat(bc.astype(jnp.float32), 256).reshape(1, 512)

    w1 = w1_t.T.astype(jnp.float32)                                 # (512, 32)
    b1r = b1.reshape(1, 32).astype(jnp.float32)
    w2p = jnp.zeros((32, 128), jnp.float32).at[:, :10].set(w2_t.T.astype(jnp.float32))
    b2p = jnp.zeros((1, 128), jnp.float32).at[:, :10].set(
        b2.reshape(1, 10).astype(jnp.float32))

    # --- batch tiling ---------------------------------------------------------
    TN = _choose_tn(N, tn)
    Np = _cdiv(N, TN) * TN
    if Np != N:
        # Only reached when no multiple-of-8 tile divides N; small remainder pad.
        x2d = jnp.pad(x2d, ((0, Np - N), (0, 0)))

    grid_spec = pltpu.PrefetchScalarGridSpec(
        num_scalar_prefetch=0,
        grid=(Np // TN,),
        in_specs=[
            pl.BlockSpec((TN, 3072), lambda b: (b, 0)),      # activations (pipelined)
            pl.BlockSpec((3072, 512), lambda b: (0, 0)),     # folded conv weight (resident)
            pl.BlockSpec((1, 512), lambda b: (0, 0)),        # conv bias (resident)
            pl.BlockSpec((512, 32), lambda b: (0, 0)),       # w1 (resident)
            pl.BlockSpec((1, 32), lambda b: (0, 0)),         # b1 (resident)
            pl.BlockSpec((32, 128), lambda b: (0, 0)),       # w2 padded (resident)
            pl.BlockSpec((1, 128), lambda b: (0, 0)),        # b2 padded (resident)
        ],
        out_specs=pl.BlockSpec((TN, 128), lambda b: (b, 0)),
    )

    out_padded = pl.pallas_call(
        cifar_conv_kernel,
        out_shape=jax.ShapeDtypeStruct((Np, 128), jnp.float32),
        grid_spec=grid_spec,
        compiler_params=pltpu.CompilerParams(
            dimension_semantics=("parallel",),
            vmem_limit_bytes=56 * 1024 * 1024,
        ),
    )(x2d, wconv, bconv, w1, b1r, w2p, b2p)

    return out_padded[:N, :10]


def cifar_conv_reference(x, params):
    """Pure-JAX reference matching the PyTorch module semantics."""
    wc_t, bc, w1_t, b1, w2_t, b2 = params
    y = lax.conv_general_dilated(
        x, wc_t, window_strides=(2, 2), padding="VALID",
        dimension_numbers=("NCHW", "OIHW", "NCHW"))
    y = jax.nn.relu(y + bc.reshape(1, 2, 1, 1))
    y = y.reshape(x.shape[0], -1)               # channel-major flatten (N, 512)
    y = jax.nn.relu(y @ w1_t.T + b1)
    return y @ w2_t.T + b2


def init_params(key):
    ks = jax.random.split(key, 6)
    wc_t = 0.1 * jax.random.normal(ks[0], (2, 3, 2, 2), jnp.float32)   # OIHW
    bc = 0.1 * jax.random.normal(ks[1], (2,), jnp.float32)
    w1_t = 0.05 * jax.random.normal(ks[2], (32, 512), jnp.float32)     # (out, in)
    b1 = 0.1 * jax.random.normal(ks[3], (32,), jnp.float32)
    w2_t = 0.1 * jax.random.normal(ks[4], (10, 32), jnp.float32)       # (out, in)
    b2 = 0.1 * jax.random.normal(ks[5], (10,), jnp.float32)
    return (wc_t, bc, w1_t, b1, w2_t, b2)


if __name__ == "__main__":
    key = jax.random.PRNGKey(0)
    kx, kp = jax.random.split(key)
    # Linear(512, 32) after Conv2d(3,2,2,stride=2) forces 32x32 spatial input.
    x = jax.random.normal(kx, (2, 3, 32, 32), jnp.float32)
    params = init_params(kp)

    fwd = jax.jit(cifar_conv_forward)
    out = jax.block_until_ready(fwd(x, params))

    ref = cifar_conv_reference(x, params)
    assert out.shape == (2, 10)
    # Tolerance covers TPU default (possibly reduced-precision) matmul regimes
    # in both the XLA reference conv/dots and the in-kernel MXU dots.
    assert jnp.allclose(out, ref, atol=2e-3, rtol=2e-3), "mismatch vs reference"
    print("KERNEL_OK")
</pallas_src>

<mosaic_0001>
module attributes {stable_mosaic.version = 11 : i64} {
  func.func @cifar_conv_kernel(%arg0: i32, %arg1: memref<8x3072xf32, #tpu.memory_space<vmem>>, %arg2: memref<3072x512xf32, #tpu.memory_space<vmem>>, %arg3: memref<1x512xf32, #tpu.memory_space<vmem>>, %arg4: memref<512x32xf32, #tpu.memory_space<vmem>>, %arg5: memref<1x32xf32, #tpu.memory_space<vmem>>, %arg6: memref<32x128xf32, #tpu.memory_space<vmem>>, %arg7: memref<1x128xf32, #tpu.memory_space<vmem>>, %arg8: memref<8x128xf32, #tpu.memory_space<vmem>>) attributes {dimension_semantics = [#tpu.dimension_semantics<parallel>], iteration_bounds = array<i64: 1>, scalar_prefetch = 0 : i64, scratch_operands = 0 : i64, tpu.core_type = #tpu.core_type<tc>, window_params = [{transform_indices = @transform_0, window_bounds = array<i64: 8, 3072>}, {pipeline_mode = #tpu.pipeline_mode<synchronous>, transform_indices = @transform_1, window_bounds = array<i64: 3072, 512>}, {pipeline_mode = #tpu.pipeline_mode<synchronous>, transform_indices = @transform_2, window_bounds = array<i64: 1, 512>}, {pipeline_mode = #tpu.pipeline_mode<synchronous>, transform_indices = @transform_3, window_bounds = array<i64: 512, 32>}, {pipeline_mode = #tpu.pipeline_mode<synchronous>, transform_indices = @transform_4, window_bounds = array<i64: 1, 32>}, {pipeline_mode = #tpu.pipeline_mode<synchronous>, transform_indices = @transform_5, window_bounds = array<i64: 32, 128>}, {pipeline_mode = #tpu.pipeline_mode<synchronous>, transform_indices = @transform_6, window_bounds = array<i64: 1, 128>}, {transform_indices = @transform_7, window_bounds = array<i64: 8, 128>}]} {
    %c0 = arith.constant 0 : index
    %c0_0 = arith.constant 0 : index
    %0 = vector.load %arg1[%c0, %c0_0] : memref<8x3072xf32, #tpu.memory_space<vmem>>, vector<8x3072xf32>
    %c0_1 = arith.constant 0 : index
    %c0_2 = arith.constant 0 : index
    %1 = vector.load %arg2[%c0_1, %c0_2] : memref<3072x512xf32, #tpu.memory_space<vmem>>, vector<3072x512xf32>
    %cst = arith.constant dense<0.000000e+00> : vector<8x512xf32>
    %2 = tpu.matmul %0, %1, %cst {dimension_numbers = #tpu.dot_dimension_numbers<[1], [0], [0], [1], [0, 0, 1, 1], [], []>} : vector<8x3072xf32>, vector<3072x512xf32>, vector<8x512xf32> -> vector<8x512xf32>
    %c0_3 = arith.constant 0 : index
    %c0_4 = arith.constant 0 : index
    %3 = vector.load %arg3[%c0_3, %c0_4] : memref<1x512xf32, #tpu.memory_space<vmem>>, vector<1x512xf32>
    %4 = vector.broadcast %3 : vector<1x512xf32> to vector<8x512xf32>
    %5 = arith.addf %2, %4 : vector<8x512xf32>
    %cst_5 = arith.constant 0.000000e+00 : f32
    %6 = vector.broadcast %cst_5 : f32 to vector<8x512xf32>
    %7 = arith.maximumf %5, %6 : vector<8x512xf32>
    %c0_6 = arith.constant 0 : index
    %c0_7 = arith.constant 0 : index
    %8 = vector.load %arg4[%c0_6, %c0_7] : memref<512x32xf32, #tpu.memory_space<vmem>>, vector<512x32xf32>
    %cst_8 = arith.constant dense<0.000000e+00> : vector<8x32xf32>
    %9 = tpu.matmul %7, %8, %cst_8 {dimension_numbers = #tpu.dot_dimension_numbers<[1], [0], [0], [1], [0, 0, 1, 1], [], []>} : vector<8x512xf32>, vector<512x32xf32>, vector<8x32xf32> -> vector<8x32xf32>
    %c0_9 = arith.constant 0 : index
    %c0_10 = arith.constant 0 : index
    %10 = vector.load %arg5[%c0_9, %c0_10] : memref<1x32xf32, #tpu.memory_space<vmem>>, vector<1x32xf32>
    %11 = vector.broadcast %10 : vector<1x32xf32> to vector<8x32xf32>
    %12 = arith.addf %9, %11 : vector<8x32xf32>
    %cst_11 = arith.constant 0.000000e+00 : f32
    %13 = vector.broadcast %cst_11 : f32 to vector<8x32xf32>
    %14 = arith.maximumf %12, %13 : vector<8x32xf32>
    %c0_12 = arith.constant 0 : index
    %c0_13 = arith.constant 0 : index
    %15 = vector.load %arg6[%c0_12, %c0_13] : memref<32x128xf32, #tpu.memory_space<vmem>>, vector<32x128xf32>
    %cst_14 = arith.constant dense<0.000000e+00> : vector<8x128xf32>
    %16 = tpu.matmul %14, %15, %cst_14 {dimension_numbers = #tpu.dot_dimension_numbers<[1], [0], [0], [1], [0, 0, 1, 1], [], []>} : vector<8x32xf32>, vector<32x128xf32>, vector<8x128xf32> -> vector<8x128xf32>
    %c0_15 = arith.constant 0 : index
    %c0_16 = arith.constant 0 : index
    %17 = vector.load %arg7[%c0_15, %c0_16] : memref<1x128xf32, #tpu.memory_space<vmem>>, vector<1x128xf32>
    %18 = vector.broadcast %17 : vector<1x128xf32> to vector<8x128xf32>
    %19 = arith.addf %16, %18 : vector<8x128xf32>
    %c0_17 = arith.constant 0 : index
    %c0_18 = arith.constant 0 : index
    %20 = vector.load %arg8[%c0_17, %c0_18] : memref<8x128xf32, #tpu.memory_space<vmem>>, vector<8x128xf32>
    tpu.vector_store %arg8[%c0_17, %c0_18], %19 {strides = array<i32>} : memref<8x128xf32, #tpu.memory_space<vmem>>, vector<8x128xf32>,
    return
  }
  func.func @transform_0(%arg0: i32) -> (i32, i32) {
    %c0_i32 = arith.constant 0 : i32
    %c0_i32_0 = arith.constant 0 : i32
    return %arg0, %c0_i32 : i32, i32
  }
  func.func @transform_1(%arg0: i32) -> (i32, i32) {
    %c0_i32 = arith.constant 0 : i32
    %c0_i32_0 = arith.constant 0 : i32
    %c0_i32_1 = arith.constant 0 : i32
    return %c0_i32, %c0_i32_0 : i32, i32
  }
  func.func @transform_2(%arg0: i32) -> (i32, i32) {
    %c0_i32 = arith.constant 0 : i32
    %c0_i32_0 = arith.constant 0 : i32
    %c0_i32_1 = arith.constant 0 : i32
    return %c0_i32, %c0_i32_0 : i32, i32
  }
  func.func @transform_3(%arg0: i32) -> (i32, i32) {
    %c0_i32 = arith.constant 0 : i32
    %c0_i32_0 = arith.constant 0 : i32
    %c0_i32_1 = arith.constant 0 : i32
    return %c0_i32, %c0_i32_0 : i32, i32
  }
  func.func @transform_4(%arg0: i32) -> (i32, i32) {
    %c0_i32 = arith.constant 0 : i32
    %c0_i32_0 = arith.constant 0 : i32
    %c0_i32_1 = arith.constant 0 : i32
    return %c0_i32, %c0_i32_0 : i32, i32
  }
  func.func @transform_5(%arg0: i32) -> (i32, i32) {
    %c0_i32 = arith.constant 0 : i32
    %c0_i32_0 = arith.constant 0 : i32
    %c0_i32_1 = arith.constant 0 : i32
    return %c0_i32, %c0_i32_0 : i32, i32
  }
  func.func @transform_6(%arg0: i32) -> (i32, i32) {
    %c0_i32 = arith.constant 0 : i32
    %c0_i32_0 = arith.constant 0 : i32
    %c0_i32_1 = arith.constant 0 : i32
    return %c0_i32, %c0_i32_0 : i32, i32
  }
  func.func @transform_7(%arg0: i32) -> (i32, i32) {
    %c0_i32 = arith.constant 0 : i32
    %c0_i32_0 = arith.constant 0 : i32
    return %arg0, %c0_i32 : i32, i32
  }
}

</mosaic_0001>

<bundles_post_ra>
// kernel: cifar_conv_forward.1
= control target key start
LH: loop header
LB: loop body
LE: loop exit
PB: predicated region body
PF: predicated region fallthrough
CT: control target
= control target key end

     0   :  { %vm5365_vm0 = vmmov 0   ;;  %vm3539_vm1 = vcmask 261120   ;;  %s10303_s1 = inlined_call_operand.vmem [shape: f32[3072,512], index: 1, kind: input, shape index: {}]   ;;  %s10304_s0 = inlined_call_operand.vmem [shape: f32[8,3072], index: 0, kind: input, shape index: {}]   ;;  %s10305_s3 = inlined_call_operand.vmem [shape: f32[512,32], index: 3, kind: input, shape index: {}]   ;;  %s10306_s2 = inlined_call_operand.vmem [shape: f32[1,512], index: 2, kind: input, shape index: {}]   ;;  %s10307_s5 = inlined_call_operand.vmem [shape: f32[32,128], index: 5, kind: input, shape index: {}]   ;;  %s10308_s4 = inlined_call_operand.vmem [shape: f32[1,32], index: 4, kind: input, shape index: {}]   ;;  %s10309_s6 = inlined_call_operand.vmem [shape: f32[1,128], index: 6, kind: input, shape index: {}]   ;;  %s10310_s7 = inlined_call_operand.vmem [shape: f32[8,128], index: 7, kind: output, shape index: {}]  }
   0x1   :  { %v51_v0 = vld [vmem:[%s10303_s1 + $0x8] sm:$0xff]  ;;  %v53_v2 = vld [vmem:[%s10303_s1 + $0x18] sm:$0xff]  ;;  %v50_v5 = vld [vmem:[%s10303_s1] sm:$0xff] }
   0x2   :  { %v55_v1 = vld [vmem:[%s10303_s1 + $0x28] sm:$0xff]  ;;  %v57_v4 = vld [vmem:[%s10303_s1 + $0x38] sm:$0xff]  ;;  %v54_v6 = vld [vmem:[%s10303_s1 + $0x20] sm:$0xff] }
   0x3   :  { %v3707_v3 = vpack.c.bf16 %v55_v1, %v51_v0  ;;  %v4475_v7 = vpack.c.bf16 %v57_v4, %v53_v2  ;;  %v3709_v8 = vpack.c.bf16 %v54_v6, %v50_v5  ;;  %v52_v9 = vld [vmem:[%s10303_s1 + $0x10] sm:$0xff]  ;;  %v59_v11 = vld [vmem:[%s10303_s1 + $0x48] sm:$0xff]  ;;  %v61_v14 = vld [vmem:[%s10303_s1 + $0x58] sm:$0xff] }
   0x4   :  { %v56_v10 = vld [vmem:[%s10303_s1 + $0x30] sm:$0xff]  ;;  %v63_v13 = vld [vmem:[%s10303_s1 + $0x68] sm:$0xff]  ;;  %v65_v15 = vld [vmem:[%s10303_s1 + $0x78] sm:$0xff] }
   0x5   :  { %3708 = vmatprep.subr.bf16.mxu0 %v3707_v3  ;;  %v4477_v12 = vpack.c.bf16 %v56_v10, %v52_v9  ;;  %4476 = vmatprep.subr.bf16.mxu1 %v4475_v7  ;;  %v3711_v16 = vpack.c.bf16 %v63_v13, %v59_v11  ;;  %v4479_v17 = vpack.c.bf16 %v65_v15, %v61_v14  ;;  %v58_v18 = vld [vmem:[%s10303_s1 + $0x40] sm:$0xff]  ;;  %v60_v20 = vld [vmem:[%s10303_s1 + $0x50] sm:$0xff]  ;;  %v67_v23 = vld [vmem:[%s10303_s1 + $0x88] sm:$0xff] }
   0x6   :  { %3710 = vmatpush1.bf16.msra.mxu0 %v3709_v8  ;;  %v62_v19 = vld [vmem:[%s10303_s1 + $0x60] sm:$0xff]  ;;  %v64_v22 = vld [vmem:[%s10303_s1 + $0x70] sm:$0xff]  ;;  %v71_v24 = vld [vmem:[%s10303_s1 + $0xa8] sm:$0xff] }
   0x7   :  { %4478 = vmatpush1.bf16.msra.mxu1 %v4477_v12  ;;  %v3713_v21 = vpack.c.bf16 %v62_v19, %v58_v18  ;;  %3712 = vmatprep.subr.bf16.mxu0 %v3711_v16  ;;  %v4481_v25 = vpack.c.bf16 %v64_v22, %v60_v20  ;;  %v3715_v26 = vpack.c.bf16 %v71_v24, %v67_v23  ;;  %v69_v27 = vld [vmem:[%s10303_s1 + $0x98] sm:$0xff]  ;;  %v66_v29 = vld [vmem:[%s10303_s1 + $0x80] sm:$0xff]  ;;  %v68_v32 = vld [vmem:[%s10303_s1 + $0x90] sm:$0xff] }
   0x8   :  { %4480 = vmatprep.subr.bf16.mxu1 %v4479_v17  ;;  %v73_v28 = vld [vmem:[%s10303_s1 + $0xb8] sm:$0xff]  ;;  %v70_v31 = vld [vmem:[%s10303_s1 + $0xa0] sm:$0xff]  ;;  %v72_v33 = vld [vmem:[%s10303_s1 + $0xb0] sm:$0xff] }
   0x9   :  { %v4483_v30 = vpack.c.bf16 %v73_v28, %v69_v27  ;;  %v3717_v34 = vpack.c.bf16 %v70_v31, %v66_v29  ;;  %v75_v35 = vld [vmem:[%s10303_s1 + $0xc8] sm:$0xff]  ;;  %v77_v37 = vld [vmem:[%s10303_s1 + $0xd8] sm:$0xff]  ;;  %v4485_v38 = vpack.c.bf16 %v72_v33, %v68_v32  ;;  %v74_v41 = vld [vmem:[%s10303_s1 + $0xc0] sm:$0xff] }
   0xa   :  { %3714 = vmatpush1.bf16.msra.mxu0 %v3713_v21  ;;  %v79_v36 = vld [vmem:[%s10303_s1 + $0xe8] sm:$0xff]  ;;  %v81_v40 = vld [vmem:[%s10303_s1 + $0xf8] sm:$0xff]  ;;  %v78_v42 = vld [vmem:[%s10303_s1 + $0xe0] sm:$0xff] }
   0xb   :  { %4482 = vmatpush1.bf16.msra.mxu1 %v4481_v25  ;;  %3716 = vmatprep.subr.bf16.mxu0 %v3715_v26  ;;  %v3719_v39 = vpack.c.bf16 %v79_v36, %v75_v35  ;;  %v4487_v43 = vpack.c.bf16 %v81_v40, %v77_v37  ;;  %v76_v44 = vld [vmem:[%s10303_s1 + $0xd0] sm:$0xff]  ;;  %v83_v46 = vld [vmem:[%s10303_s1 + $0x108] sm:$0xff]  ;;  %v85_v48 = vld [vmem:[%s10303_s1 + $0x118] sm:$0xff]  ;;  %v3721_v50 = vpack.c.bf16 %v78_v42, %v74_v41 }
   0xc   :  { %4484 = vmatprep.subr.bf16.mxu1 %v4483_v30  ;;  %v80_v45 = vld [vmem:[%s10303_s1 + $0xf0] sm:$0xff]  ;;  %v87_v47 = vld [vmem:[%s10303_s1 + $0x128] sm:$0xff]  ;;  %v89_v49 = vld [vmem:[%s10303_s1 + $0x138] sm:$0xff] }
   0xd   :  { %v4489_v51 = vpack.c.bf16 %v80_v45, %v76_v44  ;;  %v3723_v52 = vpack.c.bf16 %v87_v47, %v83_v46  ;;  %v82_v53 = vld [vmem:[%s10303_s1 + $0x100] sm:$0xff]  ;;  %v84_v55 = vld [vmem:[%s10303_s1 + $0x110] sm:$0xff]  ;;  %v4491_v56 = vpack.c.bf16 %v89_v49, %v85_v48  ;;  %v91_v58 = vld [vmem:[%s10303_s1 + $0x148] sm:$0xff] }
   0xe   :  { %3718 = vmatpush1.bf16.msra.mxu0 %v3717_v34  ;;  %v86_v54 = vld [vmem:[%s10303_s1 + $0x120] sm:$0xff]  ;;  %v88_v57 = vld [vmem:[%s10303_s1 + $0x130] sm:$0xff]  ;;  %v95_v59 = vld [vmem:[%s10303_s1 + $0x168] sm:$0xff] }
   0xf   :  { %4486 = vmatpush1.bf16.msra.mxu1 %v4485_v38  ;;  %3720 = vmatprep.subr.bf16.mxu0 %v3719_v39  ;;  %v93_v60 = vld [vmem:[%s10303_s1 + $0x158] sm:$0xff]  ;;  %v3725_v62 = vpack.c.bf16 %v86_v54, %v82_v53  ;;  %v4493_v63 = vpack.c.bf16 %v88_v57, %v84_v55  ;;  %v3727_v0 = vpack.c.bf16 %v95_v59, %v91_v58  ;;  %v90_v1 = vld [vmem:[%s10303_s1 + $0x140] sm:$0xff]  ;;  %v92_v3 = vld [vmem:[%s10303_s1 + $0x150] sm:$0xff] }
  0x10   :  { %4488 = vmatprep.subr.bf16.mxu1 %v4487_v43  ;;  %v97_v61 = vld [vmem:[%s10303_s1 + $0x178] sm:$0xff]  ;;  %v94_v2 = vld [vmem:[%s10303_s1 + $0x160] sm:$0xff]  ;;  %v96_v5 = vld [vmem:[%s10303_s1 + $0x170] sm:$0xff] }
  0x11   :  { %v4495_v4 = vpack.c.bf16 %v97_v61, %v93_v60  ;;  %v99_v6 = vld [vmem:[%s10303_s1 + $0x188] sm:$0xff]  ;;  %v101_v8 = vld [vmem:[%s10303_s1 + $0x198] sm:$0xff]  ;;  %v3729_v10 = vpack.c.bf16 %v94_v2, %v90_v1  ;;  %v4497_v11 = vpack.c.bf16 %v96_v5, %v92_v3  ;;  %v98_v13 = vld [vmem:[%s10303_s1 + $0x180] sm:$0xff] }
  0x12   :  { %3722 = vmatpush1.bf16.msra.mxu0 %v3721_v50  ;;  %v103_v7 = vld [vmem:[%s10303_s1 + $0x1a8] sm:$0xff]  ;;  %v105_v9 = vld [vmem:[%s10303_s1 + $0x1b8] sm:$0xff]  ;;  %v102_v14 = vld [vmem:[%s10303_s1 + $0x1a0] sm:$0xff] }
  0x13   :  { %4490 = vmatpush1.bf16.msra.mxu1 %v4489_v51  ;;  %3724 = vmatprep.subr.bf16.mxu0 %v3723_v52  ;;  %v3731_v12 = vpack.c.bf16 %v103_v7, %v99_v6  ;;  %v100_v15 = vld [vmem:[%s10303_s1 + $0x190] sm:$0xff]  ;;  %v4499_v16 = vpack.c.bf16 %v105_v9, %v101_v8  ;;  %v107_v18 = vld [vmem:[%s10303_s1 + $0x1c8] sm:$0xff]  ;;  %v109_v20 = vld [vmem:[%s10303_s1 + $0x1d8] sm:$0xff]  ;;  %v3733_v22 = vpack.c.bf16 %v102_v14, %v98_v13 }
  0x14   :  { %4492 = vmatprep.subr.bf16.mxu1 %v4491_v56  ;;  %v104_v17 = vld [vmem:[%s10303_s1 + $0x1b0] sm:$0xff]  ;;  %v111_v19 = vld [vmem:[%s10303_s1 + $0x1e8] sm:$0xff]  ;;  %v113_v21 = vld [vmem:[%s10303_s1 + $0x1f8] sm:$0xff] }
  0x15   :  { %v4501_v23 = vpack.c.bf16 %v104_v17, %v100_v15  ;;  %v3735_v24 = vpack.c.bf16 %v111_v19, %v107_v18  ;;  %v106_v25 = vld [vmem:[%s10303_s1 + $0x1c0] sm:$0xff]  ;;  %v108_v27 = vld [vmem:[%s10303_s1 + $0x1d0] sm:$0xff]  ;;  %v4503_v28 = vpack.c.bf16 %v113_v21, %v109_v20  ;;  %v115_v30 = vld [vmem:[%s10303_s1 + $0x208] sm:$0xff] }
  0x16   :  { %3726 = vmatpush1.bf16.msra.mxu0 %v3725_v62  ;;  %v110_v26 = vld [vmem:[%s10303_s1 + $0x1e0] sm:$0xff]  ;;  %v112_v29 = vld [vmem:[%s10303_s1 + $0x1f0] sm:$0xff]  ;;  %v119_v31 = vld [vmem:[%s10303_s1 + $0x228] sm:$0xff] }
  0x17   :  { %4494 = vmatpush1.bf16.msra.mxu1 %v4493_v63  ;;  %3728 = vmatprep.subr.bf16.mxu0 %v3727_v0  ;;  %v117_v32 = vld [vmem:[%s10303_s1 + $0x218] sm:$0xff]  ;;  %v3737_v34 = vpack.c.bf16 %v110_v26, %v106_v25  ;;  %v4505_v35 = vpack.c.bf16 %v112_v29, %v108_v27  ;;  %v3739_v36 = vpack.c.bf16 %v119_v31, %v115_v30  ;;  %v114_v37 = vld [vmem:[%s10303_s1 + $0x200] sm:$0xff]  ;;  %v116_v39 = vld [vmem:[%s10303_s1 + $0x210] sm:$0xff] }
  0x18   :  { %4496 = vmatprep.subr.bf16.mxu1 %v4495_v4  ;;  %v121_v33 = vld [vmem:[%s10303_s1 + $0x238] sm:$0xff]  ;;  %v118_v38 = vld [vmem:[%s10303_s1 + $0x220] sm:$0xff]  ;;  %v120_v41 = vld [vmem:[%s10303_s1 + $0x230] sm:$0xff] }
  0x19   :  { %v4507_v40 = vpack.c.bf16 %v121_v33, %v117_v32  ;;  %v123_v42 = vld [vmem:[%s10303_s1 + $0x248] sm:$0xff]  ;;  %v125_v44 = vld [vmem:[%s10303_s1 + $0x258] sm:$0xff]  ;;  %v3741_v46 = vpack.c.bf16 %v118_v38, %v114_v37  ;;  %v4509_v47 = vpack.c.bf16 %v120_v41, %v116_v39  ;;  %v122_v49 = vld [vmem:[%s10303_s1 + $0x240] sm:$0xff] }
  0x1a   :  { %3730 = vmatpush1.bf16.msra.mxu0 %v3729_v10  ;;  %v127_v43 = vld [vmem:[%s10303_s1 + $0x268] sm:$0xff]  ;;  %v129_v45 = vld [vmem:[%s10303_s1 + $0x278] sm:$0xff]  ;;  %v126_v50 = vld [vmem:[%s10303_s1 + $0x260] sm:$0xff] }
  0x1b   :  { %4498 = vmatpush1.bf16.msra.mxu1 %v4497_v11  ;;  %3732 = vmatprep.subr.bf16.mxu0 %v3731_v12  ;;  %v3743_v48 = vpack.c.bf16 %v127_v43, %v123_v42  ;;  %v124_v51 = vld [vmem:[%s10303_s1 + $0x250] sm:$0xff]  ;;  %v4511_v52 = vpack.c.bf16 %v129_v45, %v125_v44  ;;  %v131_v54 = vld [vmem:[%s10303_s1 + $0x288] sm:$0xff]  ;;  %v133_v56 = vld [vmem:[%s10303_s1 + $0x298] sm:$0xff]  ;;  %v3745_v58 = vpack.c.bf16 %v126_v50, %v122_v49 }
  0x1c   :  { %4500 = vmatprep.subr.bf16.mxu1 %v4499_v16  ;;  %v128_v53 = vld [vmem:[%s10303_s1 + $0x270] sm:$0xff]  ;;  %v135_v55 = vld [vmem:[%s10303_s1 + $0x2a8] sm:$0xff]  ;;  %v137_v57 = vld [vmem:[%s10303_s1 + $0x2b8] sm:$0xff] }
  0x1d   :  { %v4513_v59 = vpack.c.bf16 %v128_v53, %v124_v51  ;;  %v3747_v60 = vpack.c.bf16 %v135_v55, %v131_v54  ;;  %v130_v61 = vld [vmem:[%s10303_s1 + $0x280] sm:$0xff]  ;;  %v132_v63 = vld [vmem:[%s10303_s1 + $0x290] sm:$0xff]  ;;  %v4515_v0 = vpack.c.bf16 %v137_v57, %v133_v56  ;;  %v139_v2 = vld [vmem:[%s10303_s1 + $0x2c8] sm:$0xff] }
  0x1e   :  { %3734 = vmatpush1.bf16.msra.mxu0 %v3733_v22  ;;  %v134_v62 = vld [vmem:[%s10303_s1 + $0x2a0] sm:$0xff]  ;;  %v136_v1 = vld [vmem:[%s10303_s1 + $0x2b0] sm:$0xff]  ;;  %v143_v3 = vld [vmem:[%s10303_s1 + $0x2e8] sm:$0xff] }
  0x1f   :  { %4502 = vmatpush1.bf16.msra.mxu1 %v4501_v23  ;;  %3736 = vmatprep.subr.bf16.mxu0 %v3735_v24  ;;  %v141_v4 = vld [vmem:[%s10303_s1 + $0x2d8] sm:$0xff]  ;;  %v3749_v6 = vpack.c.bf16 %v134_v62, %v130_v61  ;;  %v138_v7 = vld [vmem:[%s10303_s1 + $0x2c0] sm:$0xff]  ;;  %v4517_v8 = vpack.c.bf16 %v136_v1, %v132_v63  ;;  %v3751_v9 = vpack.c.bf16 %v143_v3, %v139_v2  ;;  %v140_v11 = vld [vmem:[%s10303_s1 + $0x2d0] sm:$0xff] }
  0x20   :  { %4504 = vmatprep.subr.bf16.mxu1 %v4503_v28  ;;  %v145_v5 = vld [vmem:[%s10303_s1 + $0x2f8] sm:$0xff]  ;;  %v142_v10 = vld [vmem:[%s10303_s1 + $0x2e0] sm:$0xff]  ;;  %v144_v12 = vld [vmem:[%s10303_s1 + $0x2f0] sm:$0xff] }
  0x21   :  { %v4519_v13 = vpack.c.bf16 %v145_v5, %v141_v4  ;;  %v147_v14 = vld [vmem:[%s10303_s1 + $0x308] sm:$0xff]  ;;  %v149_v17 = vld [vmem:[%s10303_s1 + $0x318] sm:$0xff]  ;;  %v3753_v19 = vpack.c.bf16 %v142_v10, %v138_v7  ;;  %v4521_v20 = vpack.c.bf16 %v144_v12, %v140_v11  ;;  %v146_v22 = vld [vmem:[%s10303_s1 + $0x300] sm:$0xff] }
  0x22   :  { %3738 = vmatpush1.bf16.msra.mxu0 %v3737_v34  ;;  %v151_v15 = vld [vmem:[%s10303_s1 + $0x328] sm:$0xff]  ;;  %v153_v18 = vld [vmem:[%s10303_s1 + $0x338] sm:$0xff]  ;;  %v150_v23 = vld [vmem:[%s10303_s1 + $0x320] sm:$0xff] }
  0x23   :  { %4506 = vmatpush1.bf16.msra.mxu1 %v4505_v35  ;;  %3740 = vmatprep.subr.bf16.mxu0 %v3739_v36  ;;  %v27_v16 = vld [vmem:[%s10304_s0 + $0x8] sm:$0xff]  ;;  %v3755_v21 = vpack.c.bf16 %v151_v15, %v147_v14  ;;  %v148_v24 = vld [vmem:[%s10303_s1 + $0x310] sm:$0xff]  ;;  %v4523_v25 = vpack.c.bf16 %v153_v18, %v149_v17  ;;  %v157_v29 = vld [vmem:[%s10303_s1 + $0x358] sm:$0xff]  ;;  %v3757_v31 = vpack.c.bf16 %v150_v23, %v146_v22 }
  0x24   :  { %4508 = vmatprep.subr.bf16.mxu1 %v4507_v40  ;;  %1672 = vmatprep.mubr.f32.mxu0 %v27_v16  ;;  %v152_v26 = vld [vmem:[%s10303_s1 + $0x330] sm:$0xff]  ;;  %v155_v27 = vld [vmem:[%s10303_s1 + $0x348] sm:$0xff]  ;;  %v161_v30 = vld [vmem:[%s10303_s1 + $0x378] sm:$0xff] }
  0x25   :  { %2524 = vmatprep.mubr.f32.mxu1 %v27_v16  ;;  %v159_v28 = vld [vmem:[%s10303_s1 + $0x368] sm:$0xff]  ;;  %v4525_v32 = vpack.c.bf16 %v152_v26, %v148_v24  ;;  %v154_v34 = vld [vmem:[%s10303_s1 + $0x340] sm:$0xff]  ;;  %v156_v36 = vld [vmem:[%s10303_s1 + $0x350] sm:$0xff]  ;;  %v4527_v37 = vpack.c.bf16 %v161_v30, %v157_v29 }
  0x26   :  { %3742 = vmatpush1.bf16.msra.mxu0 %v3741_v46  ;;  %v3759_v33 = vpack.c.bf16 %v159_v28, %v155_v27  ;;  %v158_v35 = vld [vmem:[%s10303_s1 + $0x360] sm:$0xff]  ;;  %v160_v38 = vld [vmem:[%s10303_s1 + $0x370] sm:$0xff]  ;;  %v163_v39 = vld [vmem:[%s10303_s1 + $0x388] sm:$0xff] }
  0x27   :  { %4510 = vmatpush1.bf16.msra.mxu1 %v4509_v47  ;;  %3744 = vmatprep.subr.bf16.mxu0 %v3743_v48  ;;  %v167_v40 = vld [vmem:[%s10303_s1 + $0x3a8] sm:$0xff]  ;;  %v165_v41 = vld [vmem:[%s10303_s1 + $0x398] sm:$0xff]  ;;  %v3761_v43 = vpack.c.bf16 %v158_v35, %v154_v34  ;;  %v4529_v44 = vpack.c.bf16 %v160_v38, %v156_v36  ;;  %v162_v46 = vld [vmem:[%s10303_s1 + $0x380] sm:$0xff] }
  0x28   :  { %4512 = vmatprep.subr.bf16.mxu1 %v4511_v52  ;;  %v169_v42 = vld [vmem:[%s10303_s1 + $0x3b8] sm:$0xff]  ;;  %v3763_v45 = vpack.c.bf16 %v167_v40, %v163_v39  ;;  %v166_v47 = vld [vmem:[%s10303_s1 + $0x3a0] sm:$0xff]  ;;  %v164_v48 = vld [vmem:[%s10303_s1 + $0x390] sm:$0xff] }
  0x29   :  { %v4531_v49 = vpack.c.bf16 %v169_v42, %v165_v41  ;;  %v168_v50 = vld [vmem:[%s10303_s1 + $0x3b0] sm:$0xff]  ;;  %v171_v51 = vld [vmem:[%s10303_s1 + $0x3c8] sm:$0xff]  ;;  %v173_v53 = vld [vmem:[%s10303_s1 + $0x3d8] sm:$0xff]  ;;  %v3765_v55 = vpack.c.bf16 %v166_v47, %v162_v46 }
  0x2a   :  { %3746 = vmatpush1.bf16.msra.mxu0 %v3745_v58  ;;  %v175_v52 = vld [vmem:[%s10303_s1 + $0x3e8] sm:$0xff]  ;;  %v177_v54 = vld [vmem:[%s10303_s1 + $0x3f8] sm:$0xff]  ;;  %v4533_v56 = vpack.c.bf16 %v168_v50, %v164_v48  ;;  %v170_v58 = vld [vmem:[%s10303_s1 + $0x3c0] sm:$0xff] }
  0x2b   :  { %4514 = vmatpush1.bf16.msra.mxu1 %v4513_v59  ;;  %3748 = vmatprep.subr.bf16.mxu0 %v3747_v60  ;;  %v3767_v57 = vpack.c.bf16 %v175_v52, %v171_v51  ;;  %v174_v59 = vld [vmem:[%s10303_s1 + $0x3e0] sm:$0xff]  ;;  %v172_v60 = vld [vmem:[%s10303_s1 + $0x3d0] sm:$0xff]  ;;  %v4535_v61 = vpack.c.bf16 %v177_v54, %v173_v53  ;;  %v179_v63 = vld [vmem:[%s10303_s1 + $0x408] sm:$0xff] }
  0x2c   :  { %4516 = vmatprep.subr.bf16.mxu1 %v4515_v0  ;;  %v176_v62 = vld [vmem:[%s10303_s1 + $0x3f0] sm:$0xff]  ;;  %v183_v0 = vld [vmem:[%s10303_s1 + $0x428] sm:$0xff]  ;;  %v181_v1 = vld [vmem:[%s10303_s1 + $0x418] sm:$0xff]  ;;  %v3769_v3 = vpack.c.bf16 %v174_v59, %v170_v58 }
  0x2d   :  { %v185_v2 = vld [vmem:[%s10303_s1 + $0x438] sm:$0xff]  ;;  %v4537_v4 = vpack.c.bf16 %v176_v62, %v172_v60  ;;  %v3771_v5 = vpack.c.bf16 %v183_v0, %v179_v63  ;;  %v182_v7 = vld [vmem:[%s10303_s1 + $0x420] sm:$0xff]  ;;  %v184_v10 = vld [vmem:[%s10303_s1 + $0x430] sm:$0xff] }
  0x2e   :  { %3750 = vmatpush1.bf16.msra.mxu0 %v3749_v6  ;;  %v178_v6 = vld [vmem:[%s10303_s1 + $0x400] sm:$0xff]  ;;  %v187_v11 = vld [vmem:[%s10303_s1 + $0x448] sm:$0xff]  ;;  %v193_v14 = vld [vmem:[%s10303_s1 + $0x478] sm:$0xff] }
  0x2f   :  { %4518 = vmatpush1.bf16.msra.mxu1 %v4517_v8  ;;  %3752 = vmatprep.subr.bf16.mxu0 %v3751_v9  ;;  %v180_v8 = vld [vmem:[%s10303_s1 + $0x410] sm:$0xff]  ;;  %v4539_v9 = vpack.c.bf16 %v185_v2, %v181_v1  ;;  %v191_v12 = vld [vmem:[%s10303_s1 + $0x468] sm:$0xff]  ;;  %v26_v15 = vld [vmem:[%s10304_s0] sm:$0xff]  ;;  %v3773_v16 = vpack.c.bf16 %v182_v7, %v178_v6 }
  0x30   :  { %4520 = vmatprep.subr.bf16.mxu1 %v4519_v13  ;;  %v189_v13 = vld [vmem:[%s10303_s1 + $0x458] sm:$0xff]  ;;  %v4541_v17 = vpack.c.bf16 %v184_v10, %v180_v8  ;;  %v3775_v18 = vpack.c.bf16 %v191_v12, %v187_v11  ;;  %v192_v23 = vld [vmem:[%s10303_s1 + $0x470] sm:$0xff]  ;;  %v195_v24 = vld [vmem:[%s10303_s1 + $0x488] sm:$0xff] }
  0x31   :  { %v4543_v22 = vpack.c.bf16 %v193_v14, %v189_v13  ;;  %v197_v26 = vld [vmem:[%s10303_s1 + $0x498] sm:$0xff]  ;;  %v200_v35 = vld [vmem:[%s10303_s1 + $0x4b0] sm:$0xff]  ;;  %v203_v36 = vld [vmem:[%s10303_s1 + $0x4c8] sm:$0xff] }
  0x32   :  { %3754 = vmatpush1.bf16.msra.mxu0 %v3753_v19  ;;  %v186_v19 = vld [vmem:[%s10303_s1 + $0x440] sm:$0xff]  ;;  %v201_v27 = vld [vmem:[%s10303_s1 + $0x4b8] sm:$0xff]  ;;  %v208_v47 = vld [vmem:[%s10303_s1 + $0x4f0] sm:$0xff] }
  0x33   :  { %4522 = vmatpush1.bf16.msra.mxu1 %v4521_v20  ;;  %3756 = vmatprep.subr.bf16.mxu0 %v3755_v21  ;;  %v190_v20 = vld [vmem:[%s10303_s1 + $0x460] sm:$0xff]  ;;  %v188_v21 = vld [vmem:[%s10303_s1 + $0x450] sm:$0xff]  ;;  %v4547_v34 = vpack.c.bf16 %v201_v27, %v197_v26  ;;  %v205_v38 = vld [vmem:[%s10303_s1 + $0x4d8] sm:$0xff] }
  0x34   :  { %4524 = vmatprep.subr.bf16.mxu1 %v4523_v25  ;;  %v199_v25 = vld [vmem:[%s10303_s1 + $0x4a8] sm:$0xff]  ;;  %v3777_v28 = vpack.c.bf16 %v190_v20, %v186_v19  ;;  %v4545_v29 = vpack.c.bf16 %v192_v23, %v188_v21  ;;  %v209_v39 = vld [vmem:[%s10303_s1 + $0x4f8] sm:$0xff]  ;;  %v216_v59 = vld [vmem:[%s10303_s1 + $0x530] sm:$0xff] }
  0x35   :  { %v3779_v30 = vpack.c.bf16 %v199_v25, %v195_v24  ;;  %v4551_v46 = vpack.c.bf16 %v209_v39, %v205_v38  ;;  %v211_v48 = vld [vmem:[%s10303_s1 + $0x508] sm:$0xff]  ;;  %v213_v50 = vld [vmem:[%s10303_s1 + $0x518] sm:$0xff]  ;;  %v224_v7 = vld [vmem:[%s10303_s1 + $0x570] sm:$0xff] }
  0x36   :  { %3758 = vmatpush1.bf16.msra.mxu0 %v3757_v31  ;;  %v194_v31 = vld [vmem:[%s10303_s1 + $0x480] sm:$0xff]  ;;  %v217_v51 = vld [vmem:[%s10303_s1 + $0x538] sm:$0xff]  ;;  %v219_v60 = vld [vmem:[%s10303_s1 + $0x548] sm:$0xff] }
  0x37   :  { %4526 = vmatpush1.bf16.msra.mxu1 %v4525_v32  ;;  %3760 = vmatprep.subr.bf16.mxu0 %v3759_v33  ;;  %v198_v32 = vld [vmem:[%s10303_s1 + $0x4a0] sm:$0xff]  ;;  %v196_v33 = vld [vmem:[%s10303_s1 + $0x490] sm:$0xff]  ;;  %v4555_v58 = vpack.c.bf16 %v217_v51, %v213_v50  ;;  %v221_v62 = vld [vmem:[%s10303_s1 + $0x558] sm:$0xff] }
  0x38   :  { %4528 = vmatprep.subr.bf16.mxu1 %v4527_v37  ;;  %v207_v37 = vld [vmem:[%s10303_s1 + $0x4e8] sm:$0xff]  ;;  %v3781_v40 = vpack.c.bf16 %v198_v32, %v194_v31  ;;  %v4549_v41 = vpack.c.bf16 %v200_v35, %v196_v33  ;;  %v225_v63 = vld [vmem:[%s10303_s1 + $0x578] sm:$0xff]  ;;  %v226_v13 = vld [vmem:[%s10303_s1 + $0x580] sm:$0xff] }
  0x39   :  { %v3783_v42 = vpack.c.bf16 %v207_v37, %v203_v36  ;;  %v4559_v6 = vpack.c.bf16 %v225_v63, %v221_v62  ;;  %v227_v8 = vld [vmem:[%s10303_s1 + $0x588] sm:$0xff]  ;;  %v229_v10 = vld [vmem:[%s10303_s1 + $0x598] sm:$0xff]  ;;  %v240_v32 = vld [vmem:[%s10303_s1 + $0x5f0] sm:$0xff] }
  0x3a   :  { %3762 = vmatpush1.bf16.msra.mxu0 %v3761_v43  ;;  %v202_v43 = vld [vmem:[%s10303_s1 + $0x4c0] sm:$0xff]  ;;  %v233_v11 = vld [vmem:[%s10303_s1 + $0x5b8] sm:$0xff]  ;;  %v235_v20 = vld [vmem:[%s10303_s1 + $0x5c8] sm:$0xff] }
  0x3b   :  { %4530 = vmatpush1.bf16.msra.mxu1 %v4529_v44  ;;  %3764 = vmatprep.subr.bf16.mxu0 %v3763_v45  ;;  %v206_v44 = vld [vmem:[%s10303_s1 + $0x4e0] sm:$0xff]  ;;  %v204_v45 = vld [vmem:[%s10303_s1 + $0x4d0] sm:$0xff]  ;;  %v4563_v19 = vpack.c.bf16 %v233_v11, %v229_v10  ;;  %v239_v21 = vld [vmem:[%s10303_s1 + $0x5e8] sm:$0xff] }
  0x3c   :  { %4532 = vmatprep.subr.bf16.mxu1 %v4531_v49  ;;  %v215_v49 = vld [vmem:[%s10303_s1 + $0x528] sm:$0xff]  ;;  %v3785_v52 = vpack.c.bf16 %v206_v44, %v202_v43  ;;  %v4553_v53 = vpack.c.bf16 %v208_v47, %v204_v45  ;;  %v237_v23 = vld [vmem:[%s10303_s1 + $0x5d8] sm:$0xff]  ;;  %v3799_v27 = vpack.c.bf16 %v239_v21, %v235_v20  ;;  %v248_v44 = vld [vmem:[%s10303_s1 + $0x630] sm:$0xff] }
  0x3d   :  { %v3787_v54 = vpack.c.bf16 %v215_v49, %v211_v48  ;;  %v241_v24 = vld [vmem:[%s10303_s1 + $0x5f8] sm:$0xff]  ;;  %v243_v33 = vld [vmem:[%s10303_s1 + $0x608] sm:$0xff] }
  0x3e   :  { %3766 = vmatpush1.bf16.msra.mxu0 %v3765_v55  ;;  %v210_v55 = vld [vmem:[%s10303_s1 + $0x500] sm:$0xff]  ;;  %v4567_v31 = vpack.c.bf16 %v241_v24, %v237_v23  ;;  %v245_v35 = vld [vmem:[%s10303_s1 + $0x618] sm:$0xff]  ;;  %v251_v45 = vld [vmem:[%s10303_s1 + $0x648] sm:$0xff] }
  0x3f   :  { %4534 = vmatpush1.bf16.msra.mxu1 %v4533_v56  ;;  %3768 = vmatprep.subr.bf16.mxu0 %v3767_v57  ;;  %v214_v56 = vld [vmem:[%s10303_s1 + $0x520] sm:$0xff]  ;;  %v212_v57 = vld [vmem:[%s10303_s1 + $0x510] sm:$0xff]  ;;  %v249_v36 = vld [vmem:[%s10303_s1 + $0x638] sm:$0xff] }
  0x40   :  { %4536 = vmatprep.subr.bf16.mxu1 %v4535_v61  ;;  %v223_v61 = vld [vmem:[%s10303_s1 + $0x568] sm:$0xff]  ;;  %v3789_v0 = vpack.c.bf16 %v214_v56, %v210_v55  ;;  %v4557_v1 = vpack.c.bf16 %v216_v59, %v212_v57  ;;  %v4571_v43 = vpack.c.bf16 %v249_v36, %v245_v35  ;;  %v253_v47 = vld [vmem:[%s10303_s1 + $0x658] sm:$0xff]  ;;  %v256_v56 = vld [vmem:[%s10303_s1 + $0x670] sm:$0xff] }
  0x41   :  { %v3791_v2 = vpack.c.bf16 %v223_v61, %v219_v60  ;;  %v257_v48 = vld [vmem:[%s10303_s1 + $0x678] sm:$0xff]  ;;  %v259_v57 = vld [vmem:[%s10303_s1 + $0x688] sm:$0xff]  ;;  %v274_v24 = vld [vmem:[%s10303_s1 + $0x700] sm:$0xff] }
  0x42   :  { %3770 = vmatpush1.bf16.msra.mxu0 %v3769_v3  ;;  %v218_v3 = vld [vmem:[%s10303_s1 + $0x540] sm:$0xff]  ;;  %v4575_v55 = vpack.c.bf16 %v257_v48, %v253_v47  ;;  %v261_v59 = vld [vmem:[%s10303_s1 + $0x698] sm:$0xff] }
  0x43   :  { %4538 = vmatpush1.bf16.msra.mxu1 %v4537_v4  ;;  %3772 = vmatprep.subr.bf16.mxu0 %v3771_v5  ;;  %v222_v4 = vld [vmem:[%s10303_s1 + $0x560] sm:$0xff]  ;;  %v220_v5 = vld [vmem:[%s10303_s1 + $0x550] sm:$0xff]  ;;  %v265_v60 = vld [vmem:[%s10303_s1 + $0x6b8] sm:$0xff] }
  0x44   :  { %4540 = vmatprep.subr.bf16.mxu1 %v4539_v9  ;;  %v231_v9 = vld [vmem:[%s10303_s1 + $0x5a8] sm:$0xff]  ;;  %v3793_v12 = vpack.c.bf16 %v222_v4, %v218_v3  ;;  %v4561_v14 = vpack.c.bf16 %v224_v7, %v220_v5  ;;  %v4579_v3 = vpack.c.bf16 %v265_v60, %v261_v59  ;;  %v264_v4 = vld [vmem:[%s10303_s1 + $0x6b0] sm:$0xff]  ;;  %v269_v7 = vld [vmem:[%s10303_s1 + $0x6d8] sm:$0xff] }
  0x45   :  { %1673 = vmatmul.mubr.f32.vlgmr.msra.gmra.mrb[0].mxu0 %v26_v15  ;;  %v267_v5 = vld [vmem:[%s10303_s1 + $0x6c8] sm:$0xff]  ;;  %v281_v20 = vld [vmem:[%s10303_s1 + $0x738] sm:$0xff]  ;;  %v282_v36 = vld [vmem:[%s10303_s1 + $0x740] sm:$0xff] }
  0x46   :  { %3774 = vmatpush1.bf16.msra.mxu0 %v3773_v16  ;;  %2525 = vmatmul.mubr.f32.vlgmr.msra.gmra.mrb[0].mxu1 %v26_v15  ;;  %v3795_v15 = vpack.c.bf16 %v231_v9, %v227_v8  ;;  %v230_v16 = vld [vmem:[%s10303_s1 + $0x5a0] sm:$0xff]  ;;  %v273_v8 = vld [vmem:[%s10303_s1 + $0x6f8] sm:$0xff] }
  0x47   :  { %4542 = vmatpush1.bf16.msra.mxu1 %v4541_v17  ;;  %3776 = vmatprep.subr.bf16.mxu0 %v3775_v18  ;;  %v228_v17 = vld [vmem:[%s10303_s1 + $0x590] sm:$0xff]  ;;  %v3797_v25 = vpack.c.bf16 %v230_v16, %v226_v13  ;;  %v270_v13 = vld [vmem:[%s10303_s1 + $0x6e0] sm:$0xff] }
  0x48   :  { %4544 = vmatprep.subr.bf16.mxu1 %v4543_v22  ;;  %v232_v18 = vld [vmem:[%s10303_s1 + $0x5b0] sm:$0xff]  ;;  %v29_v22 = vld [vmem:[%s10304_s0 + $0x18] sm:$0xff]  ;;  %v290_v48 = vld [vmem:[%s10303_s1 + $0x780] sm:$0xff] }
  0x49   :  { %1743 = vmatprep.mubr.f32.mxu0 %v29_v22  ;;  %2595 = vmatprep.mubr.f32.mxu1 %v29_v22  ;;  %v4565_v26 = vpack.c.bf16 %v232_v18, %v228_v17  ;;  %v272_v16 = vld [vmem:[%s10303_s1 + $0x6f0] sm:$0xff]  ;;  %v275_v17 = vld [vmem:[%s10303_s1 + $0x708] sm:$0xff]  ;;  %v298_v60 = vld [vmem:[%s10303_s1 + $0x7c0] sm:$0xff] }
  0x4a   :  { %3778 = vmatpush1.bf16.msra.mxu0 %v3777_v28  ;;  %v234_v28 = vld [vmem:[%s10303_s1 + $0x5c0] sm:$0xff]  ;;  %v279_v18 = vld [vmem:[%s10303_s1 + $0x728] sm:$0xff] }
  0x4b   :  { %4546 = vmatpush1.bf16.msra.mxu1 %v4545_v29  ;;  %3780 = vmatprep.subr.bf16.mxu0 %v3779_v30  ;;  %v238_v29 = vld [vmem:[%s10303_s1 + $0x5e0] sm:$0xff]  ;;  %v236_v30 = vld [vmem:[%s10303_s1 + $0x5d0] sm:$0xff]  ;;  %v3819_v23 = vpack.c.bf16 %v279_v18, %v275_v17 }
  0x4c   :  { %4548 = vmatprep.subr.bf16.mxu1 %v4547_v34  ;;  %v247_v34 = vld [vmem:[%s10303_s1 + $0x628] sm:$0xff]  ;;  %v3801_v37 = vpack.c.bf16 %v238_v29, %v234_v28  ;;  %v4569_v38 = vpack.c.bf16 %v240_v32, %v236_v30  ;;  %v280_v28 = vld [vmem:[%s10303_s1 + $0x730] sm:$0xff]  ;;  %v289_v32 = vld [vmem:[%s10303_s1 + $0x778] sm:$0xff] }
  0x4d   :  { %v3803_v39 = vpack.c.bf16 %v247_v34, %v243_v33  ;;  %v283_v29 = vld [vmem:[%s10303_s1 + $0x748] sm:$0xff]  ;;  %v28_v17 = vld [vmem:[%s10304_s0 + $0x10] sm:$0xff] }
  0x4e   :  { %3782 = vmatpush1.bf16.msra.mxu0 %v3781_v40  ;;  %v242_v40 = vld [vmem:[%s10303_s1 + $0x600] sm:$0xff]  ;;  %v287_v30 = vld [vmem:[%s10303_s1 + $0x768] sm:$0xff] }
  0x4f   :  { %4550 = vmatpush1.bf16.msra.mxu1 %v4549_v41  ;;  %3784 = vmatprep.subr.bf16.mxu0 %v3783_v42  ;;  %v246_v41 = vld [vmem:[%s10303_s1 + $0x620] sm:$0xff]  ;;  %v244_v42 = vld [vmem:[%s10303_s1 + $0x610] sm:$0xff]  ;;  %v3823_v35 = vpack.c.bf16 %v287_v30, %v283_v29  ;;  %v329_v29 = vld [vmem:[%s10303_s1 + $0x8b8] sm:$0xff] }
  0x50   :  { %4552 = vmatprep.subr.bf16.mxu1 %v4551_v46  ;;  %v255_v46 = vld [vmem:[%s10303_s1 + $0x668] sm:$0xff]  ;;  %v3805_v49 = vpack.c.bf16 %v246_v41, %v242_v40  ;;  %v4573_v50 = vpack.c.bf16 %v248_v44, %v244_v42  ;;  %v288_v40 = vld [vmem:[%s10303_s1 + $0x770] sm:$0xff]  ;;  %v297_v44 = vld [vmem:[%s10303_s1 + $0x7b8] sm:$0xff] }
  0x51   :  { %v3807_v51 = vpack.c.bf16 %v255_v46, %v251_v45  ;;  %v291_v41 = vld [vmem:[%s10303_s1 + $0x788] sm:$0xff] }
  0x52   :  { %3786 = vmatpush1.bf16.msra.mxu0 %v3785_v52  ;;  %v250_v52 = vld [vmem:[%s10303_s1 + $0x640] sm:$0xff]  ;;  %v295_v42 = vld [vmem:[%s10303_s1 + $0x7a8] sm:$0xff] }
  0x53   :  { %4554 = vmatpush1.bf16.msra.mxu1 %v4553_v53  ;;  %3788 = vmatprep.subr.bf16.mxu0 %v3787_v54  ;;  %v254_v53 = vld [vmem:[%s10303_s1 + $0x660] sm:$0xff]  ;;  %v252_v54 = vld [vmem:[%s10303_s1 + $0x650] sm:$0xff]  ;;  %v3827_v47 = vpack.c.bf16 %v295_v42, %v291_v41  ;;  %v31_v30 = vld [vmem:[%s10304_s0 + $0x28] sm:$0xff] }
  0x54   :  { %4556 = vmatprep.subr.bf16.mxu1 %v4555_v58  ;;  %v263_v58 = vld [vmem:[%s10303_s1 + $0x6a8] sm:$0xff]  ;;  %v3809_v61 = vpack.c.bf16 %v254_v53, %v250_v52  ;;  %v4577_v62 = vpack.c.bf16 %v256_v56, %v252_v54  ;;  %v296_v52 = vld [vmem:[%s10303_s1 + $0x7b0] sm:$0xff]  ;;  %v305_v56 = vld [vmem:[%s10303_s1 + $0x7f8] sm:$0xff] }
  0x55   :  { %v3811_v63 = vpack.c.bf16 %v263_v58, %v259_v57  ;;  %v299_v53 = vld [vmem:[%s10303_s1 + $0x7c8] sm:$0xff]  ;;  %v333_v41 = vld [vmem:[%s10303_s1 + $0x8d8] sm:$0xff] }
  0x56   :  { %3790 = vmatpush1.bf16.msra.mxu0 %v3789_v0  ;;  %v258_v0 = vld [vmem:[%s10303_s1 + $0x680] sm:$0xff]  ;;  %v303_v54 = vld [vmem:[%s10303_s1 + $0x7e8] sm:$0xff]  ;;  %v337_v42 = vld [vmem:[%s10303_s1 + $0x8f8] sm:$0xff] }
  0x57   :  { %4558 = vmatpush1.bf16.msra.mxu1 %v4557_v1  ;;  %3792 = vmatprep.subr.bf16.mxu0 %v3791_v2  ;;  %v262_v1 = vld [vmem:[%s10303_s1 + $0x6a0] sm:$0xff]  ;;  %v260_v2 = vld [vmem:[%s10303_s1 + $0x690] sm:$0xff]  ;;  %v3831_v59 = vpack.c.bf16 %v303_v54, %v299_v53  ;;  %v341_v53 = vld [vmem:[%s10303_s1 + $0x918] sm:$0xff] }
  0x58   :  { %4560 = vmatprep.subr.bf16.mxu1 %v4559_v6  ;;  %v271_v6 = vld [vmem:[%s10303_s1 + $0x6e8] sm:$0xff]  ;;  %v3813_v9 = vpack.c.bf16 %v262_v1, %v258_v0  ;;  %v4581_v10 = vpack.c.bf16 %v264_v4, %v260_v2  ;;  %v304_v0 = vld [vmem:[%s10303_s1 + $0x7f0] sm:$0xff]  ;;  %v313_v4 = vld [vmem:[%s10303_s1 + $0x838] sm:$0xff] }
  0x59   :  { %v3815_v11 = vpack.c.bf16 %v271_v6, %v267_v5  ;;  %v307_v1 = vld [vmem:[%s10303_s1 + $0x808] sm:$0xff]  ;;  %v345_v54 = vld [vmem:[%s10303_s1 + $0x938] sm:$0xff] }
  0x5a   :  { %3794 = vmatpush1.bf16.msra.mxu0 %v3793_v12  ;;  %v266_v12 = vld [vmem:[%s10303_s1 + $0x6c0] sm:$0xff]  ;;  %v311_v2 = vld [vmem:[%s10303_s1 + $0x828] sm:$0xff] }
  0x5b   :  { %4562 = vmatpush1.bf16.msra.mxu1 %v4561_v14  ;;  %3796 = vmatprep.subr.bf16.mxu0 %v3795_v15  ;;  %v268_v14 = vld [vmem:[%s10303_s1 + $0x6d0] sm:$0xff]  ;;  %v4583_v15 = vpack.c.bf16 %v273_v8, %v269_v7  ;;  %v3817_v21 = vpack.c.bf16 %v270_v13, %v266_v12  ;;  %v3835_v7 = vpack.c.bf16 %v311_v2, %v307_v1  ;;  %v306_v8 = vld [vmem:[%s10303_s1 + $0x800] sm:$0xff]  ;;  %v315_v13 = vld [vmem:[%s10303_s1 + $0x848] sm:$0xff] }
  0x5c   :  { %4564 = vmatprep.subr.bf16.mxu1 %v4563_v19  ;;  %v277_v19 = vld [vmem:[%s10303_s1 + $0x718] sm:$0xff]  ;;  %v4585_v22 = vpack.c.bf16 %v272_v16, %v268_v14  ;;  %v312_v12 = vld [vmem:[%s10303_s1 + $0x830] sm:$0xff]  ;;  %v319_v14 = vld [vmem:[%s10303_s1 + $0x868] sm:$0xff] }
  0x5d   :  { %v321_v16 = vld [vmem:[%s10303_s1 + $0x878] sm:$0xff] }
  0x5e   :  { %3798 = vmatpush1.bf16.msra.mxu0 %v3797_v25  ;;  %v278_v25 = vld [vmem:[%s10303_s1 + $0x720] sm:$0xff]  ;;  %v349_v1 = vld [vmem:[%s10303_s1 + $0x958] sm:$0xff] }
  0x5f   :  { %4566 = vmatpush1.bf16.msra.mxu1 %v4565_v26  ;;  %3800 = vmatprep.subr.bf16.mxu0 %v3799_v27  ;;  %v276_v26 = vld [vmem:[%s10303_s1 + $0x710] sm:$0xff]  ;;  %v4587_v27 = vpack.c.bf16 %v281_v20, %v277_v19  ;;  %v3821_v33 = vpack.c.bf16 %v278_v25, %v274_v24  ;;  %v3839_v20 = vpack.c.bf16 %v319_v14, %v315_v13  ;;  %v353_v2 = vld [vmem:[%s10303_s1 + $0x978] sm:$0xff] }
  0x60   :  { %4568 = vmatprep.subr.bf16.mxu1 %v4567_v31  ;;  %v285_v31 = vld [vmem:[%s10303_s1 + $0x758] sm:$0xff]  ;;  %v4589_v34 = vpack.c.bf16 %v280_v28, %v276_v26  ;;  %v320_v25 = vld [vmem:[%s10303_s1 + $0x870] sm:$0xff]  ;;  %v323_v26 = vld [vmem:[%s10303_s1 + $0x888] sm:$0xff] }
  0x61   :  { %v325_v28 = vld [vmem:[%s10303_s1 + $0x898] sm:$0xff] }
  0x62   :  { %3802 = vmatpush1.bf16.msra.mxu0 %v3801_v37  ;;  %v286_v37 = vld [vmem:[%s10303_s1 + $0x760] sm:$0xff]  ;;  %v357_v13 = vld [vmem:[%s10303_s1 + $0x998] sm:$0xff] }
  0x63   :  { %4570 = vmatpush1.bf16.msra.mxu1 %v4569_v38  ;;  %3804 = vmatprep.subr.bf16.mxu0 %v3803_v39  ;;  %v284_v38 = vld [vmem:[%s10303_s1 + $0x750] sm:$0xff]  ;;  %v4591_v39 = vpack.c.bf16 %v289_v32, %v285_v31  ;;  %v3825_v45 = vpack.c.bf16 %v286_v37, %v282_v36  ;;  %v4611_v37 = vpack.c.bf16 %v329_v29, %v325_v28  ;;  %v361_v14 = vld [vmem:[%s10303_s1 + $0x9b8] sm:$0xff] }
  0x64   :  { %4572 = vmatprep.subr.bf16.mxu1 %v4571_v43  ;;  %v293_v43 = vld [vmem:[%s10303_s1 + $0x798] sm:$0xff]  ;;  %v4593_v46 = vpack.c.bf16 %v288_v40, %v284_v38  ;;  %v324_v36 = vld [vmem:[%s10303_s1 + $0x890] sm:$0xff]  ;;  %v335_v40 = vld [vmem:[%s10303_s1 + $0x8e8] sm:$0xff] }
  0x65   :  { %v328_v38 = vld [vmem:[%s10303_s1 + $0x8b0] sm:$0xff] }
  0x66   :  { %3806 = vmatpush1.bf16.msra.mxu0 %v3805_v49  ;;  %v294_v49 = vld [vmem:[%s10303_s1 + $0x7a0] sm:$0xff] }
  0x67   :  { %4574 = vmatpush1.bf16.msra.mxu1 %v4573_v50  ;;  %3808 = vmatprep.subr.bf16.mxu0 %v3807_v51  ;;  %v292_v50 = vld [vmem:[%s10303_s1 + $0x790] sm:$0xff]  ;;  %v4595_v51 = vpack.c.bf16 %v297_v44, %v293_v43  ;;  %v3829_v57 = vpack.c.bf16 %v294_v49, %v290_v48  ;;  %v4613_v44 = vpack.c.bf16 %v328_v38, %v324_v36  ;;  %v375_v36 = vld [vmem:[%s10303_s1 + $0xa28] sm:$0xff]  ;;  %v377_v38 = vld [vmem:[%s10303_s1 + $0xa38] sm:$0xff] }
  0x68   :  { %4576 = vmatprep.subr.bf16.mxu1 %v4575_v55  ;;  %v301_v55 = vld [vmem:[%s10303_s1 + $0x7d8] sm:$0xff]  ;;  %v4597_v58 = vpack.c.bf16 %v296_v52, %v292_v50  ;;  %v332_v48 = vld [vmem:[%s10303_s1 + $0x8d0] sm:$0xff]  ;;  %v4615_v49 = vpack.c.bf16 %v337_v42, %v333_v41  ;;  %v343_v52 = vld [vmem:[%s10303_s1 + $0x928] sm:$0xff] }
  0x69   :  { %v336_v50 = vld [vmem:[%s10303_s1 + $0x8f0] sm:$0xff]  ;;  %v370_v42 = vld [vmem:[%s10303_s1 + $0xa00] sm:$0xff] }
  0x6a   :  { %3810 = vmatpush1.bf16.msra.mxu0 %v3809_v61  ;;  %v302_v61 = vld [vmem:[%s10303_s1 + $0x7e0] sm:$0xff] }
  0x6b   :  { %4578 = vmatpush1.bf16.msra.mxu1 %v4577_v62  ;;  %3812 = vmatprep.subr.bf16.mxu0 %v3811_v63  ;;  %v300_v62 = vld [vmem:[%s10303_s1 + $0x7d0] sm:$0xff]  ;;  %v4599_v63 = vpack.c.bf16 %v305_v56, %v301_v55  ;;  %v3833_v5 = vpack.c.bf16 %v302_v61, %v298_v60  ;;  %v4617_v56 = vpack.c.bf16 %v336_v50, %v332_v48  ;;  %v383_v48 = vld [vmem:[%s10303_s1 + $0xa68] sm:$0xff]  ;;  %v385_v50 = vld [vmem:[%s10303_s1 + $0xa78] sm:$0xff] }
  0x6c   :  { %4580 = vmatprep.subr.bf16.mxu1 %v4579_v3  ;;  %v309_v3 = vld [vmem:[%s10303_s1 + $0x818] sm:$0xff]  ;;  %v4601_v6 = vpack.c.bf16 %v304_v0, %v300_v62  ;;  %v340_v60 = vld [vmem:[%s10303_s1 + $0x910] sm:$0xff]  ;;  %v4619_v61 = vpack.c.bf16 %v345_v54, %v341_v53  ;;  %v351_v0 = vld [vmem:[%s10303_s1 + $0x968] sm:$0xff] }
  0x6d   :  { %v344_v62 = vld [vmem:[%s10303_s1 + $0x930] sm:$0xff]  ;;  %v378_v54 = vld [vmem:[%s10303_s1 + $0xa40] sm:$0xff] }
  0x6e   :  { %3814 = vmatpush1.bf16.msra.mxu0 %v3813_v9  ;;  %v310_v9 = vld [vmem:[%s10303_s1 + $0x820] sm:$0xff] }
  0x6f   :  { %4582 = vmatpush1.bf16.msra.mxu1 %v4581_v10  ;;  %3816 = vmatprep.subr.bf16.mxu0 %v3815_v11  ;;  %v308_v10 = vld [vmem:[%s10303_s1 + $0x810] sm:$0xff]  ;;  %v4603_v11 = vpack.c.bf16 %v313_v4, %v309_v3  ;;  %v3837_v18 = vpack.c.bf16 %v310_v9, %v306_v8  ;;  %v4621_v4 = vpack.c.bf16 %v344_v62, %v340_v60  ;;  %v391_v60 = vld [vmem:[%s10303_s1 + $0xaa8] sm:$0xff]  ;;  %v393_v62 = vld [vmem:[%s10303_s1 + $0xab8] sm:$0xff] }
  0x70   :  { %4584 = vmatprep.subr.bf16.mxu1 %v4583_v15  ;;  %v317_v15 = vld [vmem:[%s10303_s1 + $0x858] sm:$0xff]  ;;  %v4605_v19 = vpack.c.bf16 %v312_v12, %v308_v10  ;;  %v348_v8 = vld [vmem:[%s10303_s1 + $0x950] sm:$0xff]  ;;  %v4623_v9 = vpack.c.bf16 %v353_v2, %v349_v1  ;;  %v359_v12 = vld [vmem:[%s10303_s1 + $0x9a8] sm:$0xff] }
  0x71   :  { %v4607_v24 = vpack.c.bf16 %v321_v16, %v317_v15  ;;  %v352_v10 = vld [vmem:[%s10303_s1 + $0x970] sm:$0xff]  ;;  %v386_v2 = vld [vmem:[%s10303_s1 + $0xa80] sm:$0xff] }
  0x72   :  { %3818 = vmatpush1.bf16.msra.mxu0 %v3817_v21  ;;  %v314_v21 = vld [vmem:[%s10303_s1 + $0x840] sm:$0xff]  ;;  %v4625_v16 = vpack.c.bf16 %v352_v10, %v348_v8  ;;  %v399_v8 = vld [vmem:[%s10303_s1 + $0xae8] sm:$0xff]  ;;  %v401_v10 = vld [vmem:[%s10303_s1 + $0xaf8] sm:$0xff] }
  0x73   :  { %4586 = vmatpush1.bf16.msra.mxu1 %v4585_v22  ;;  %3820 = vmatprep.subr.bf16.mxu0 %v3819_v23  ;;  %v318_v22 = vld [vmem:[%s10303_s1 + $0x860] sm:$0xff]  ;;  %v316_v23 = vld [vmem:[%s10303_s1 + $0x850] sm:$0xff] }
  0x74   :  { %4588 = vmatprep.subr.bf16.mxu1 %v4587_v27  ;;  %v327_v27 = vld [vmem:[%s10303_s1 + $0x8a8] sm:$0xff]  ;;  %v3841_v31 = vpack.c.bf16 %v318_v22, %v314_v21  ;;  %v4609_v32 = vpack.c.bf16 %v320_v25, %v316_v23  ;;  %v4627_v21 = vpack.c.bf16 %v361_v14, %v357_v13  ;;  %v360_v22 = vld [vmem:[%s10303_s1 + $0x9b0] sm:$0xff]  ;;  %v365_v25 = vld [vmem:[%s10303_s1 + $0x9d8] sm:$0xff] }
  0x75   :  { %v363_v23 = vld [vmem:[%s10303_s1 + $0x9c8] sm:$0xff]  ;;  %v394_v14 = vld [vmem:[%s10303_s1 + $0xac0] sm:$0xff] }
  0x76   :  { %3822 = vmatpush1.bf16.msra.mxu0 %v3821_v33  ;;  %v3843_v33 = vpack.c.bf16 %v327_v27, %v323_v26  ;;  %v369_v26 = vld [vmem:[%s10303_s1 + $0x9f8] sm:$0xff] }
  0x77   :  { %4590 = vmatpush1.bf16.msra.mxu1 %v4589_v34  ;;  %3824 = vmatprep.subr.bf16.mxu0 %v3823_v35  ;;  %v322_v34 = vld [vmem:[%s10303_s1 + $0x880] sm:$0xff] }
  0x78   :  { %4592 = vmatprep.subr.bf16.mxu1 %v4591_v39  ;;  %v326_v35 = vld [vmem:[%s10303_s1 + $0x8a0] sm:$0xff]  ;;  %v331_v39 = vld [vmem:[%s10303_s1 + $0x8c8] sm:$0xff] }
  0x79   :  { %v3845_v43 = vpack.c.bf16 %v326_v35, %v322_v34  ;;  %v368_v34 = vld [vmem:[%s10303_s1 + $0x9f0] sm:$0xff]  ;;  %v371_v35 = vld [vmem:[%s10303_s1 + $0xa08] sm:$0xff] }
  0x7a   :  { %3826 = vmatpush1.bf16.msra.mxu0 %v3825_v45  ;;  %v3847_v45 = vpack.c.bf16 %v335_v40, %v331_v39  ;;  %v3867_v41 = vpack.c.bf16 %v375_v36, %v371_v35 }
  0x7b   :  { %4594 = vmatpush1.bf16.msra.mxu1 %v4593_v46  ;;  %3828 = vmatprep.subr.bf16.mxu0 %v3827_v47  ;;  %v330_v46 = vld [vmem:[%s10303_s1 + $0x8c0] sm:$0xff] }
  0x7c   :  { %4596 = vmatprep.subr.bf16.mxu1 %v4595_v51  ;;  %v334_v47 = vld [vmem:[%s10303_s1 + $0x8e0] sm:$0xff]  ;;  %v339_v51 = vld [vmem:[%s10303_s1 + $0x908] sm:$0xff] }
  0x7d   :  { %v3849_v55 = vpack.c.bf16 %v334_v47, %v330_v46  ;;  %v376_v46 = vld [vmem:[%s10303_s1 + $0xa30] sm:$0xff]  ;;  %v379_v47 = vld [vmem:[%s10303_s1 + $0xa48] sm:$0xff] }
  0x7e   :  { %3830 = vmatpush1.bf16.msra.mxu0 %v3829_v57  ;;  %v3851_v57 = vpack.c.bf16 %v343_v52, %v339_v51  ;;  %v3871_v53 = vpack.c.bf16 %v383_v48, %v379_v47 }
  0x7f   :  { %4598 = vmatpush1.bf16.msra.mxu1 %v4597_v58  ;;  %3832 = vmatprep.subr.bf16.mxu0 %v3831_v59  ;;  %v338_v58 = vld [vmem:[%s10303_s1 + $0x900] sm:$0xff] }
  0x80   :  { %4600 = vmatprep.subr.bf16.mxu1 %v4599_v63  ;;  %v342_v59 = vld [vmem:[%s10303_s1 + $0x920] sm:$0xff]  ;;  %v347_v63 = vld [vmem:[%s10303_s1 + $0x948] sm:$0xff] }
  0x81   :  { %v3853_v3 = vpack.c.bf16 %v342_v59, %v338_v58  ;;  %v384_v58 = vld [vmem:[%s10303_s1 + $0xa70] sm:$0xff]  ;;  %v387_v59 = vld [vmem:[%s10303_s1 + $0xa88] sm:$0xff] }
  0x82   :  { %3834 = vmatpush1.bf16.msra.mxu0 %v3833_v5  ;;  %v3855_v5 = vpack.c.bf16 %v351_v0, %v347_v63  ;;  %v3875_v1 = vpack.c.bf16 %v391_v60, %v387_v59 }
  0x83   :  { %4602 = vmatpush1.bf16.msra.mxu1 %v4601_v6  ;;  %3836 = vmatprep.subr.bf16.mxu0 %v3835_v7  ;;  %v346_v6 = vld [vmem:[%s10303_s1 + $0x940] sm:$0xff] }
  0x84   :  { %4604 = vmatprep.subr.bf16.mxu1 %v4603_v11  ;;  %v350_v7 = vld [vmem:[%s10303_s1 + $0x960] sm:$0xff]  ;;  %v355_v11 = vld [vmem:[%s10303_s1 + $0x988] sm:$0xff] }
  0x85   :  { %1744 = vmatmul.mubr.f32.vlgmr.msra.gmra.mrb[0].mxu0 %v28_v17  ;;  %v3857_v15 = vpack.c.bf16 %v350_v7, %v346_v6  ;;  %v392_v6 = vld [vmem:[%s10303_s1 + $0xab0] sm:$0xff]  ;;  %v395_v7 = vld [vmem:[%s10303_s1 + $0xac8] sm:$0xff] }
  0x86   :  { %3838 = vmatpush1.bf16.msra.mxu0 %v3837_v18  ;;  %2596 = vmatmul.mubr.f32.vlgmr.msra.gmra.mrb[0].mxu1 %v28_v17  ;;  %v3859_v17 = vpack.c.bf16 %v359_v12, %v355_v11  ;;  %v354_v18 = vld [vmem:[%s10303_s1 + $0x980] sm:$0xff]  ;;  %v3879_v13 = vpack.c.bf16 %v399_v8, %v395_v7 }
  0x87   :  { %4606 = vmatpush1.bf16.msra.mxu1 %v4605_v19  ;;  %3840 = vmatprep.subr.bf16.mxu0 %v3839_v20  ;;  %v358_v19 = vld [vmem:[%s10303_s1 + $0x9a0] sm:$0xff]  ;;  %v356_v20 = vld [vmem:[%s10303_s1 + $0x990] sm:$0xff] }
  0x88   :  { %4608 = vmatprep.subr.bf16.mxu1 %v4607_v24  ;;  %1814 = vmatprep.mubr.f32.mxu0 %v31_v30  ;;  %v367_v24 = vld [vmem:[%s10303_s1 + $0x9e8] sm:$0xff]  ;;  %v3861_v27 = vpack.c.bf16 %v358_v19, %v354_v18  ;;  %v4629_v28 = vpack.c.bf16 %v360_v22, %v356_v20  ;;  %v400_v18 = vld [vmem:[%s10303_s1 + $0xaf0] sm:$0xff]  ;;  %v409_v22 = vld [vmem:[%s10303_s1 + $0xb38] sm:$0xff] }
  0x89   :  { %2666 = vmatprep.mubr.f32.mxu1 %v31_v30  ;;  %v3863_v29 = vpack.c.bf16 %v367_v24, %v363_v23  ;;  %v362_v30 = vld [vmem:[%s10303_s1 + $0x9c0] sm:$0xff]  ;;  %v403_v19 = vld [vmem:[%s10303_s1 + $0xb08] sm:$0xff] }
  0x8a   :  { %3842 = vmatpush1.bf16.msra.mxu0 %v3841_v31  ;;  %v366_v31 = vld [vmem:[%s10303_s1 + $0x9e0] sm:$0xff]  ;;  %v407_v20 = vld [vmem:[%s10303_s1 + $0xb28] sm:$0xff] }
  0x8b   :  { %4610 = vmatpush1.bf16.msra.mxu1 %v4609_v32  ;;  %3844 = vmatprep.subr.bf16.mxu0 %v3843_v33  ;;  %v364_v32 = vld [vmem:[%s10303_s1 + $0x9d0] sm:$0xff]  ;;  %v4631_v33 = vpack.c.bf16 %v369_v26, %v365_v25  ;;  %v3865_v39 = vpack.c.bf16 %v366_v31, %v362_v30  ;;  %v3883_v25 = vpack.c.bf16 %v407_v20, %v403_v19  ;;  %v402_v26 = vld [vmem:[%s10303_s1 + $0xb00] sm:$0xff]  ;;  %v411_v31 = vld [vmem:[%s10303_s1 + $0xb48] sm:$0xff] }
  0x8c   :  { %4612 = vmatprep.subr.bf16.mxu1 %v4611_v37  ;;  %v373_v37 = vld [vmem:[%s10303_s1 + $0xa18] sm:$0xff]  ;;  %v4633_v40 = vpack.c.bf16 %v368_v34, %v364_v32  ;;  %v408_v30 = vld [vmem:[%s10303_s1 + $0xb30] sm:$0xff]  ;;  %v415_v32 = vld [vmem:[%s10303_s1 + $0xb68] sm:$0xff] }
  0x8d   :  { %v417_v34 = vld [vmem:[%s10303_s1 + $0xb78] sm:$0xff]  ;;  %v30_v19 = vld [vmem:[%s10304_s0 + $0x20] sm:$0xff] }
  0x8e   :  { %3846 = vmatpush1.bf16.msra.mxu0 %v3845_v43  ;;  %v374_v43 = vld [vmem:[%s10303_s1 + $0xa20] sm:$0xff] }
  0x8f   :  { %4614 = vmatpush1.bf16.msra.mxu1 %v4613_v44  ;;  %3848 = vmatprep.subr.bf16.mxu0 %v3847_v45  ;;  %v372_v44 = vld [vmem:[%s10303_s1 + $0xa10] sm:$0xff]  ;;  %v4635_v45 = vpack.c.bf16 %v377_v38, %v373_v37  ;;  %v3869_v51 = vpack.c.bf16 %v374_v43, %v370_v42  ;;  %v3887_v37 = vpack.c.bf16 %v415_v32, %v411_v31  ;;  %v410_v38 = vld [vmem:[%s10303_s1 + $0xb40] sm:$0xff]  ;;  %v419_v43 = vld [vmem:[%s10303_s1 + $0xb88] sm:$0xff] }
  0x90   :  { %4616 = vmatprep.subr.bf16.mxu1 %v4615_v49  ;;  %v381_v49 = vld [vmem:[%s10303_s1 + $0xa58] sm:$0xff]  ;;  %v4637_v52 = vpack.c.bf16 %v376_v46, %v372_v44  ;;  %v416_v42 = vld [vmem:[%s10303_s1 + $0xb70] sm:$0xff]  ;;  %v423_v44 = vld [vmem:[%s10303_s1 + $0xba8] sm:$0xff] }
  0x91   :  { %v425_v46 = vld [vmem:[%s10303_s1 + $0xbb8] sm:$0xff] }
  0x92   :  { %3850 = vmatpush1.bf16.msra.mxu0 %v3849_v55  ;;  %v382_v55 = vld [vmem:[%s10303_s1 + $0xa60] sm:$0xff]  ;;  %v457_v31 = vld [vmem:[%s10303_s1 + $0xcb8] sm:$0xff] }
  0x93   :  { %4618 = vmatpush1.bf16.msra.mxu1 %v4617_v56  ;;  %3852 = vmatprep.subr.bf16.mxu0 %v3851_v57  ;;  %v380_v56 = vld [vmem:[%s10303_s1 + $0xa50] sm:$0xff]  ;;  %v4639_v57 = vpack.c.bf16 %v385_v50, %v381_v49  ;;  %v3873_v63 = vpack.c.bf16 %v382_v55, %v378_v54  ;;  %v3891_v49 = vpack.c.bf16 %v423_v44, %v419_v43  ;;  %v418_v50 = vld [vmem:[%s10303_s1 + $0xb80] sm:$0xff]  ;;  %v427_v55 = vld [vmem:[%s10303_s1 + $0xbc8] sm:$0xff] }
  0x94   :  { %4620 = vmatprep.subr.bf16.mxu1 %v4619_v61  ;;  %v389_v61 = vld [vmem:[%s10303_s1 + $0xa98] sm:$0xff]  ;;  %v4641_v0 = vpack.c.bf16 %v384_v58, %v380_v56  ;;  %v424_v54 = vld [vmem:[%s10303_s1 + $0xbb0] sm:$0xff]  ;;  %v431_v56 = vld [vmem:[%s10303_s1 + $0xbe8] sm:$0xff] }
  0x95   :  { %v433_v58 = vld [vmem:[%s10303_s1 + $0xbf8] sm:$0xff] }
  0x96   :  { %3854 = vmatpush1.bf16.msra.mxu0 %v3853_v3  ;;  %v390_v3 = vld [vmem:[%s10303_s1 + $0xaa0] sm:$0xff]  ;;  %v33_v32 = vld [vmem:[%s10304_s0 + $0x38] sm:$0xff] }
  0x97   :  { %4622 = vmatpush1.bf16.msra.mxu1 %v4621_v4  ;;  %3856 = vmatprep.subr.bf16.mxu0 %v3855_v5  ;;  %v388_v4 = vld [vmem:[%s10303_s1 + $0xa90] sm:$0xff]  ;;  %v4643_v5 = vpack.c.bf16 %v393_v62, %v389_v61  ;;  %v3877_v11 = vpack.c.bf16 %v390_v3, %v386_v2  ;;  %v3895_v61 = vpack.c.bf16 %v431_v56, %v427_v55  ;;  %v426_v62 = vld [vmem:[%s10303_s1 + $0xbc0] sm:$0xff]  ;;  %v435_v3 = vld [vmem:[%s10303_s1 + $0xc08] sm:$0xff] }
  0x98   :  { %4624 = vmatprep.subr.bf16.mxu1 %v4623_v9  ;;  %v397_v9 = vld [vmem:[%s10303_s1 + $0xad8] sm:$0xff]  ;;  %v4645_v12 = vpack.c.bf16 %v392_v6, %v388_v4  ;;  %v432_v2 = vld [vmem:[%s10303_s1 + $0xbf0] sm:$0xff]  ;;  %v439_v4 = vld [vmem:[%s10303_s1 + $0xc28] sm:$0xff] }
  0x99   :  { %v441_v6 = vld [vmem:[%s10303_s1 + $0xc38] sm:$0xff] }
  0x9a   :  { %3858 = vmatpush1.bf16.msra.mxu0 %v3857_v15  ;;  %v398_v15 = vld [vmem:[%s10303_s1 + $0xae0] sm:$0xff]  ;;  %v461_v43 = vld [vmem:[%s10303_s1 + $0xcd8] sm:$0xff] }
  0x9b   :  { %4626 = vmatpush1.bf16.msra.mxu1 %v4625_v16  ;;  %3860 = vmatprep.subr.bf16.mxu0 %v3859_v17  ;;  %v396_v16 = vld [vmem:[%s10303_s1 + $0xad0] sm:$0xff]  ;;  %v4647_v17 = vpack.c.bf16 %v401_v10, %v397_v9  ;;  %v3881_v23 = vpack.c.bf16 %v398_v15, %v394_v14  ;;  %v3899_v9 = vpack.c.bf16 %v439_v4, %v435_v3  ;;  %v434_v10 = vld [vmem:[%s10303_s1 + $0xc00] sm:$0xff]  ;;  %v443_v15 = vld [vmem:[%s10303_s1 + $0xc48] sm:$0xff] }
  0x9c   :  { %4628 = vmatprep.subr.bf16.mxu1 %v4627_v21  ;;  %v405_v21 = vld [vmem:[%s10303_s1 + $0xb18] sm:$0xff]  ;;  %v4649_v24 = vpack.c.bf16 %v400_v18, %v396_v16  ;;  %v440_v14 = vld [vmem:[%s10303_s1 + $0xc30] sm:$0xff]  ;;  %v447_v16 = vld [vmem:[%s10303_s1 + $0xc68] sm:$0xff] }
  0x9d   :  { %v449_v18 = vld [vmem:[%s10303_s1 + $0xc78] sm:$0xff] }
  0x9e   :  { %3862 = vmatpush1.bf16.msra.mxu0 %v3861_v27  ;;  %v406_v27 = vld [vmem:[%s10303_s1 + $0xb20] sm:$0xff]  ;;  %v465_v44 = vld [vmem:[%s10303_s1 + $0xcf8] sm:$0xff] }
  0x9f   :  { %4630 = vmatpush1.bf16.msra.mxu1 %v4629_v28  ;;  %3864 = vmatprep.subr.bf16.mxu0 %v3863_v29  ;;  %v404_v28 = vld [vmem:[%s10303_s1 + $0xb10] sm:$0xff]  ;;  %v4651_v29 = vpack.c.bf16 %v409_v22, %v405_v21  ;;  %v3885_v35 = vpack.c.bf16 %v406_v27, %v402_v26  ;;  %v3903_v22 = vpack.c.bf16 %v447_v16, %v443_v15  ;;  %v469_v55 = vld [vmem:[%s10303_s1 + $0xd18] sm:$0xff] }
  0xa0   :  { %4632 = vmatprep.subr.bf16.mxu1 %v4631_v33  ;;  %v413_v33 = vld [vmem:[%s10303_s1 + $0xb58] sm:$0xff]  ;;  %v4653_v36 = vpack.c.bf16 %v408_v30, %v404_v28  ;;  %v448_v27 = vld [vmem:[%s10303_s1 + $0xc70] sm:$0xff]  ;;  %v451_v28 = vld [vmem:[%s10303_s1 + $0xc88] sm:$0xff] }
  0xa1   :  { %v453_v30 = vld [vmem:[%s10303_s1 + $0xc98] sm:$0xff] }
  0xa2   :  { %3866 = vmatpush1.bf16.msra.mxu0 %v3865_v39  ;;  %v414_v39 = vld [vmem:[%s10303_s1 + $0xb60] sm:$0xff]  ;;  %v473_v56 = vld [vmem:[%s10303_s1 + $0xd38] sm:$0xff] }
  0xa3   :  { %4634 = vmatpush1.bf16.msra.mxu1 %v4633_v40  ;;  %3868 = vmatprep.subr.bf16.mxu0 %v3867_v41  ;;  %v412_v40 = vld [vmem:[%s10303_s1 + $0xb50] sm:$0xff]  ;;  %v4655_v41 = vpack.c.bf16 %v417_v34, %v413_v33  ;;  %v3889_v47 = vpack.c.bf16 %v414_v39, %v410_v38  ;;  %v4675_v39 = vpack.c.bf16 %v457_v31, %v453_v30  ;;  %v477_v3 = vld [vmem:[%s10303_s1 + $0xd58] sm:$0xff] }
  0xa4   :  { %4636 = vmatprep.subr.bf16.mxu1 %v4635_v45  ;;  %v421_v45 = vld [vmem:[%s10303_s1 + $0xb98] sm:$0xff]  ;;  %v4657_v48 = vpack.c.bf16 %v416_v42, %v412_v40  ;;  %v452_v38 = vld [vmem:[%s10303_s1 + $0xc90] sm:$0xff]  ;;  %v463_v42 = vld [vmem:[%s10303_s1 + $0xce8] sm:$0xff] }
  0xa5   :  { %v456_v40 = vld [vmem:[%s10303_s1 + $0xcb0] sm:$0xff]  ;;  %v481_v4 = vld [vmem:[%s10303_s1 + $0xd78] sm:$0xff] }
  0xa6   :  { %3870 = vmatpush1.bf16.msra.mxu0 %v3869_v51  ;;  %v422_v51 = vld [vmem:[%s10303_s1 + $0xba0] sm:$0xff]  ;;  %v485_v15 = vld [vmem:[%s10303_s1 + $0xd98] sm:$0xff] }
  0xa7   :  { %4638 = vmatpush1.bf16.msra.mxu1 %v4637_v52  ;;  %3872 = vmatprep.subr.bf16.mxu0 %v3871_v53  ;;  %v420_v52 = vld [vmem:[%s10303_s1 + $0xb90] sm:$0xff]  ;;  %v4659_v53 = vpack.c.bf16 %v425_v46, %v421_v45  ;;  %v3893_v59 = vpack.c.bf16 %v422_v51, %v418_v50  ;;  %v4677_v46 = vpack.c.bf16 %v456_v40, %v452_v38  ;;  %v489_v16 = vld [vmem:[%s10303_s1 + $0xdb8] sm:$0xff]  ;;  %v503_v38 = vld [vmem:[%s10303_s1 + $0xe28] sm:$0xff] }
  0xa8   :  { %4640 = vmatprep.subr.bf16.mxu1 %v4639_v57  ;;  %v429_v57 = vld [vmem:[%s10303_s1 + $0xbd8] sm:$0xff]  ;;  %v4661_v60 = vpack.c.bf16 %v424_v54, %v420_v52  ;;  %v460_v50 = vld [vmem:[%s10303_s1 + $0xcd0] sm:$0xff]  ;;  %v4679_v51 = vpack.c.bf16 %v465_v44, %v461_v43  ;;  %v471_v54 = vld [vmem:[%s10303_s1 + $0xd28] sm:$0xff] }
  0xa9   :  { %v464_v52 = vld [vmem:[%s10303_s1 + $0xcf0] sm:$0xff]  ;;  %v505_v40 = vld [vmem:[%s10303_s1 + $0xe38] sm:$0xff]  ;;  %v498_v44 = vld [vmem:[%s10303_s1 + $0xe00] sm:$0xff] }
  0xaa   :  { %3874 = vmatpush1.bf16.msra.mxu0 %v3873_v63  ;;  %v430_v63 = vld [vmem:[%s10303_s1 + $0xbe0] sm:$0xff] }
  0xab   :  { %4642 = vmatpush1.bf16.msra.mxu1 %v4641_v0  ;;  %3876 = vmatprep.subr.bf16.mxu0 %v3875_v1  ;;  %v428_v0 = vld [vmem:[%s10303_s1 + $0xbd0] sm:$0xff]  ;;  %v4663_v1 = vpack.c.bf16 %v433_v58, %v429_v57  ;;  %v3897_v7 = vpack.c.bf16 %v430_v63, %v426_v62  ;;  %v4681_v58 = vpack.c.bf16 %v464_v52, %v460_v50  ;;  %v511_v50 = vld [vmem:[%s10303_s1 + $0xe68] sm:$0xff]  ;;  %v513_v52 = vld [vmem:[%s10303_s1 + $0xe78] sm:$0xff] }
  0xac   :  { %4644 = vmatprep.subr.bf16.mxu1 %v4643_v5  ;;  %v437_v5 = vld [vmem:[%s10303_s1 + $0xc18] sm:$0xff]  ;;  %v4665_v8 = vpack.c.bf16 %v432_v2, %v428_v0  ;;  %v468_v62 = vld [vmem:[%s10303_s1 + $0xd10] sm:$0xff]  ;;  %v4683_v63 = vpack.c.bf16 %v473_v56, %v469_v55  ;;  %v479_v2 = vld [vmem:[%s10303_s1 + $0xd68] sm:$0xff] }
  0xad   :  { %v472_v0 = vld [vmem:[%s10303_s1 + $0xd30] sm:$0xff]  ;;  %v506_v56 = vld [vmem:[%s10303_s1 + $0xe40] sm:$0xff] }
  0xae   :  { %3878 = vmatpush1.bf16.msra.mxu0 %v3877_v11  ;;  %v438_v11 = vld [vmem:[%s10303_s1 + $0xc20] sm:$0xff] }
  0xaf   :  { %4646 = vmatpush1.bf16.msra.mxu1 %v4645_v12  ;;  %3880 = vmatprep.subr.bf16.mxu0 %v3879_v13  ;;  %v436_v12 = vld [vmem:[%s10303_s1 + $0xc10] sm:$0xff]  ;;  %v4667_v13 = vpack.c.bf16 %v441_v6, %v437_v5  ;;  %v3901_v20 = vpack.c.bf16 %v438_v11, %v434_v10  ;;  %v4685_v6 = vpack.c.bf16 %v472_v0, %v468_v62  ;;  %v519_v62 = vld [vmem:[%s10303_s1 + $0xea8] sm:$0xff]  ;;  %v521_v0 = vld [vmem:[%s10303_s1 + $0xeb8] sm:$0xff] }
  0xb0   :  { %4648 = vmatprep.subr.bf16.mxu1 %v4647_v17  ;;  %v445_v17 = vld [vmem:[%s10303_s1 + $0xc58] sm:$0xff]  ;;  %v4669_v21 = vpack.c.bf16 %v440_v14, %v436_v12  ;;  %v476_v10 = vld [vmem:[%s10303_s1 + $0xd50] sm:$0xff]  ;;  %v4687_v11 = vpack.c.bf16 %v481_v4, %v477_v3  ;;  %v487_v14 = vld [vmem:[%s10303_s1 + $0xda8] sm:$0xff] }
  0xb1   :  { %v4671_v26 = vpack.c.bf16 %v449_v18, %v445_v17  ;;  %v480_v12 = vld [vmem:[%s10303_s1 + $0xd70] sm:$0xff]  ;;  %v514_v4 = vld [vmem:[%s10303_s1 + $0xe80] sm:$0xff] }
  0xb2   :  { %3882 = vmatpush1.bf16.msra.mxu0 %v3881_v23  ;;  %v442_v23 = vld [vmem:[%s10303_s1 + $0xc40] sm:$0xff]  ;;  %v4689_v18 = vpack.c.bf16 %v480_v12, %v476_v10  ;;  %v527_v10 = vld [vmem:[%s10303_s1 + $0xee8] sm:$0xff]  ;;  %v529_v12 = vld [vmem:[%s10303_s1 + $0xef8] sm:$0xff] }
  0xb3   :  { %4650 = vmatpush1.bf16.msra.mxu1 %v4649_v24  ;;  %3884 = vmatprep.subr.bf16.mxu0 %v3883_v25  ;;  %v446_v24 = vld [vmem:[%s10303_s1 + $0xc60] sm:$0xff]  ;;  %v444_v25 = vld [vmem:[%s10303_s1 + $0xc50] sm:$0xff] }
  0xb4   :  { %4652 = vmatprep.subr.bf16.mxu1 %v4651_v29  ;;  %v455_v29 = vld [vmem:[%s10303_s1 + $0xca8] sm:$0xff]  ;;  %v3905_v33 = vpack.c.bf16 %v446_v24, %v442_v23  ;;  %v4673_v34 = vpack.c.bf16 %v448_v27, %v444_v25  ;;  %v4691_v23 = vpack.c.bf16 %v489_v16, %v485_v15  ;;  %v488_v24 = vld [vmem:[%s10303_s1 + $0xdb0] sm:$0xff]  ;;  %v493_v27 = vld [vmem:[%s10303_s1 + $0xdd8] sm:$0xff] }
  0xb5   :  { %v491_v25 = vld [vmem:[%s10303_s1 + $0xdc8] sm:$0xff]  ;;  %v522_v16 = vld [vmem:[%s10303_s1 + $0xec0] sm:$0xff] }
  0xb6   :  { %3886 = vmatpush1.bf16.msra.mxu0 %v3885_v35  ;;  %v3907_v35 = vpack.c.bf16 %v455_v29, %v451_v28  ;;  %v497_v28 = vld [vmem:[%s10303_s1 + $0xdf8] sm:$0xff] }
  0xb7   :  { %4654 = vmatpush1.bf16.msra.mxu1 %v4653_v36  ;;  %3888 = vmatprep.subr.bf16.mxu0 %v3887_v37  ;;  %v450_v36 = vld [vmem:[%s10303_s1 + $0xc80] sm:$0xff] }
  0xb8   :  { %4656 = vmatprep.subr.bf16.mxu1 %v4655_v41  ;;  %v454_v37 = vld [vmem:[%s10303_s1 + $0xca0] sm:$0xff]  ;;  %v459_v41 = vld [vmem:[%s10303_s1 + $0xcc8] sm:$0xff] }
  0xb9   :  { %v3909_v45 = vpack.c.bf16 %v454_v37, %v450_v36  ;;  %v496_v36 = vld [vmem:[%s10303_s1 + $0xdf0] sm:$0xff]  ;;  %v499_v37 = vld [vmem:[%s10303_s1 + $0xe08] sm:$0xff] }
  0xba   :  { %3890 = vmatpush1.bf16.msra.mxu0 %v3889_v47  ;;  %v3911_v47 = vpack.c.bf16 %v463_v42, %v459_v41  ;;  %v3931_v43 = vpack.c.bf16 %v503_v38, %v499_v37 }
  0xbb   :  { %4658 = vmatpush1.bf16.msra.mxu1 %v4657_v48  ;;  %3892 = vmatprep.subr.bf16.mxu0 %v3891_v49  ;;  %v458_v48 = vld [vmem:[%s10303_s1 + $0xcc0] sm:$0xff] }
  0xbc   :  { %4660 = vmatprep.subr.bf16.mxu1 %v4659_v53  ;;  %v462_v49 = vld [vmem:[%s10303_s1 + $0xce0] sm:$0xff]  ;;  %v467_v53 = vld [vmem:[%s10303_s1 + $0xd08] sm:$0xff] }
  0xbd   :  { %v3913_v57 = vpack.c.bf16 %v462_v49, %v458_v48  ;;  %v504_v48 = vld [vmem:[%s10303_s1 + $0xe30] sm:$0xff]  ;;  %v507_v49 = vld [vmem:[%s10303_s1 + $0xe48] sm:$0xff] }
  0xbe   :  { %3894 = vmatpush1.bf16.msra.mxu0 %v3893_v59  ;;  %v3915_v59 = vpack.c.bf16 %v471_v54, %v467_v53  ;;  %v3935_v55 = vpack.c.bf16 %v511_v50, %v507_v49 }
  0xbf   :  { %4662 = vmatpush1.bf16.msra.mxu1 %v4661_v60  ;;  %3896 = vmatprep.subr.bf16.mxu0 %v3895_v61  ;;  %v466_v60 = vld [vmem:[%s10303_s1 + $0xd00] sm:$0xff] }
  0xc0   :  { %4664 = vmatprep.subr.bf16.mxu1 %v4663_v1  ;;  %v470_v61 = vld [vmem:[%s10303_s1 + $0xd20] sm:$0xff]  ;;  %v475_v1 = vld [vmem:[%s10303_s1 + $0xd48] sm:$0xff] }
  0xc1   :  { %v3917_v5 = vpack.c.bf16 %v470_v61, %v466_v60  ;;  %v512_v60 = vld [vmem:[%s10303_s1 + $0xe70] sm:$0xff]  ;;  %v515_v61 = vld [vmem:[%s10303_s1 + $0xe88] sm:$0xff] }
  0xc2   :  { %3898 = vmatpush1.bf16.msra.mxu0 %v3897_v7  ;;  %v3919_v7 = vpack.c.bf16 %v479_v2, %v475_v1  ;;  %v3939_v3 = vpack.c.bf16 %v519_v62, %v515_v61 }
  0xc3   :  { %4666 = vmatpush1.bf16.msra.mxu1 %v4665_v8  ;;  %3900 = vmatprep.subr.bf16.mxu0 %v3899_v9  ;;  %v474_v8 = vld [vmem:[%s10303_s1 + $0xd40] sm:$0xff] }
  0xc4   :  { %4668 = vmatprep.subr.bf16.mxu1 %v4667_v13  ;;  %v478_v9 = vld [vmem:[%s10303_s1 + $0xd60] sm:$0xff]  ;;  %v483_v13 = vld [vmem:[%s10303_s1 + $0xd88] sm:$0xff] }
  0xc5   :  { %1815 = vmatmul.mubr.f32.vlgmr.msra.gmra.mrb[0].mxu0 %v30_v19  ;;  %v3921_v17 = vpack.c.bf16 %v478_v9, %v474_v8  ;;  %v520_v8 = vld [vmem:[%s10303_s1 + $0xeb0] sm:$0xff]  ;;  %v523_v9 = vld [vmem:[%s10303_s1 + $0xec8] sm:$0xff] }
  0xc6   :  { %3902 = vmatpush1.bf16.msra.mxu0 %v3901_v20  ;;  %2667 = vmatmul.mubr.f32.vlgmr.msra.gmra.mrb[0].mxu1 %v30_v19  ;;  %v3923_v19 = vpack.c.bf16 %v487_v14, %v483_v13  ;;  %v482_v20 = vld [vmem:[%s10303_s1 + $0xd80] sm:$0xff]  ;;  %v3943_v15 = vpack.c.bf16 %v527_v10, %v523_v9 }
  0xc7   :  { %4670 = vmatpush1.bf16.msra.mxu1 %v4669_v21  ;;  %3904 = vmatprep.subr.bf16.mxu0 %v3903_v22  ;;  %v486_v21 = vld [vmem:[%s10303_s1 + $0xda0] sm:$0xff]  ;;  %v484_v22 = vld [vmem:[%s10303_s1 + $0xd90] sm:$0xff] }
  0xc8   :  { %4672 = vmatprep.subr.bf16.mxu1 %v4671_v26  ;;  %1885 = vmatprep.mubr.f32.mxu0 %v33_v32  ;;  %v495_v26 = vld [vmem:[%s10303_s1 + $0xde8] sm:$0xff]  ;;  %v3925_v29 = vpack.c.bf16 %v486_v21, %v482_v20  ;;  %v4693_v30 = vpack.c.bf16 %v488_v24, %v484_v22  ;;  %v528_v20 = vld [vmem:[%s10303_s1 + $0xef0] sm:$0xff]  ;;  %v537_v24 = vld [vmem:[%s10303_s1 + $0xf38] sm:$0xff] }
  0xc9   :  { %2737 = vmatprep.mubr.f32.mxu1 %v33_v32  ;;  %v3927_v31 = vpack.c.bf16 %v495_v26, %v491_v25  ;;  %v490_v32 = vld [vmem:[%s10303_s1 + $0xdc0] sm:$0xff]  ;;  %v531_v21 = vld [vmem:[%s10303_s1 + $0xf08] sm:$0xff] }
  0xca   :  { %3906 = vmatpush1.bf16.msra.mxu0 %v3905_v33  ;;  %v494_v33 = vld [vmem:[%s10303_s1 + $0xde0] sm:$0xff]  ;;  %v535_v22 = vld [vmem:[%s10303_s1 + $0xf28] sm:$0xff] }
  0xcb   :  { %4674 = vmatpush1.bf16.msra.mxu1 %v4673_v34  ;;  %3908 = vmatprep.subr.bf16.mxu0 %v3907_v35  ;;  %v492_v34 = vld [vmem:[%s10303_s1 + $0xdd0] sm:$0xff]  ;;  %v4695_v35 = vpack.c.bf16 %v497_v28, %v493_v27  ;;  %v3929_v41 = vpack.c.bf16 %v494_v33, %v490_v32  ;;  %v3947_v27 = vpack.c.bf16 %v535_v22, %v531_v21  ;;  %v530_v28 = vld [vmem:[%s10303_s1 + $0xf00] sm:$0xff]  ;;  %v539_v33 = vld [vmem:[%s10303_s1 + $0xf48] sm:$0xff] }
  0xcc   :  { %4676 = vmatprep.subr.bf16.mxu1 %v4675_v39  ;;  %v501_v39 = vld [vmem:[%s10303_s1 + $0xe18] sm:$0xff]  ;;  %v4697_v42 = vpack.c.bf16 %v496_v36, %v492_v34  ;;  %v536_v32 = vld [vmem:[%s10303_s1 + $0xf30] sm:$0xff]  ;;  %v543_v34 = vld [vmem:[%s10303_s1 + $0xf68] sm:$0xff] }
  0xcd   :  { %v545_v36 = vld [vmem:[%s10303_s1 + $0xf78] sm:$0xff]  ;;  %v32_v21 = vld [vmem:[%s10304_s0 + $0x30] sm:$0xff] }
  0xce   :  { %3910 = vmatpush1.bf16.msra.mxu0 %v3909_v45  ;;  %v502_v45 = vld [vmem:[%s10303_s1 + $0xe20] sm:$0xff] }
  0xcf   :  { %4678 = vmatpush1.bf16.msra.mxu1 %v4677_v46  ;;  %3912 = vmatprep.subr.bf16.mxu0 %v3911_v47  ;;  %v500_v46 = vld [vmem:[%s10303_s1 + $0xe10] sm:$0xff]  ;;  %v4699_v47 = vpack.c.bf16 %v505_v40, %v501_v39  ;;  %v3933_v53 = vpack.c.bf16 %v502_v45, %v498_v44  ;;  %v3951_v39 = vpack.c.bf16 %v543_v34, %v539_v33  ;;  %v538_v40 = vld [vmem:[%s10303_s1 + $0xf40] sm:$0xff]  ;;  %v547_v45 = vld [vmem:[%s10303_s1 + $0xf88] sm:$0xff] }
  0xd0   :  { %4680 = vmatprep.subr.bf16.mxu1 %v4679_v51  ;;  %v509_v51 = vld [vmem:[%s10303_s1 + $0xe58] sm:$0xff]  ;;  %v4701_v54 = vpack.c.bf16 %v504_v48, %v500_v46  ;;  %v544_v44 = vld [vmem:[%s10303_s1 + $0xf70] sm:$0xff]  ;;  %v551_v46 = vld [vmem:[%s10303_s1 + $0xfa8] sm:$0xff] }
  0xd1   :  { %v553_v48 = vld [vmem:[%s10303_s1 + $0xfb8] sm:$0xff]  ;;  %v35_v34 = vld [vmem:[%s10304_s0 + $0x48] sm:$0xff] }
  0xd2   :  { %3914 = vmatpush1.bf16.msra.mxu0 %v3913_v57  ;;  %v510_v57 = vld [vmem:[%s10303_s1 + $0xe60] sm:$0xff]  ;;  %v585_v33 = vld [vmem:[%s10303_s1 + $0x10b8] sm:$0xff] }
  0xd3   :  { %4682 = vmatpush1.bf16.msra.mxu1 %v4681_v58  ;;  %3916 = vmatprep.subr.bf16.mxu0 %v3915_v59  ;;  %v508_v58 = vld [vmem:[%s10303_s1 + $0xe50] sm:$0xff]  ;;  %v4703_v59 = vpack.c.bf16 %v513_v52, %v509_v51  ;;  %v3937_v1 = vpack.c.bf16 %v510_v57, %v506_v56  ;;  %v3955_v51 = vpack.c.bf16 %v551_v46, %v547_v45  ;;  %v546_v52 = vld [vmem:[%s10303_s1 + $0xf80] sm:$0xff]  ;;  %v555_v57 = vld [vmem:[%s10303_s1 + $0xfc8] sm:$0xff] }
  0xd4   :  { %4684 = vmatprep.subr.bf16.mxu1 %v4683_v63  ;;  %v517_v63 = vld [vmem:[%s10303_s1 + $0xe98] sm:$0xff]  ;;  %v4705_v2 = vpack.c.bf16 %v512_v60, %v508_v58  ;;  %v552_v56 = vld [vmem:[%s10303_s1 + $0xfb0] sm:$0xff]  ;;  %v559_v58 = vld [vmem:[%s10303_s1 + $0xfe8] sm:$0xff] }
  0xd5   :  { %v561_v60 = vld [vmem:[%s10303_s1 + $0xff8] sm:$0xff] }
  0xd6   :  { %3918 = vmatpush1.bf16.msra.mxu0 %v3917_v5  ;;  %v518_v5 = vld [vmem:[%s10303_s1 + $0xea0] sm:$0xff]  ;;  %v589_v45 = vld [vmem:[%s10303_s1 + $0x10d8] sm:$0xff] }
  0xd7   :  { %4686 = vmatpush1.bf16.msra.mxu1 %v4685_v6  ;;  %3920 = vmatprep.subr.bf16.mxu0 %v3919_v7  ;;  %v516_v6 = vld [vmem:[%s10303_s1 + $0xe90] sm:$0xff]  ;;  %v4707_v7 = vpack.c.bf16 %v521_v0, %v517_v63  ;;  %v3941_v13 = vpack.c.bf16 %v518_v5, %v514_v4  ;;  %v3959_v63 = vpack.c.bf16 %v559_v58, %v555_v57  ;;  %v554_v0 = vld [vmem:[%s10303_s1 + $0xfc0] sm:$0xff]  ;;  %v563_v5 = vld [vmem:[%s10303_s1 + $0x1008] sm:$0xff] }
  0xd8   :  { %4688 = vmatprep.subr.bf16.mxu1 %v4687_v11  ;;  %v525_v11 = vld [vmem:[%s10303_s1 + $0xed8] sm:$0xff]  ;;  %v4709_v14 = vpack.c.bf16 %v520_v8, %v516_v6  ;;  %v560_v4 = vld [vmem:[%s10303_s1 + $0xff0] sm:$0xff]  ;;  %v567_v6 = vld [vmem:[%s10303_s1 + $0x1028] sm:$0xff] }
  0xd9   :  { %v569_v8 = vld [vmem:[%s10303_s1 + $0x1038] sm:$0xff] }
  0xda   :  { %3922 = vmatpush1.bf16.msra.mxu0 %v3921_v17  ;;  %v526_v17 = vld [vmem:[%s10303_s1 + $0xee0] sm:$0xff]  ;;  %v593_v46 = vld [vmem:[%s10303_s1 + $0x10f8] sm:$0xff] }
  0xdb   :  { %4690 = vmatpush1.bf16.msra.mxu1 %v4689_v18  ;;  %3924 = vmatprep.subr.bf16.mxu0 %v3923_v19  ;;  %v524_v18 = vld [vmem:[%s10303_s1 + $0xed0] sm:$0xff]  ;;  %v4711_v19 = vpack.c.bf16 %v529_v12, %v525_v11  ;;  %v3945_v25 = vpack.c.bf16 %v526_v17, %v522_v16  ;;  %v3963_v11 = vpack.c.bf16 %v567_v6, %v563_v5  ;;  %v562_v12 = vld [vmem:[%s10303_s1 + $0x1000] sm:$0xff]  ;;  %v571_v17 = vld [vmem:[%s10303_s1 + $0x1048] sm:$0xff] }
  0xdc   :  { %4692 = vmatprep.subr.bf16.mxu1 %v4691_v23  ;;  %v533_v23 = vld [vmem:[%s10303_s1 + $0xf18] sm:$0xff]  ;;  %v4713_v26 = vpack.c.bf16 %v528_v20, %v524_v18  ;;  %v568_v16 = vld [vmem:[%s10303_s1 + $0x1030] sm:$0xff]  ;;  %v575_v18 = vld [vmem:[%s10303_s1 + $0x1068] sm:$0xff] }
  0xdd   :  { %v577_v20 = vld [vmem:[%s10303_s1 + $0x1078] sm:$0xff] }
  0xde   :  { %3926 = vmatpush1.bf16.msra.mxu0 %v3925_v29  ;;  %v534_v29 = vld [vmem:[%s10303_s1 + $0xf20] sm:$0xff]  ;;  %v597_v57 = vld [vmem:[%s10303_s1 + $0x1118] sm:$0xff] }
  0xdf   :  { %4694 = vmatpush1.bf16.msra.mxu1 %v4693_v30  ;;  %3928 = vmatprep.subr.bf16.mxu0 %v3927_v31  ;;  %v532_v30 = vld [vmem:[%s10303_s1 + $0xf10] sm:$0xff]  ;;  %v4715_v31 = vpack.c.bf16 %v537_v24, %v533_v23  ;;  %v3949_v37 = vpack.c.bf16 %v534_v29, %v530_v28  ;;  %v3967_v24 = vpack.c.bf16 %v575_v18, %v571_v17  ;;  %v601_v58 = vld [vmem:[%s10303_s1 + $0x1138] sm:$0xff] }
  0xe0   :  { %4696 = vmatprep.subr.bf16.mxu1 %v4695_v35  ;;  %v541_v35 = vld [vmem:[%s10303_s1 + $0xf58] sm:$0xff]  ;;  %v4717_v38 = vpack.c.bf16 %v536_v32, %v532_v30  ;;  %v576_v29 = vld [vmem:[%s10303_s1 + $0x1070] sm:$0xff]  ;;  %v579_v30 = vld [vmem:[%s10303_s1 + $0x1088] sm:$0xff] }
  0xe1   :  { %v581_v32 = vld [vmem:[%s10303_s1 + $0x1098] sm:$0xff] }
  0xe2   :  { %3930 = vmatpush1.bf16.msra.mxu0 %v3929_v41  ;;  %v542_v41 = vld [vmem:[%s10303_s1 + $0xf60] sm:$0xff]  ;;  %v605_v5 = vld [vmem:[%s10303_s1 + $0x1158] sm:$0xff] }
  0xe3   :  { %4698 = vmatpush1.bf16.msra.mxu1 %v4697_v42  ;;  %3932 = vmatprep.subr.bf16.mxu0 %v3931_v43  ;;  %v540_v42 = vld [vmem:[%s10303_s1 + $0xf50] sm:$0xff]  ;;  %v4719_v43 = vpack.c.bf16 %v545_v36, %v541_v35  ;;  %v3953_v49 = vpack.c.bf16 %v542_v41, %v538_v40  ;;  %v4739_v41 = vpack.c.bf16 %v585_v33, %v581_v32  ;;  %v609_v6 = vld [vmem:[%s10303_s1 + $0x1178] sm:$0xff] }
  0xe4   :  { %4700 = vmatprep.subr.bf16.mxu1 %v4699_v47  ;;  %v549_v47 = vld [vmem:[%s10303_s1 + $0xf98] sm:$0xff]  ;;  %v4721_v50 = vpack.c.bf16 %v544_v44, %v540_v42  ;;  %v580_v40 = vld [vmem:[%s10303_s1 + $0x1090] sm:$0xff]  ;;  %v591_v44 = vld [vmem:[%s10303_s1 + $0x10e8] sm:$0xff] }
  0xe5   :  { %v584_v42 = vld [vmem:[%s10303_s1 + $0x10b0] sm:$0xff]  ;;  %v613_v17 = vld [vmem:[%s10303_s1 + $0x1198] sm:$0xff] }
  0xe6   :  { %3934 = vmatpush1.bf16.msra.mxu0 %v3933_v53  ;;  %v550_v53 = vld [vmem:[%s10303_s1 + $0xfa0] sm:$0xff]  ;;  %v617_v18 = vld [vmem:[%s10303_s1 + $0x11b8] sm:$0xff] }
  0xe7   :  { %4702 = vmatpush1.bf16.msra.mxu1 %v4701_v54  ;;  %3936 = vmatprep.subr.bf16.mxu0 %v3935_v55  ;;  %v548_v54 = vld [vmem:[%s10303_s1 + $0xf90] sm:$0xff]  ;;  %v4723_v55 = vpack.c.bf16 %v553_v48, %v549_v47  ;;  %v3957_v61 = vpack.c.bf16 %v550_v53, %v546_v52  ;;  %v4741_v48 = vpack.c.bf16 %v584_v42, %v580_v40  ;;  %v631_v40 = vld [vmem:[%s10303_s1 + $0x1228] sm:$0xff]  ;;  %v633_v42 = vld [vmem:[%s10303_s1 + $0x1238] sm:$0xff] }
  0xe8   :  { %4704 = vmatprep.subr.bf16.mxu1 %v4703_v59  ;;  %v557_v59 = vld [vmem:[%s10303_s1 + $0xfd8] sm:$0xff]  ;;  %v4725_v62 = vpack.c.bf16 %v552_v56, %v548_v54  ;;  %v588_v52 = vld [vmem:[%s10303_s1 + $0x10d0] sm:$0xff]  ;;  %v4743_v53 = vpack.c.bf16 %v593_v46, %v589_v45  ;;  %v599_v56 = vld [vmem:[%s10303_s1 + $0x1128] sm:$0xff] }
  0xe9   :  { %v592_v54 = vld [vmem:[%s10303_s1 + $0x10f0] sm:$0xff]  ;;  %v626_v46 = vld [vmem:[%s10303_s1 + $0x1200] sm:$0xff] }
  0xea   :  { %3938 = vmatpush1.bf16.msra.mxu0 %v3937_v1  ;;  %v558_v1 = vld [vmem:[%s10303_s1 + $0xfe0] sm:$0xff] }
  0xeb   :  { %4706 = vmatpush1.bf16.msra.mxu1 %v4705_v2  ;;  %3940 = vmatprep.subr.bf16.mxu0 %v3939_v3  ;;  %v556_v2 = vld [vmem:[%s10303_s1 + $0xfd0] sm:$0xff]  ;;  %v4727_v3 = vpack.c.bf16 %v561_v60, %v557_v59  ;;  %v3961_v9 = vpack.c.bf16 %v558_v1, %v554_v0  ;;  %v4745_v60 = vpack.c.bf16 %v592_v54, %v588_v52  ;;  %v639_v52 = vld [vmem:[%s10303_s1 + $0x1268] sm:$0xff]  ;;  %v641_v54 = vld [vmem:[%s10303_s1 + $0x1278] sm:$0xff] }
  0xec   :  { %4708 = vmatprep.subr.bf16.mxu1 %v4707_v7  ;;  %v565_v7 = vld [vmem:[%s10303_s1 + $0x1018] sm:$0xff]  ;;  %v4729_v10 = vpack.c.bf16 %v560_v4, %v556_v2  ;;  %v596_v0 = vld [vmem:[%s10303_s1 + $0x1110] sm:$0xff]  ;;  %v4747_v1 = vpack.c.bf16 %v601_v58, %v597_v57  ;;  %v607_v4 = vld [vmem:[%s10303_s1 + $0x1168] sm:$0xff] }
  0xed   :  { %v600_v2 = vld [vmem:[%s10303_s1 + $0x1130] sm:$0xff]  ;;  %v634_v58 = vld [vmem:[%s10303_s1 + $0x1240] sm:$0xff] }
  0xee   :  { %3942 = vmatpush1.bf16.msra.mxu0 %v3941_v13  ;;  %v566_v13 = vld [vmem:[%s10303_s1 + $0x1020] sm:$0xff] }
  0xef   :  { %4710 = vmatpush1.bf16.msra.mxu1 %v4709_v14  ;;  %3944 = vmatprep.subr.bf16.mxu0 %v3943_v15  ;;  %v564_v14 = vld [vmem:[%s10303_s1 + $0x1010] sm:$0xff]  ;;  %v4731_v15 = vpack.c.bf16 %v569_v8, %v565_v7  ;;  %v3965_v22 = vpack.c.bf16 %v566_v13, %v562_v12  ;;  %v4749_v8 = vpack.c.bf16 %v600_v2, %v596_v0  ;;  %v647_v0 = vld [vmem:[%s10303_s1 + $0x12a8] sm:$0xff]  ;;  %v649_v2 = vld [vmem:[%s10303_s1 + $0x12b8] sm:$0xff] }
  0xf0   :  { %4712 = vmatprep.subr.bf16.mxu1 %v4711_v19  ;;  %v573_v19 = vld [vmem:[%s10303_s1 + $0x1058] sm:$0xff]  ;;  %v4733_v23 = vpack.c.bf16 %v568_v16, %v564_v14  ;;  %v604_v12 = vld [vmem:[%s10303_s1 + $0x1150] sm:$0xff]  ;;  %v4751_v13 = vpack.c.bf16 %v609_v6, %v605_v5  ;;  %v615_v16 = vld [vmem:[%s10303_s1 + $0x11a8] sm:$0xff] }
  0xf1   :  { %v4735_v28 = vpack.c.bf16 %v577_v20, %v573_v19  ;;  %v608_v14 = vld [vmem:[%s10303_s1 + $0x1170] sm:$0xff]  ;;  %v642_v6 = vld [vmem:[%s10303_s1 + $0x1280] sm:$0xff] }
  0xf2   :  { %3946 = vmatpush1.bf16.msra.mxu0 %v3945_v25  ;;  %v570_v25 = vld [vmem:[%s10303_s1 + $0x1040] sm:$0xff]  ;;  %v4753_v20 = vpack.c.bf16 %v608_v14, %v604_v12  ;;  %v655_v12 = vld [vmem:[%s10303_s1 + $0x12e8] sm:$0xff]  ;;  %v657_v14 = vld [vmem:[%s10303_s1 + $0x12f8] sm:$0xff] }
  0xf3   :  { %4714 = vmatpush1.bf16.msra.mxu1 %v4713_v26  ;;  %3948 = vmatprep.subr.bf16.mxu0 %v3947_v27  ;;  %v574_v26 = vld [vmem:[%s10303_s1 + $0x1060] sm:$0xff]  ;;  %v572_v27 = vld [vmem:[%s10303_s1 + $0x1050] sm:$0xff] }
  0xf4   :  { %4716 = vmatprep.subr.bf16.mxu1 %v4715_v31  ;;  %v583_v31 = vld [vmem:[%s10303_s1 + $0x10a8] sm:$0xff]  ;;  %v3969_v35 = vpack.c.bf16 %v574_v26, %v570_v25  ;;  %v4737_v36 = vpack.c.bf16 %v576_v29, %v572_v27  ;;  %v4755_v25 = vpack.c.bf16 %v617_v18, %v613_v17  ;;  %v616_v26 = vld [vmem:[%s10303_s1 + $0x11b0] sm:$0xff]  ;;  %v621_v29 = vld [vmem:[%s10303_s1 + $0x11d8] sm:$0xff] }
  0xf5   :  { %v619_v27 = vld [vmem:[%s10303_s1 + $0x11c8] sm:$0xff]  ;;  %v650_v18 = vld [vmem:[%s10303_s1 + $0x12c0] sm:$0xff] }
  0xf6   :  { %3950 = vmatpush1.bf16.msra.mxu0 %v3949_v37  ;;  %v3971_v37 = vpack.c.bf16 %v583_v31, %v579_v30  ;;  %v625_v30 = vld [vmem:[%s10303_s1 + $0x11f8] sm:$0xff] }
  0xf7   :  { %4718 = vmatpush1.bf16.msra.mxu1 %v4717_v38  ;;  %3952 = vmatprep.subr.bf16.mxu0 %v3951_v39  ;;  %v578_v38 = vld [vmem:[%s10303_s1 + $0x1080] sm:$0xff] }
  0xf8   :  { %4720 = vmatprep.subr.bf16.mxu1 %v4719_v43  ;;  %v582_v39 = vld [vmem:[%s10303_s1 + $0x10a0] sm:$0xff]  ;;  %v587_v43 = vld [vmem:[%s10303_s1 + $0x10c8] sm:$0xff] }
  0xf9   :  { %v3973_v47 = vpack.c.bf16 %v582_v39, %v578_v38  ;;  %v624_v38 = vld [vmem:[%s10303_s1 + $0x11f0] sm:$0xff]  ;;  %v627_v39 = vld [vmem:[%s10303_s1 + $0x1208] sm:$0xff] }
  0xfa   :  { %3954 = vmatpush1.bf16.msra.mxu0 %v3953_v49  ;;  %v3975_v49 = vpack.c.bf16 %v591_v44, %v587_v43  ;;  %v3995_v45 = vpack.c.bf16 %v631_v40, %v627_v39 }
  0xfb   :  { %4722 = vmatpush1.bf16.msra.mxu1 %v4721_v50  ;;  %3956 = vmatprep.subr.bf16.mxu0 %v3955_v51  ;;  %v586_v50 = vld [vmem:[%s10303_s1 + $0x10c0] sm:$0xff] }
  0xfc   :  { %4724 = vmatprep.subr.bf16.mxu1 %v4723_v55  ;;  %v590_v51 = vld [vmem:[%s10303_s1 + $0x10e0] sm:$0xff]  ;;  %v595_v55 = vld [vmem:[%s10303_s1 + $0x1108] sm:$0xff] }
  0xfd   :  { %v3977_v59 = vpack.c.bf16 %v590_v51, %v586_v50  ;;  %v632_v50 = vld [vmem:[%s10303_s1 + $0x1230] sm:$0xff]  ;;  %v635_v51 = vld [vmem:[%s10303_s1 + $0x1248] sm:$0xff] }
  0xfe   :  { %3958 = vmatpush1.bf16.msra.mxu0 %v3957_v61  ;;  %v3979_v61 = vpack.c.bf16 %v599_v56, %v595_v55  ;;  %v3999_v57 = vpack.c.bf16 %v639_v52, %v635_v51 }
  0xff   :  { %4726 = vmatpush1.bf16.msra.mxu1 %v4725_v62  ;;  %3960 = vmatprep.subr.bf16.mxu0 %v3959_v63  ;;  %v594_v62 = vld [vmem:[%s10303_s1 + $0x1100] sm:$0xff] }
 0x100   :  { %4728 = vmatprep.subr.bf16.mxu1 %v4727_v3  ;;  %v598_v63 = vld [vmem:[%s10303_s1 + $0x1120] sm:$0xff]  ;;  %v603_v3 = vld [vmem:[%s10303_s1 + $0x1148] sm:$0xff] }
 0x101   :  { %v3981_v7 = vpack.c.bf16 %v598_v63, %v594_v62  ;;  %v640_v62 = vld [vmem:[%s10303_s1 + $0x1270] sm:$0xff]  ;;  %v643_v63 = vld [vmem:[%s10303_s1 + $0x1288] sm:$0xff] }
 0x102   :  { %3962 = vmatpush1.bf16.msra.mxu0 %v3961_v9  ;;  %v3983_v9 = vpack.c.bf16 %v607_v4, %v603_v3  ;;  %v4003_v5 = vpack.c.bf16 %v647_v0, %v643_v63 }
 0x103   :  { %4730 = vmatpush1.bf16.msra.mxu1 %v4729_v10  ;;  %3964 = vmatprep.subr.bf16.mxu0 %v3963_v11  ;;  %v602_v10 = vld [vmem:[%s10303_s1 + $0x1140] sm:$0xff] }
 0x104   :  { %4732 = vmatprep.subr.bf16.mxu1 %v4731_v15  ;;  %v606_v11 = vld [vmem:[%s10303_s1 + $0x1160] sm:$0xff]  ;;  %v611_v15 = vld [vmem:[%s10303_s1 + $0x1188] sm:$0xff] }
 0x105   :  { %1886 = vmatmul.mubr.f32.vlgmr.msra.gmra.mrb[0].mxu0 %v32_v21  ;;  %v3985_v19 = vpack.c.bf16 %v606_v11, %v602_v10  ;;  %v648_v10 = vld [vmem:[%s10303_s1 + $0x12b0] sm:$0xff]  ;;  %v651_v11 = vld [vmem:[%s10303_s1 + $0x12c8] sm:$0xff] }
 0x106   :  { %3966 = vmatpush1.bf16.msra.mxu0 %v3965_v22  ;;  %2738 = vmatmul.mubr.f32.vlgmr.msra.gmra.mrb[0].mxu1 %v32_v21  ;;  %v3987_v21 = vpack.c.bf16 %v615_v16, %v611_v15  ;;  %v610_v22 = vld [vmem:[%s10303_s1 + $0x1180] sm:$0xff]  ;;  %v4007_v17 = vpack.c.bf16 %v655_v12, %v651_v11 }
 0x107   :  { %4734 = vmatpush1.bf16.msra.mxu1 %v4733_v23  ;;  %3968 = vmatprep.subr.bf16.mxu0 %v3967_v24  ;;  %v614_v23 = vld [vmem:[%s10303_s1 + $0x11a0] sm:$0xff]  ;;  %v612_v24 = vld [vmem:[%s10303_s1 + $0x1190] sm:$0xff] }
 0x108   :  { %4736 = vmatprep.subr.bf16.mxu1 %v4735_v28  ;;  %1956 = vmatprep.mubr.f32.mxu0 %v35_v34  ;;  %v623_v28 = vld [vmem:[%s10303_s1 + $0x11e8] sm:$0xff]  ;;  %v3989_v31 = vpack.c.bf16 %v614_v23, %v610_v22  ;;  %v4757_v32 = vpack.c.bf16 %v616_v26, %v612_v24  ;;  %v656_v22 = vld [vmem:[%s10303_s1 + $0x12f0] sm:$0xff]  ;;  %v665_v26 = vld [vmem:[%s10303_s1 + $0x1338] sm:$0xff] }
 0x109   :  { %2808 = vmatprep.mubr.f32.mxu1 %v35_v34  ;;  %v3991_v33 = vpack.c.bf16 %v623_v28, %v619_v27  ;;  %v618_v34 = vld [vmem:[%s10303_s1 + $0x11c0] sm:$0xff]  ;;  %v659_v23 = vld [vmem:[%s10303_s1 + $0x1308] sm:$0xff] }
 0x10a   :  { %3970 = vmatpush1.bf16.msra.mxu0 %v3969_v35  ;;  %v622_v35 = vld [vmem:[%s10303_s1 + $0x11e0] sm:$0xff]  ;;  %v663_v24 = vld [vmem:[%s10303_s1 + $0x1328] sm:$0xff] }
 0x10b   :  { %4738 = vmatpush1.bf16.msra.mxu1 %v4737_v36  ;;  %3972 = vmatprep.subr.bf16.mxu0 %v3971_v37  ;;  %v620_v36 = vld [vmem:[%s10303_s1 + $0x11d0] sm:$0xff]  ;;  %v4759_v37 = vpack.c.bf16 %v625_v30, %v621_v29  ;;  %v3993_v43 = vpack.c.bf16 %v622_v35, %v618_v34  ;;  %v4011_v29 = vpack.c.bf16 %v663_v24, %v659_v23  ;;  %v658_v30 = vld [vmem:[%s10303_s1 + $0x1300] sm:$0xff]  ;;  %v667_v35 = vld [vmem:[%s10303_s1 + $0x1348] sm:$0xff] }
 0x10c   :  { %4740 = vmatprep.subr.bf16.mxu1 %v4739_v41  ;;  %v629_v41 = vld [vmem:[%s10303_s1 + $0x1218] sm:$0xff]  ;;  %v4761_v44 = vpack.c.bf16 %v624_v38, %v620_v36  ;;  %v664_v34 = vld [vmem:[%s10303_s1 + $0x1330] sm:$0xff]  ;;  %v671_v36 = vld [vmem:[%s10303_s1 + $0x1368] sm:$0xff] }
 0x10d   :  { %v673_v38 = vld [vmem:[%s10303_s1 + $0x1378] sm:$0xff]  ;;  %v34_v23 = vld [vmem:[%s10304_s0 + $0x40] sm:$0xff] }
 0x10e   :  { %3974 = vmatpush1.bf16.msra.mxu0 %v3973_v47  ;;  %v630_v47 = vld [vmem:[%s10303_s1 + $0x1220] sm:$0xff] }
 0x10f   :  { %4742 = vmatpush1.bf16.msra.mxu1 %v4741_v48  ;;  %3976 = vmatprep.subr.bf16.mxu0 %v3975_v49  ;;  %v628_v48 = vld [vmem:[%s10303_s1 + $0x1210] sm:$0xff]  ;;  %v4763_v49 = vpack.c.bf16 %v633_v42, %v629_v41  ;;  %v3997_v55 = vpack.c.bf16 %v630_v47, %v626_v46  ;;  %v4015_v41 = vpack.c.bf16 %v671_v36, %v667_v35  ;;  %v666_v42 = vld [vmem:[%s10303_s1 + $0x1340] sm:$0xff]  ;;  %v675_v47 = vld [vmem:[%s10303_s1 + $0x1388] sm:$0xff] }
 0x110   :  { %4744 = vmatprep.subr.bf16.mxu1 %v4743_v53  ;;  %v637_v53 = vld [vmem:[%s10303_s1 + $0x1258] sm:$0xff]  ;;  %v4765_v56 = vpack.c.bf16 %v632_v50, %v628_v48  ;;  %v672_v46 = vld [vmem:[%s10303_s1 + $0x1370] sm:$0xff]  ;;  %v679_v48 = vld [vmem:[%s10303_s1 + $0x13a8] sm:$0xff] }
 0x111   :  { %v681_v50 = vld [vmem:[%s10303_s1 + $0x13b8] sm:$0xff] }
 0x112   :  { %3978 = vmatpush1.bf16.msra.mxu0 %v3977_v59  ;;  %v638_v59 = vld [vmem:[%s10303_s1 + $0x1260] sm:$0xff]  ;;  %v713_v35 = vld [vmem:[%s10303_s1 + $0x14b8] sm:$0xff] }
 0x113   :  { %4746 = vmatpush1.bf16.msra.mxu1 %v4745_v60  ;;  %3980 = vmatprep.subr.bf16.mxu0 %v3979_v61  ;;  %v636_v60 = vld [vmem:[%s10303_s1 + $0x1250] sm:$0xff]  ;;  %v4767_v61 = vpack.c.bf16 %v641_v54, %v637_v53  ;;  %v4001_v3 = vpack.c.bf16 %v638_v59, %v634_v58  ;;  %v4019_v53 = vpack.c.bf16 %v679_v48, %v675_v47  ;;  %v674_v54 = vld [vmem:[%s10303_s1 + $0x1380] sm:$0xff]  ;;  %v683_v59 = vld [vmem:[%s10303_s1 + $0x13c8] sm:$0xff] }
 0x114   :  { %4748 = vmatprep.subr.bf16.mxu1 %v4747_v1  ;;  %v645_v1 = vld [vmem:[%s10303_s1 + $0x1298] sm:$0xff]  ;;  %v4769_v4 = vpack.c.bf16 %v640_v62, %v636_v60  ;;  %v680_v58 = vld [vmem:[%s10303_s1 + $0x13b0] sm:$0xff]  ;;  %v687_v60 = vld [vmem:[%s10303_s1 + $0x13e8] sm:$0xff] }
 0x115   :  { %v689_v62 = vld [vmem:[%s10303_s1 + $0x13f8] sm:$0xff] }
 0x116   :  { %3982 = vmatpush1.bf16.msra.mxu0 %v3981_v7  ;;  %v646_v7 = vld [vmem:[%s10303_s1 + $0x12a0] sm:$0xff]  ;;  %v37_v36 = vld [vmem:[%s10304_s0 + $0x58] sm:$0xff] }
 0x117   :  { %4750 = vmatpush1.bf16.msra.mxu1 %v4749_v8  ;;  %3984 = vmatprep.subr.bf16.mxu0 %v3983_v9  ;;  %v644_v8 = vld [vmem:[%s10303_s1 + $0x1290] sm:$0xff]  ;;  %v4771_v9 = vpack.c.bf16 %v649_v2, %v645_v1  ;;  %v4005_v15 = vpack.c.bf16 %v646_v7, %v642_v6  ;;  %v4023_v1 = vpack.c.bf16 %v687_v60, %v683_v59  ;;  %v682_v2 = vld [vmem:[%s10303_s1 + $0x13c0] sm:$0xff]  ;;  %v691_v7 = vld [vmem:[%s10303_s1 + $0x1408] sm:$0xff] }
 0x118   :  { %4752 = vmatprep.subr.bf16.mxu1 %v4751_v13  ;;  %v653_v13 = vld [vmem:[%s10303_s1 + $0x12d8] sm:$0xff]  ;;  %v4773_v16 = vpack.c.bf16 %v648_v10, %v644_v8  ;;  %v688_v6 = vld [vmem:[%s10303_s1 + $0x13f0] sm:$0xff]  ;;  %v695_v8 = vld [vmem:[%s10303_s1 + $0x1428] sm:$0xff] }
 0x119   :  { %v697_v10 = vld [vmem:[%s10303_s1 + $0x1438] sm:$0xff] }
 0x11a   :  { %3986 = vmatpush1.bf16.msra.mxu0 %v3985_v19  ;;  %v654_v19 = vld [vmem:[%s10303_s1 + $0x12e0] sm:$0xff]  ;;  %v717_v47 = vld [vmem:[%s10303_s1 + $0x14d8] sm:$0xff] }
 0x11b   :  { %4754 = vmatpush1.bf16.msra.mxu1 %v4753_v20  ;;  %3988 = vmatprep.subr.bf16.mxu0 %v3987_v21  ;;  %v652_v20 = vld [vmem:[%s10303_s1 + $0x12d0] sm:$0xff]  ;;  %v4775_v21 = vpack.c.bf16 %v657_v14, %v653_v13  ;;  %v4009_v27 = vpack.c.bf16 %v654_v19, %v650_v18  ;;  %v4027_v13 = vpack.c.bf16 %v695_v8, %v691_v7  ;;  %v690_v14 = vld [vmem:[%s10303_s1 + $0x1400] sm:$0xff]  ;;  %v699_v19 = vld [vmem:[%s10303_s1 + $0x1448] sm:$0xff] }
 0x11c   :  { %4756 = vmatprep.subr.bf16.mxu1 %v4755_v25  ;;  %v661_v25 = vld [vmem:[%s10303_s1 + $0x1318] sm:$0xff]  ;;  %v4777_v28 = vpack.c.bf16 %v656_v22, %v652_v20  ;;  %v696_v18 = vld [vmem:[%s10303_s1 + $0x1430] sm:$0xff]  ;;  %v703_v20 = vld [vmem:[%s10303_s1 + $0x1468] sm:$0xff] }
 0x11d   :  { %v705_v22 = vld [vmem:[%s10303_s1 + $0x1478] sm:$0xff] }
 0x11e   :  { %3990 = vmatpush1.bf16.msra.mxu0 %v3989_v31  ;;  %v662_v31 = vld [vmem:[%s10303_s1 + $0x1320] sm:$0xff]  ;;  %v721_v48 = vld [vmem:[%s10303_s1 + $0x14f8] sm:$0xff] }
 0x11f   :  { %4758 = vmatpush1.bf16.msra.mxu1 %v4757_v32  ;;  %3992 = vmatprep.subr.bf16.mxu0 %v3991_v33  ;;  %v660_v32 = vld [vmem:[%s10303_s1 + $0x1310] sm:$0xff]  ;;  %v4779_v33 = vpack.c.bf16 %v665_v26, %v661_v25  ;;  %v4013_v39 = vpack.c.bf16 %v662_v31, %v658_v30  ;;  %v4031_v26 = vpack.c.bf16 %v703_v20, %v699_v19  ;;  %v725_v59 = vld [vmem:[%s10303_s1 + $0x1518] sm:$0xff] }
 0x120   :  { %4760 = vmatprep.subr.bf16.mxu1 %v4759_v37  ;;  %v669_v37 = vld [vmem:[%s10303_s1 + $0x1358] sm:$0xff]  ;;  %v4781_v40 = vpack.c.bf16 %v664_v34, %v660_v32  ;;  %v704_v31 = vld [vmem:[%s10303_s1 + $0x1470] sm:$0xff]  ;;  %v707_v32 = vld [vmem:[%s10303_s1 + $0x1488] sm:$0xff] }
 0x121   :  { %v709_v34 = vld [vmem:[%s10303_s1 + $0x1498] sm:$0xff] }
 0x122   :  { %3994 = vmatpush1.bf16.msra.mxu0 %v3993_v43  ;;  %v670_v43 = vld [vmem:[%s10303_s1 + $0x1360] sm:$0xff]  ;;  %v729_v60 = vld [vmem:[%s10303_s1 + $0x1538] sm:$0xff] }
 0x123   :  { %4762 = vmatpush1.bf16.msra.mxu1 %v4761_v44  ;;  %3996 = vmatprep.subr.bf16.mxu0 %v3995_v45  ;;  %v668_v44 = vld [vmem:[%s10303_s1 + $0x1350] sm:$0xff]  ;;  %v4783_v45 = vpack.c.bf16 %v673_v38, %v669_v37  ;;  %v4017_v51 = vpack.c.bf16 %v670_v43, %v666_v42  ;;  %v4803_v43 = vpack.c.bf16 %v713_v35, %v709_v34  ;;  %v733_v7 = vld [vmem:[%s10303_s1 + $0x1558] sm:$0xff] }
 0x124   :  { %4764 = vmatprep.subr.bf16.mxu1 %v4763_v49  ;;  %v677_v49 = vld [vmem:[%s10303_s1 + $0x1398] sm:$0xff]  ;;  %v4785_v52 = vpack.c.bf16 %v672_v46, %v668_v44  ;;  %v708_v42 = vld [vmem:[%s10303_s1 + $0x1490] sm:$0xff]  ;;  %v719_v46 = vld [vmem:[%s10303_s1 + $0x14e8] sm:$0xff] }
 0x125   :  { %v712_v44 = vld [vmem:[%s10303_s1 + $0x14b0] sm:$0xff]  ;;  %v737_v8 = vld [vmem:[%s10303_s1 + $0x1578] sm:$0xff] }
 0x126   :  { %3998 = vmatpush1.bf16.msra.mxu0 %v3997_v55  ;;  %v678_v55 = vld [vmem:[%s10303_s1 + $0x13a0] sm:$0xff]  ;;  %v741_v19 = vld [vmem:[%s10303_s1 + $0x1598] sm:$0xff] }
 0x127   :  { %4766 = vmatpush1.bf16.msra.mxu1 %v4765_v56  ;;  %4000 = vmatprep.subr.bf16.mxu0 %v3999_v57  ;;  %v676_v56 = vld [vmem:[%s10303_s1 + $0x1390] sm:$0xff]  ;;  %v4787_v57 = vpack.c.bf16 %v681_v50, %v677_v49  ;;  %v4021_v63 = vpack.c.bf16 %v678_v55, %v674_v54  ;;  %v4805_v50 = vpack.c.bf16 %v712_v44, %v708_v42  ;;  %v745_v20 = vld [vmem:[%s10303_s1 + $0x15b8] sm:$0xff]  ;;  %v759_v42 = vld [vmem:[%s10303_s1 + $0x1628] sm:$0xff] }
 0x128   :  { %4768 = vmatprep.subr.bf16.mxu1 %v4767_v61  ;;  %v685_v61 = vld [vmem:[%s10303_s1 + $0x13d8] sm:$0xff]  ;;  %v4789_v0 = vpack.c.bf16 %v680_v58, %v676_v56  ;;  %v716_v54 = vld [vmem:[%s10303_s1 + $0x14d0] sm:$0xff]  ;;  %v4807_v55 = vpack.c.bf16 %v721_v48, %v717_v47  ;;  %v727_v58 = vld [vmem:[%s10303_s1 + $0x1528] sm:$0xff] }
 0x129   :  { %v720_v56 = vld [vmem:[%s10303_s1 + $0x14f0] sm:$0xff]  ;;  %v761_v44 = vld [vmem:[%s10303_s1 + $0x1638] sm:$0xff]  ;;  %v754_v48 = vld [vmem:[%s10303_s1 + $0x1600] sm:$0xff] }
 0x12a   :  { %4002 = vmatpush1.bf16.msra.mxu0 %v4001_v3  ;;  %v686_v3 = vld [vmem:[%s10303_s1 + $0x13e0] sm:$0xff] }
 0x12b   :  { %4770 = vmatpush1.bf16.msra.mxu1 %v4769_v4  ;;  %4004 = vmatprep.subr.bf16.mxu0 %v4003_v5  ;;  %v684_v4 = vld [vmem:[%s10303_s1 + $0x13d0] sm:$0xff]  ;;  %v4791_v5 = vpack.c.bf16 %v689_v62, %v685_v61  ;;  %v4025_v11 = vpack.c.bf16 %v686_v3, %v682_v2  ;;  %v4809_v62 = vpack.c.bf16 %v720_v56, %v716_v54  ;;  %v767_v54 = vld [vmem:[%s10303_s1 + $0x1668] sm:$0xff]  ;;  %v769_v56 = vld [vmem:[%s10303_s1 + $0x1678] sm:$0xff] }
 0x12c   :  { %4772 = vmatprep.subr.bf16.mxu1 %v4771_v9  ;;  %v693_v9 = vld [vmem:[%s10303_s1 + $0x1418] sm:$0xff]  ;;  %v4793_v12 = vpack.c.bf16 %v688_v6, %v684_v4  ;;  %v724_v2 = vld [vmem:[%s10303_s1 + $0x1510] sm:$0xff]  ;;  %v4811_v3 = vpack.c.bf16 %v729_v60, %v725_v59  ;;  %v735_v6 = vld [vmem:[%s10303_s1 + $0x1568] sm:$0xff] }
 0x12d   :  { %v728_v4 = vld [vmem:[%s10303_s1 + $0x1530] sm:$0xff]  ;;  %v762_v60 = vld [vmem:[%s10303_s1 + $0x1640] sm:$0xff] }
 0x12e   :  { %4006 = vmatpush1.bf16.msra.mxu0 %v4005_v15  ;;  %v694_v15 = vld [vmem:[%s10303_s1 + $0x1420] sm:$0xff] }
 0x12f   :  { %4774 = vmatpush1.bf16.msra.mxu1 %v4773_v16  ;;  %4008 = vmatprep.subr.bf16.mxu0 %v4007_v17  ;;  %v692_v16 = vld [vmem:[%s10303_s1 + $0x1410] sm:$0xff]  ;;  %v4795_v17 = vpack.c.bf16 %v697_v10, %v693_v9  ;;  %v4029_v24 = vpack.c.bf16 %v694_v15, %v690_v14  ;;  %v4813_v10 = vpack.c.bf16 %v728_v4, %v724_v2  ;;  %v775_v2 = vld [vmem:[%s10303_s1 + $0x16a8] sm:$0xff]  ;;  %v777_v4 = vld [vmem:[%s10303_s1 + $0x16b8] sm:$0xff] }
 0x130   :  { %4776 = vmatprep.subr.bf16.mxu1 %v4775_v21  ;;  %v701_v21 = vld [vmem:[%s10303_s1 + $0x1458] sm:$0xff]  ;;  %v4797_v25 = vpack.c.bf16 %v696_v18, %v692_v16  ;;  %v732_v14 = vld [vmem:[%s10303_s1 + $0x1550] sm:$0xff]  ;;  %v4815_v15 = vpack.c.bf16 %v737_v8, %v733_v7  ;;  %v743_v18 = vld [vmem:[%s10303_s1 + $0x15a8] sm:$0xff] }
 0x131   :  { %v4799_v30 = vpack.c.bf16 %v705_v22, %v701_v21  ;;  %v736_v16 = vld [vmem:[%s10303_s1 + $0x1570] sm:$0xff]  ;;  %v770_v8 = vld [vmem:[%s10303_s1 + $0x1680] sm:$0xff] }
 0x132   :  { %4010 = vmatpush1.bf16.msra.mxu0 %v4009_v27  ;;  %v698_v27 = vld [vmem:[%s10303_s1 + $0x1440] sm:$0xff]  ;;  %v4817_v22 = vpack.c.bf16 %v736_v16, %v732_v14  ;;  %v783_v14 = vld [vmem:[%s10303_s1 + $0x16e8] sm:$0xff]  ;;  %v785_v16 = vld [vmem:[%s10303_s1 + $0x16f8] sm:$0xff] }
 0x133   :  { %4778 = vmatpush1.bf16.msra.mxu1 %v4777_v28  ;;  %4012 = vmatprep.subr.bf16.mxu0 %v4011_v29  ;;  %v702_v28 = vld [vmem:[%s10303_s1 + $0x1460] sm:$0xff]  ;;  %v700_v29 = vld [vmem:[%s10303_s1 + $0x1450] sm:$0xff] }
 0x134   :  { %4780 = vmatprep.subr.bf16.mxu1 %v4779_v33  ;;  %v711_v33 = vld [vmem:[%s10303_s1 + $0x14a8] sm:$0xff]  ;;  %v4033_v37 = vpack.c.bf16 %v702_v28, %v698_v27  ;;  %v4801_v38 = vpack.c.bf16 %v704_v31, %v700_v29  ;;  %v4819_v27 = vpack.c.bf16 %v745_v20, %v741_v19  ;;  %v744_v28 = vld [vmem:[%s10303_s1 + $0x15b0] sm:$0xff]  ;;  %v749_v31 = vld [vmem:[%s10303_s1 + $0x15d8] sm:$0xff] }
 0x135   :  { %v747_v29 = vld [vmem:[%s10303_s1 + $0x15c8] sm:$0xff]  ;;  %v778_v20 = vld [vmem:[%s10303_s1 + $0x16c0] sm:$0xff] }
 0x136   :  { %4014 = vmatpush1.bf16.msra.mxu0 %v4013_v39  ;;  %v4035_v39 = vpack.c.bf16 %v711_v33, %v707_v32  ;;  %v753_v32 = vld [vmem:[%s10303_s1 + $0x15f8] sm:$0xff] }
 0x137   :  { %4782 = vmatpush1.bf16.msra.mxu1 %v4781_v40  ;;  %4016 = vmatprep.subr.bf16.mxu0 %v4015_v41  ;;  %v706_v40 = vld [vmem:[%s10303_s1 + $0x1480] sm:$0xff] }
 0x138   :  { %4784 = vmatprep.subr.bf16.mxu1 %v4783_v45  ;;  %v710_v41 = vld [vmem:[%s10303_s1 + $0x14a0] sm:$0xff]  ;;  %v715_v45 = vld [vmem:[%s10303_s1 + $0x14c8] sm:$0xff] }
 0x139   :  { %v4037_v49 = vpack.c.bf16 %v710_v41, %v706_v40  ;;  %v752_v40 = vld [vmem:[%s10303_s1 + $0x15f0] sm:$0xff]  ;;  %v755_v41 = vld [vmem:[%s10303_s1 + $0x1608] sm:$0xff] }
 0x13a   :  { %4018 = vmatpush1.bf16.msra.mxu0 %v4017_v51  ;;  %v4039_v51 = vpack.c.bf16 %v719_v46, %v715_v45  ;;  %v4059_v47 = vpack.c.bf16 %v759_v42, %v755_v41 }
 0x13b   :  { %4786 = vmatpush1.bf16.msra.mxu1 %v4785_v52  ;;  %4020 = vmatprep.subr.bf16.mxu0 %v4019_v53  ;;  %v714_v52 = vld [vmem:[%s10303_s1 + $0x14c0] sm:$0xff] }
 0x13c   :  { %4788 = vmatprep.subr.bf16.mxu1 %v4787_v57  ;;  %v718_v53 = vld [vmem:[%s10303_s1 + $0x14e0] sm:$0xff]  ;;  %v723_v57 = vld [vmem:[%s10303_s1 + $0x1508] sm:$0xff] }
 0x13d   :  { %v4041_v61 = vpack.c.bf16 %v718_v53, %v714_v52  ;;  %v760_v52 = vld [vmem:[%s10303_s1 + $0x1630] sm:$0xff]  ;;  %v763_v53 = vld [vmem:[%s10303_s1 + $0x1648] sm:$0xff] }
 0x13e   :  { %4022 = vmatpush1.bf16.msra.mxu0 %v4021_v63  ;;  %v4043_v63 = vpack.c.bf16 %v727_v58, %v723_v57  ;;  %v4063_v59 = vpack.c.bf16 %v767_v54, %v763_v53 }
 0x13f   :  { %4790 = vmatpush1.bf16.msra.mxu1 %v4789_v0  ;;  %4024 = vmatprep.subr.bf16.mxu0 %v4023_v1  ;;  %v722_v0 = vld [vmem:[%s10303_s1 + $0x1500] sm:$0xff] }
 0x140   :  { %4792 = vmatprep.subr.bf16.mxu1 %v4791_v5  ;;  %v726_v1 = vld [vmem:[%s10303_s1 + $0x1520] sm:$0xff]  ;;  %v731_v5 = vld [vmem:[%s10303_s1 + $0x1548] sm:$0xff] }
 0x141   :  { %v4045_v9 = vpack.c.bf16 %v726_v1, %v722_v0  ;;  %v768_v0 = vld [vmem:[%s10303_s1 + $0x1670] sm:$0xff]  ;;  %v771_v1 = vld [vmem:[%s10303_s1 + $0x1688] sm:$0xff] }
 0x142   :  { %4026 = vmatpush1.bf16.msra.mxu0 %v4025_v11  ;;  %v4047_v11 = vpack.c.bf16 %v735_v6, %v731_v5  ;;  %v4067_v7 = vpack.c.bf16 %v775_v2, %v771_v1 }
 0x143   :  { %4794 = vmatpush1.bf16.msra.mxu1 %v4793_v12  ;;  %4028 = vmatprep.subr.bf16.mxu0 %v4027_v13  ;;  %v730_v12 = vld [vmem:[%s10303_s1 + $0x1540] sm:$0xff] }
 0x144   :  { %4796 = vmatprep.subr.bf16.mxu1 %v4795_v17  ;;  %v734_v13 = vld [vmem:[%s10303_s1 + $0x1560] sm:$0xff]  ;;  %v739_v17 = vld [vmem:[%s10303_s1 + $0x1588] sm:$0xff] }
 0x145   :  { %1957 = vmatmul.mubr.f32.vlgmr.msra.gmra.mrb[0].mxu0 %v34_v23  ;;  %v4049_v21 = vpack.c.bf16 %v734_v13, %v730_v12  ;;  %v776_v12 = vld [vmem:[%s10303_s1 + $0x16b0] sm:$0xff]  ;;  %v779_v13 = vld [vmem:[%s10303_s1 + $0x16c8] sm:$0xff] }
 0x146   :  { %4030 = vmatpush1.bf16.msra.mxu0 %v4029_v24  ;;  %2809 = vmatmul.mubr.f32.vlgmr.msra.gmra.mrb[0].mxu1 %v34_v23  ;;  %v4051_v23 = vpack.c.bf16 %v743_v18, %v739_v17  ;;  %v738_v24 = vld [vmem:[%s10303_s1 + $0x1580] sm:$0xff]  ;;  %v4071_v19 = vpack.c.bf16 %v783_v14, %v779_v13 }
 0x147   :  { %4798 = vmatpush1.bf16.msra.mxu1 %v4797_v25  ;;  %4032 = vmatprep.subr.bf16.mxu0 %v4031_v26  ;;  %v742_v25 = vld [vmem:[%s10303_s1 + $0x15a0] sm:$0xff]  ;;  %v740_v26 = vld [vmem:[%s10303_s1 + $0x1590] sm:$0xff] }
 0x148   :  { %4800 = vmatprep.subr.bf16.mxu1 %v4799_v30  ;;  %2027 = vmatprep.mubr.f32.mxu0 %v37_v36  ;;  %v751_v30 = vld [vmem:[%s10303_s1 + $0x15e8] sm:$0xff]  ;;  %v4053_v33 = vpack.c.bf16 %v742_v25, %v738_v24  ;;  %v4821_v34 = vpack.c.bf16 %v744_v28, %v740_v26  ;;  %v784_v24 = vld [vmem:[%s10303_s1 + $0x16f0] sm:$0xff]  ;;  %v793_v28 = vld [vmem:[%s10303_s1 + $0x1738] sm:$0xff] }
 0x149   :  { %2879 = vmatprep.mubr.f32.mxu1 %v37_v36  ;;  %v4055_v35 = vpack.c.bf16 %v751_v30, %v747_v29  ;;  %v746_v36 = vld [vmem:[%s10303_s1 + $0x15c0] sm:$0xff]  ;;  %v787_v25 = vld [vmem:[%s10303_s1 + $0x1708] sm:$0xff] }
 0x14a   :  { %4034 = vmatpush1.bf16.msra.mxu0 %v4033_v37  ;;  %v750_v37 = vld [vmem:[%s10303_s1 + $0x15e0] sm:$0xff]  ;;  %v791_v26 = vld [vmem:[%s10303_s1 + $0x1728] sm:$0xff] }
 0x14b   :  { %4802 = vmatpush1.bf16.msra.mxu1 %v4801_v38  ;;  %4036 = vmatprep.subr.bf16.mxu0 %v4035_v39  ;;  %v748_v38 = vld [vmem:[%s10303_s1 + $0x15d0] sm:$0xff]  ;;  %v4823_v39 = vpack.c.bf16 %v753_v32, %v749_v31  ;;  %v4057_v45 = vpack.c.bf16 %v750_v37, %v746_v36  ;;  %v4075_v31 = vpack.c.bf16 %v791_v26, %v787_v25  ;;  %v786_v32 = vld [vmem:[%s10303_s1 + $0x1700] sm:$0xff]  ;;  %v795_v37 = vld [vmem:[%s10303_s1 + $0x1748] sm:$0xff] }
 0x14c   :  { %4804 = vmatprep.subr.bf16.mxu1 %v4803_v43  ;;  %v757_v43 = vld [vmem:[%s10303_s1 + $0x1618] sm:$0xff]  ;;  %v4825_v46 = vpack.c.bf16 %v752_v40, %v748_v38  ;;  %v792_v36 = vld [vmem:[%s10303_s1 + $0x1730] sm:$0xff]  ;;  %v799_v38 = vld [vmem:[%s10303_s1 + $0x1768] sm:$0xff] }
 0x14d   :  { %v801_v40 = vld [vmem:[%s10303_s1 + $0x1778] sm:$0xff]  ;;  %v36_v25 = vld [vmem:[%s10304_s0 + $0x50] sm:$0xff] }
 0x14e   :  { %4038 = vmatpush1.bf16.msra.mxu0 %v4037_v49  ;;  %v758_v49 = vld [vmem:[%s10303_s1 + $0x1620] sm:$0xff] }
 0x14f   :  { %4806 = vmatpush1.bf16.msra.mxu1 %v4805_v50  ;;  %4040 = vmatprep.subr.bf16.mxu0 %v4039_v51  ;;  %v756_v50 = vld [vmem:[%s10303_s1 + $0x1610] sm:$0xff]  ;;  %v4827_v51 = vpack.c.bf16 %v761_v44, %v757_v43  ;;  %v4061_v57 = vpack.c.bf16 %v758_v49, %v754_v48  ;;  %v4079_v43 = vpack.c.bf16 %v799_v38, %v795_v37  ;;  %v794_v44 = vld [vmem:[%s10303_s1 + $0x1740] sm:$0xff]  ;;  %v803_v49 = vld [vmem:[%s10303_s1 + $0x1788] sm:$0xff] }
 0x150   :  { %4808 = vmatprep.subr.bf16.mxu1 %v4807_v55  ;;  %v765_v55 = vld [vmem:[%s10303_s1 + $0x1658] sm:$0xff]  ;;  %v4829_v58 = vpack.c.bf16 %v760_v52, %v756_v50  ;;  %v800_v48 = vld [vmem:[%s10303_s1 + $0x1770] sm:$0xff]  ;;  %v807_v50 = vld [vmem:[%s10303_s1 + $0x17a8] sm:$0xff] }
 0x151   :  { %v809_v52 = vld [vmem:[%s10303_s1 + $0x17b8] sm:$0xff]  ;;  %v39_v38 = vld [vmem:[%s10304_s0 + $0x68] sm:$0xff] }
 0x152   :  { %4042 = vmatpush1.bf16.msra.mxu0 %v4041_v61  ;;  %v766_v61 = vld [vmem:[%s10303_s1 + $0x1660] sm:$0xff]  ;;  %v841_v37 = vld [vmem:[%s10303_s1 + $0x18b8] sm:$0xff] }
 0x153   :  { %4810 = vmatpush1.bf16.msra.mxu1 %v4809_v62  ;;  %4044 = vmatprep.subr.bf16.mxu0 %v4043_v63  ;;  %v764_v62 = vld [vmem:[%s10303_s1 + $0x1650] sm:$0xff]  ;;  %v4831_v63 = vpack.c.bf16 %v769_v56, %v765_v55  ;;  %v4065_v5 = vpack.c.bf16 %v766_v61, %v762_v60  ;;  %v4083_v55 = vpack.c.bf16 %v807_v50, %v803_v49  ;;  %v802_v56 = vld [vmem:[%s10303_s1 + $0x1780] sm:$0xff]  ;;  %v811_v61 = vld [vmem:[%s10303_s1 + $0x17c8] sm:$0xff] }
 0x154   :  { %4812 = vmatprep.subr.bf16.mxu1 %v4811_v3  ;;  %v773_v3 = vld [vmem:[%s10303_s1 + $0x1698] sm:$0xff]  ;;  %v4833_v6 = vpack.c.bf16 %v768_v0, %v764_v62  ;;  %v808_v60 = vld [vmem:[%s10303_s1 + $0x17b0] sm:$0xff]  ;;  %v815_v62 = vld [vmem:[%s10303_s1 + $0x17e8] sm:$0xff] }
 0x155   :  { %v817_v0 = vld [vmem:[%s10303_s1 + $0x17f8] sm:$0xff] }
 0x156   :  { %4046 = vmatpush1.bf16.msra.mxu0 %v4045_v9  ;;  %v774_v9 = vld [vmem:[%s10303_s1 + $0x16a0] sm:$0xff]  ;;  %v845_v49 = vld [vmem:[%s10303_s1 + $0x18d8] sm:$0xff] }
 0x157   :  { %4814 = vmatpush1.bf16.msra.mxu1 %v4813_v10  ;;  %4048 = vmatprep.subr.bf16.mxu0 %v4047_v11  ;;  %v772_v10 = vld [vmem:[%s10303_s1 + $0x1690] sm:$0xff]  ;;  %v4835_v11 = vpack.c.bf16 %v777_v4, %v773_v3  ;;  %v4069_v17 = vpack.c.bf16 %v774_v9, %v770_v8  ;;  %v4087_v3 = vpack.c.bf16 %v815_v62, %v811_v61  ;;  %v810_v4 = vld [vmem:[%s10303_s1 + $0x17c0] sm:$0xff]  ;;  %v819_v9 = vld [vmem:[%s10303_s1 + $0x1808] sm:$0xff] }
 0x158   :  { %4816 = vmatprep.subr.bf16.mxu1 %v4815_v15  ;;  %v781_v15 = vld [vmem:[%s10303_s1 + $0x16d8] sm:$0xff]  ;;  %v4837_v18 = vpack.c.bf16 %v776_v12, %v772_v10  ;;  %v816_v8 = vld [vmem:[%s10303_s1 + $0x17f0] sm:$0xff]  ;;  %v823_v10 = vld [vmem:[%s10303_s1 + $0x1828] sm:$0xff] }
 0x159   :  { %v825_v12 = vld [vmem:[%s10303_s1 + $0x1838] sm:$0xff] }
 0x15a   :  { %4050 = vmatpush1.bf16.msra.mxu0 %v4049_v21  ;;  %v782_v21 = vld [vmem:[%s10303_s1 + $0x16e0] sm:$0xff]  ;;  %v849_v50 = vld [vmem:[%s10303_s1 + $0x18f8] sm:$0xff] }
 0x15b   :  { %4818 = vmatpush1.bf16.msra.mxu1 %v4817_v22  ;;  %4052 = vmatprep.subr.bf16.mxu0 %v4051_v23  ;;  %v780_v22 = vld [vmem:[%s10303_s1 + $0x16d0] sm:$0xff]  ;;  %v4839_v23 = vpack.c.bf16 %v785_v16, %v781_v15  ;;  %v4073_v29 = vpack.c.bf16 %v782_v21, %v778_v20  ;;  %v4091_v15 = vpack.c.bf16 %v823_v10, %v819_v9  ;;  %v818_v16 = vld [vmem:[%s10303_s1 + $0x1800] sm:$0xff]  ;;  %v827_v21 = vld [vmem:[%s10303_s1 + $0x1848] sm:$0xff] }
 0x15c   :  { %4820 = vmatprep.subr.bf16.mxu1 %v4819_v27  ;;  %v789_v27 = vld [vmem:[%s10303_s1 + $0x1718] sm:$0xff]  ;;  %v4841_v30 = vpack.c.bf16 %v784_v24, %v780_v22  ;;  %v824_v20 = vld [vmem:[%s10303_s1 + $0x1830] sm:$0xff]  ;;  %v831_v22 = vld [vmem:[%s10303_s1 + $0x1868] sm:$0xff] }
 0x15d   :  { %v833_v24 = vld [vmem:[%s10303_s1 + $0x1878] sm:$0xff] }
 0x15e   :  { %4054 = vmatpush1.bf16.msra.mxu0 %v4053_v33  ;;  %v790_v33 = vld [vmem:[%s10303_s1 + $0x1720] sm:$0xff]  ;;  %v853_v61 = vld [vmem:[%s10303_s1 + $0x1918] sm:$0xff] }
 0x15f   :  { %4822 = vmatpush1.bf16.msra.mxu1 %v4821_v34  ;;  %4056 = vmatprep.subr.bf16.mxu0 %v4055_v35  ;;  %v788_v34 = vld [vmem:[%s10303_s1 + $0x1710] sm:$0xff]  ;;  %v4843_v35 = vpack.c.bf16 %v793_v28, %v789_v27  ;;  %v4077_v41 = vpack.c.bf16 %v790_v33, %v786_v32  ;;  %v4095_v28 = vpack.c.bf16 %v831_v22, %v827_v21  ;;  %v857_v62 = vld [vmem:[%s10303_s1 + $0x1938] sm:$0xff] }
 0x160   :  { %4824 = vmatprep.subr.bf16.mxu1 %v4823_v39  ;;  %v797_v39 = vld [vmem:[%s10303_s1 + $0x1758] sm:$0xff]  ;;  %v4845_v42 = vpack.c.bf16 %v792_v36, %v788_v34  ;;  %v832_v33 = vld [vmem:[%s10303_s1 + $0x1870] sm:$0xff]  ;;  %v835_v34 = vld [vmem:[%s10303_s1 + $0x1888] sm:$0xff] }
 0x161   :  { %v837_v36 = vld [vmem:[%s10303_s1 + $0x1898] sm:$0xff] }
 0x162   :  { %4058 = vmatpush1.bf16.msra.mxu0 %v4057_v45  ;;  %v798_v45 = vld [vmem:[%s10303_s1 + $0x1760] sm:$0xff]  ;;  %v861_v9 = vld [vmem:[%s10303_s1 + $0x1958] sm:$0xff] }
 0x163   :  { %4826 = vmatpush1.bf16.msra.mxu1 %v4825_v46  ;;  %4060 = vmatprep.subr.bf16.mxu0 %v4059_v47  ;;  %v796_v46 = vld [vmem:[%s10303_s1 + $0x1750] sm:$0xff]  ;;  %v4847_v47 = vpack.c.bf16 %v801_v40, %v797_v39  ;;  %v4081_v53 = vpack.c.bf16 %v798_v45, %v794_v44  ;;  %v4867_v45 = vpack.c.bf16 %v841_v37, %v837_v36  ;;  %v865_v10 = vld [vmem:[%s10303_s1 + $0x1978] sm:$0xff] }
 0x164   :  { %4828 = vmatprep.subr.bf16.mxu1 %v4827_v51  ;;  %v805_v51 = vld [vmem:[%s10303_s1 + $0x1798] sm:$0xff]  ;;  %v4849_v54 = vpack.c.bf16 %v800_v48, %v796_v46  ;;  %v836_v44 = vld [vmem:[%s10303_s1 + $0x1890] sm:$0xff]  ;;  %v847_v48 = vld [vmem:[%s10303_s1 + $0x18e8] sm:$0xff] }
 0x165   :  { %v840_v46 = vld [vmem:[%s10303_s1 + $0x18b0] sm:$0xff]  ;;  %v869_v21 = vld [vmem:[%s10303_s1 + $0x1998] sm:$0xff] }
 0x166   :  { %4062 = vmatpush1.bf16.msra.mxu0 %v4061_v57  ;;  %v806_v57 = vld [vmem:[%s10303_s1 + $0x17a0] sm:$0xff]  ;;  %v873_v22 = vld [vmem:[%s10303_s1 + $0x19b8] sm:$0xff] }
 0x167   :  { %4830 = vmatpush1.bf16.msra.mxu1 %v4829_v58  ;;  %4064 = vmatprep.subr.bf16.mxu0 %v4063_v59  ;;  %v804_v58 = vld [vmem:[%s10303_s1 + $0x1790] sm:$0xff]  ;;  %v4851_v59 = vpack.c.bf16 %v809_v52, %v805_v51  ;;  %v4085_v1 = vpack.c.bf16 %v806_v57, %v802_v56  ;;  %v4869_v52 = vpack.c.bf16 %v840_v46, %v836_v44  ;;  %v887_v44 = vld [vmem:[%s10303_s1 + $0x1a28] sm:$0xff]  ;;  %v889_v46 = vld [vmem:[%s10303_s1 + $0x1a38] sm:$0xff] }
 0x168   :  { %4832 = vmatprep.subr.bf16.mxu1 %v4831_v63  ;;  %v813_v63 = vld [vmem:[%s10303_s1 + $0x17d8] sm:$0xff]  ;;  %v4853_v2 = vpack.c.bf16 %v808_v60, %v804_v58  ;;  %v844_v56 = vld [vmem:[%s10303_s1 + $0x18d0] sm:$0xff]  ;;  %v4871_v57 = vpack.c.bf16 %v849_v50, %v845_v49  ;;  %v855_v60 = vld [vmem:[%s10303_s1 + $0x1928] sm:$0xff] }
 0x169   :  { %v848_v58 = vld [vmem:[%s10303_s1 + $0x18f0] sm:$0xff]  ;;  %v882_v50 = vld [vmem:[%s10303_s1 + $0x1a00] sm:$0xff] }
 0x16a   :  { %4066 = vmatpush1.bf16.msra.mxu0 %v4065_v5  ;;  %v814_v5 = vld [vmem:[%s10303_s1 + $0x17e0] sm:$0xff] }
 0x16b   :  { %4834 = vmatpush1.bf16.msra.mxu1 %v4833_v6  ;;  %4068 = vmatprep.subr.bf16.mxu0 %v4067_v7  ;;  %v812_v6 = vld [vmem:[%s10303_s1 + $0x17d0] sm:$0xff]  ;;  %v4855_v7 = vpack.c.bf16 %v817_v0, %v813_v63  ;;  %v4089_v13 = vpack.c.bf16 %v814_v5, %v810_v4  ;;  %v4873_v0 = vpack.c.bf16 %v848_v58, %v844_v56  ;;  %v895_v56 = vld [vmem:[%s10303_s1 + $0x1a68] sm:$0xff]  ;;  %v897_v58 = vld [vmem:[%s10303_s1 + $0x1a78] sm:$0xff] }
 0x16c   :  { %4836 = vmatprep.subr.bf16.mxu1 %v4835_v11  ;;  %v821_v11 = vld [vmem:[%s10303_s1 + $0x1818] sm:$0xff]  ;;  %v4857_v14 = vpack.c.bf16 %v816_v8, %v812_v6  ;;  %v852_v4 = vld [vmem:[%s10303_s1 + $0x1910] sm:$0xff]  ;;  %v4875_v5 = vpack.c.bf16 %v857_v62, %v853_v61  ;;  %v863_v8 = vld [vmem:[%s10303_s1 + $0x1968] sm:$0xff] }
 0x16d   :  { %v856_v6 = vld [vmem:[%s10303_s1 + $0x1930] sm:$0xff]  ;;  %v890_v62 = vld [vmem:[%s10303_s1 + $0x1a40] sm:$0xff] }
 0x16e   :  { %4070 = vmatpush1.bf16.msra.mxu0 %v4069_v17  ;;  %v822_v17 = vld [vmem:[%s10303_s1 + $0x1820] sm:$0xff] }
 0x16f   :  { %4838 = vmatpush1.bf16.msra.mxu1 %v4837_v18  ;;  %4072 = vmatprep.subr.bf16.mxu0 %v4071_v19  ;;  %v820_v18 = vld [vmem:[%s10303_s1 + $0x1810] sm:$0xff]  ;;  %v4859_v19 = vpack.c.bf16 %v825_v12, %v821_v11  ;;  %v4093_v26 = vpack.c.bf16 %v822_v17, %v818_v16  ;;  %v4877_v12 = vpack.c.bf16 %v856_v6, %v852_v4  ;;  %v903_v4 = vld [vmem:[%s10303_s1 + $0x1aa8] sm:$0xff]  ;;  %v905_v6 = vld [vmem:[%s10303_s1 + $0x1ab8] sm:$0xff] }
 0x170   :  { %4840 = vmatprep.subr.bf16.mxu1 %v4839_v23  ;;  %v829_v23 = vld [vmem:[%s10303_s1 + $0x1858] sm:$0xff]  ;;  %v4861_v27 = vpack.c.bf16 %v824_v20, %v820_v18  ;;  %v860_v16 = vld [vmem:[%s10303_s1 + $0x1950] sm:$0xff]  ;;  %v4879_v17 = vpack.c.bf16 %v865_v10, %v861_v9  ;;  %v871_v20 = vld [vmem:[%s10303_s1 + $0x19a8] sm:$0xff] }
 0x171   :  { %v4863_v32 = vpack.c.bf16 %v833_v24, %v829_v23  ;;  %v864_v18 = vld [vmem:[%s10303_s1 + $0x1970] sm:$0xff]  ;;  %v898_v10 = vld [vmem:[%s10303_s1 + $0x1a80] sm:$0xff] }
 0x172   :  { %4074 = vmatpush1.bf16.msra.mxu0 %v4073_v29  ;;  %v826_v29 = vld [vmem:[%s10303_s1 + $0x1840] sm:$0xff]  ;;  %v4881_v24 = vpack.c.bf16 %v864_v18, %v860_v16  ;;  %v911_v16 = vld [vmem:[%s10303_s1 + $0x1ae8] sm:$0xff]  ;;  %v913_v18 = vld [vmem:[%s10303_s1 + $0x1af8] sm:$0xff] }
 0x173   :  { %4842 = vmatpush1.bf16.msra.mxu1 %v4841_v30  ;;  %4076 = vmatprep.subr.bf16.mxu0 %v4075_v31  ;;  %v830_v30 = vld [vmem:[%s10303_s1 + $0x1860] sm:$0xff]  ;;  %v828_v31 = vld [vmem:[%s10303_s1 + $0x1850] sm:$0xff] }
 0x174   :  { %4844 = vmatprep.subr.bf16.mxu1 %v4843_v35  ;;  %v839_v35 = vld [vmem:[%s10303_s1 + $0x18a8] sm:$0xff]  ;;  %v4097_v39 = vpack.c.bf16 %v830_v30, %v826_v29  ;;  %v4865_v40 = vpack.c.bf16 %v832_v33, %v828_v31  ;;  %v4883_v29 = vpack.c.bf16 %v873_v22, %v869_v21  ;;  %v872_v30 = vld [vmem:[%s10303_s1 + $0x19b0] sm:$0xff]  ;;  %v877_v33 = vld [vmem:[%s10303_s1 + $0x19d8] sm:$0xff] }
 0x175   :  { %v875_v31 = vld [vmem:[%s10303_s1 + $0x19c8] sm:$0xff]  ;;  %v906_v22 = vld [vmem:[%s10303_s1 + $0x1ac0] sm:$0xff] }
 0x176   :  { %4078 = vmatpush1.bf16.msra.mxu0 %v4077_v41  ;;  %v4099_v41 = vpack.c.bf16 %v839_v35, %v835_v34  ;;  %v881_v34 = vld [vmem:[%s10303_s1 + $0x19f8] sm:$0xff] }
 0x177   :  { %4846 = vmatpush1.bf16.msra.mxu1 %v4845_v42  ;;  %4080 = vmatprep.subr.bf16.mxu0 %v4079_v43  ;;  %v834_v42 = vld [vmem:[%s10303_s1 + $0x1880] sm:$0xff] }
 0x178   :  { %4848 = vmatprep.subr.bf16.mxu1 %v4847_v47  ;;  %v838_v43 = vld [vmem:[%s10303_s1 + $0x18a0] sm:$0xff]  ;;  %v843_v47 = vld [vmem:[%s10303_s1 + $0x18c8] sm:$0xff] }
 0x179   :  { %v4101_v51 = vpack.c.bf16 %v838_v43, %v834_v42  ;;  %v880_v42 = vld [vmem:[%s10303_s1 + $0x19f0] sm:$0xff]  ;;  %v883_v43 = vld [vmem:[%s10303_s1 + $0x1a08] sm:$0xff] }
 0x17a   :  { %4082 = vmatpush1.bf16.msra.mxu0 %v4081_v53  ;;  %v4103_v53 = vpack.c.bf16 %v847_v48, %v843_v47  ;;  %v4123_v49 = vpack.c.bf16 %v887_v44, %v883_v43 }
 0x17b   :  { %4850 = vmatpush1.bf16.msra.mxu1 %v4849_v54  ;;  %4084 = vmatprep.subr.bf16.mxu0 %v4083_v55  ;;  %v842_v54 = vld [vmem:[%s10303_s1 + $0x18c0] sm:$0xff] }
 0x17c   :  { %4852 = vmatprep.subr.bf16.mxu1 %v4851_v59  ;;  %v846_v55 = vld [vmem:[%s10303_s1 + $0x18e0] sm:$0xff]  ;;  %v851_v59 = vld [vmem:[%s10303_s1 + $0x1908] sm:$0xff] }
 0x17d   :  { %v4105_v63 = vpack.c.bf16 %v846_v55, %v842_v54  ;;  %v888_v54 = vld [vmem:[%s10303_s1 + $0x1a30] sm:$0xff]  ;;  %v891_v55 = vld [vmem:[%s10303_s1 + $0x1a48] sm:$0xff] }
 0x17e   :  { %4086 = vmatpush1.bf16.msra.mxu0 %v4085_v1  ;;  %v4107_v1 = vpack.c.bf16 %v855_v60, %v851_v59  ;;  %v4127_v61 = vpack.c.bf16 %v895_v56, %v891_v55 }
 0x17f   :  { %4854 = vmatpush1.bf16.msra.mxu1 %v4853_v2  ;;  %4088 = vmatprep.subr.bf16.mxu0 %v4087_v3  ;;  %v850_v2 = vld [vmem:[%s10303_s1 + $0x1900] sm:$0xff] }
 0x180   :  { %4856 = vmatprep.subr.bf16.mxu1 %v4855_v7  ;;  %v854_v3 = vld [vmem:[%s10303_s1 + $0x1920] sm:$0xff]  ;;  %v859_v7 = vld [vmem:[%s10303_s1 + $0x1948] sm:$0xff] }
 0x181   :  { %v4109_v11 = vpack.c.bf16 %v854_v3, %v850_v2  ;;  %v896_v2 = vld [vmem:[%s10303_s1 + $0x1a70] sm:$0xff]  ;;  %v899_v3 = vld [vmem:[%s10303_s1 + $0x1a88] sm:$0xff] }
 0x182   :  { %4090 = vmatpush1.bf16.msra.mxu0 %v4089_v13  ;;  %v4111_v13 = vpack.c.bf16 %v863_v8, %v859_v7  ;;  %v4131_v9 = vpack.c.bf16 %v903_v4, %v899_v3 }
 0x183   :  { %4858 = vmatpush1.bf16.msra.mxu1 %v4857_v14  ;;  %4092 = vmatprep.subr.bf16.mxu0 %v4091_v15  ;;  %v858_v14 = vld [vmem:[%s10303_s1 + $0x1940] sm:$0xff] }
 0x184   :  { %4860 = vmatprep.subr.bf16.mxu1 %v4859_v19  ;;  %v862_v15 = vld [vmem:[%s10303_s1 + $0x1960] sm:$0xff]  ;;  %v867_v19 = vld [vmem:[%s10303_s1 + $0x1988] sm:$0xff] }
 0x185   :  { %2028 = vmatmul.mubr.f32.vlgmr.msra.gmra.mrb[0].mxu0 %v36_v25  ;;  %v4113_v23 = vpack.c.bf16 %v862_v15, %v858_v14  ;;  %v904_v14 = vld [vmem:[%s10303_s1 + $0x1ab0] sm:$0xff]  ;;  %v907_v15 = vld [vmem:[%s10303_s1 + $0x1ac8] sm:$0xff] }
 0x186   :  { %4094 = vmatpush1.bf16.msra.mxu0 %v4093_v26  ;;  %2880 = vmatmul.mubr.f32.vlgmr.msra.gmra.mrb[0].mxu1 %v36_v25  ;;  %v4115_v25 = vpack.c.bf16 %v871_v20, %v867_v19  ;;  %v866_v26 = vld [vmem:[%s10303_s1 + $0x1980] sm:$0xff]  ;;  %v4135_v21 = vpack.c.bf16 %v911_v16, %v907_v15 }
 0x187   :  { %4862 = vmatpush1.bf16.msra.mxu1 %v4861_v27  ;;  %4096 = vmatprep.subr.bf16.mxu0 %v4095_v28  ;;  %v870_v27 = vld [vmem:[%s10303_s1 + $0x19a0] sm:$0xff]  ;;  %v868_v28 = vld [vmem:[%s10303_s1 + $0x1990] sm:$0xff] }
 0x188   :  { %4864 = vmatprep.subr.bf16.mxu1 %v4863_v32  ;;  %2098 = vmatprep.mubr.f32.mxu0 %v39_v38  ;;  %v879_v32 = vld [vmem:[%s10303_s1 + $0x19e8] sm:$0xff]  ;;  %v4117_v35 = vpack.c.bf16 %v870_v27, %v866_v26  ;;  %v4885_v36 = vpack.c.bf16 %v872_v30, %v868_v28  ;;  %v912_v26 = vld [vmem:[%s10303_s1 + $0x1af0] sm:$0xff]  ;;  %v921_v30 = vld [vmem:[%s10303_s1 + $0x1b38] sm:$0xff] }
 0x189   :  { %2950 = vmatprep.mubr.f32.mxu1 %v39_v38  ;;  %v4119_v37 = vpack.c.bf16 %v879_v32, %v875_v31  ;;  %v874_v38 = vld [vmem:[%s10303_s1 + $0x19c0] sm:$0xff]  ;;  %v915_v27 = vld [vmem:[%s10303_s1 + $0x1b08] sm:$0xff] }
 0x18a   :  { %4098 = vmatpush1.bf16.msra.mxu0 %v4097_v39  ;;  %v878_v39 = vld [vmem:[%s10303_s1 + $0x19e0] sm:$0xff]  ;;  %v919_v28 = vld [vmem:[%s10303_s1 + $0x1b28] sm:$0xff] }
 0x18b   :  { %4866 = vmatpush1.bf16.msra.mxu1 %v4865_v40  ;;  %4100 = vmatprep.subr.bf16.mxu0 %v4099_v41  ;;  %v876_v40 = vld [vmem:[%s10303_s1 + $0x19d0] sm:$0xff]  ;;  %v4887_v41 = vpack.c.bf16 %v881_v34, %v877_v33  ;;  %v4121_v47 = vpack.c.bf16 %v878_v39, %v874_v38  ;;  %v4139_v33 = vpack.c.bf16 %v919_v28, %v915_v27  ;;  %v914_v34 = vld [vmem:[%s10303_s1 + $0x1b00] sm:$0xff]  ;;  %v923_v39 = vld [vmem:[%s10303_s1 + $0x1b48] sm:$0xff] }
 0x18c   :  { %4868 = vmatprep.subr.bf16.mxu1 %v4867_v45  ;;  %v885_v45 = vld [vmem:[%s10303_s1 + $0x1a18] sm:$0xff]  ;;  %v4889_v48 = vpack.c.bf16 %v880_v42, %v876_v40  ;;  %v920_v38 = vld [vmem:[%s10303_s1 + $0x1b30] sm:$0xff]  ;;  %v927_v40 = vld [vmem:[%s10303_s1 + $0x1b68] sm:$0xff] }
 0x18d   :  { %v929_v42 = vld [vmem:[%s10303_s1 + $0x1b78] sm:$0xff]  ;;  %v38_v27 = vld [vmem:[%s10304_s0 + $0x60] sm:$0xff] }
 0x18e   :  { %4102 = vmatpush1.bf16.msra.mxu0 %v4101_v51  ;;  %v886_v51 = vld [vmem:[%s10303_s1 + $0x1a20] sm:$0xff] }
 0x18f   :  { %4870 = vmatpush1.bf16.msra.mxu1 %v4869_v52  ;;  %4104 = vmatprep.subr.bf16.mxu0 %v4103_v53  ;;  %v884_v52 = vld [vmem:[%s10303_s1 + $0x1a10] sm:$0xff]  ;;  %v4891_v53 = vpack.c.bf16 %v889_v46, %v885_v45  ;;  %v4125_v59 = vpack.c.bf16 %v886_v51, %v882_v50  ;;  %v4143_v45 = vpack.c.bf16 %v927_v40, %v923_v39  ;;  %v922_v46 = vld [vmem:[%s10303_s1 + $0x1b40] sm:$0xff]  ;;  %v931_v51 = vld [vmem:[%s10303_s1 + $0x1b88] sm:$0xff] }
 0x190   :  { %4872 = vmatprep.subr.bf16.mxu1 %v4871_v57  ;;  %v893_v57 = vld [vmem:[%s10303_s1 + $0x1a58] sm:$0xff]  ;;  %v4893_v60 = vpack.c.bf16 %v888_v54, %v884_v52  ;;  %v928_v50 = vld [vmem:[%s10303_s1 + $0x1b70] sm:$0xff]  ;;  %v935_v52 = vld [vmem:[%s10303_s1 + $0x1ba8] sm:$0xff] }
 0x191   :  { %v937_v54 = vld [vmem:[%s10303_s1 + $0x1bb8] sm:$0xff] }
 0x192   :  { %4106 = vmatpush1.bf16.msra.mxu0 %v4105_v63  ;;  %v894_v63 = vld [vmem:[%s10303_s1 + $0x1a60] sm:$0xff]  ;;  %v969_v39 = vld [vmem:[%s10303_s1 + $0x1cb8] sm:$0xff] }
 0x193   :  { %4874 = vmatpush1.bf16.msra.mxu1 %v4873_v0  ;;  %4108 = vmatprep.subr.bf16.mxu0 %v4107_v1  ;;  %v892_v0 = vld [vmem:[%s10303_s1 + $0x1a50] sm:$0xff]  ;;  %v4895_v1 = vpack.c.bf16 %v897_v58, %v893_v57  ;;  %v4129_v7 = vpack.c.bf16 %v894_v63, %v890_v62  ;;  %v4147_v57 = vpack.c.bf16 %v935_v52, %v931_v51  ;;  %v930_v58 = vld [vmem:[%s10303_s1 + $0x1b80] sm:$0xff]  ;;  %v939_v63 = vld [vmem:[%s10303_s1 + $0x1bc8] sm:$0xff] }
 0x194   :  { %4876 = vmatprep.subr.bf16.mxu1 %v4875_v5  ;;  %v901_v5 = vld [vmem:[%s10303_s1 + $0x1a98] sm:$0xff]  ;;  %v4897_v8 = vpack.c.bf16 %v896_v2, %v892_v0  ;;  %v936_v62 = vld [vmem:[%s10303_s1 + $0x1bb0] sm:$0xff]  ;;  %v943_v0 = vld [vmem:[%s10303_s1 + $0x1be8] sm:$0xff] }
 0x195   :  { %v945_v2 = vld [vmem:[%s10303_s1 + $0x1bf8] sm:$0xff] }
 0x196   :  { %4110 = vmatpush1.bf16.msra.mxu0 %v4109_v11  ;;  %v902_v11 = vld [vmem:[%s10303_s1 + $0x1aa0] sm:$0xff]  ;;  %v41_v40 = vld [vmem:[%s10304_s0 + $0x78] sm:$0xff] }
 0x197   :  { %4878 = vmatpush1.bf16.msra.mxu1 %v4877_v12  ;;  %4112 = vmatprep.subr.bf16.mxu0 %v4111_v13  ;;  %v900_v12 = vld [vmem:[%s10303_s1 + $0x1a90] sm:$0xff]  ;;  %v4899_v13 = vpack.c.bf16 %v905_v6, %v901_v5  ;;  %v4133_v19 = vpack.c.bf16 %v902_v11, %v898_v10  ;;  %v4151_v5 = vpack.c.bf16 %v943_v0, %v939_v63  ;;  %v938_v6 = vld [vmem:[%s10303_s1 + $0x1bc0] sm:$0xff]  ;;  %v947_v11 = vld [vmem:[%s10303_s1 + $0x1c08] sm:$0xff] }
 0x198   :  { %4880 = vmatprep.subr.bf16.mxu1 %v4879_v17  ;;  %v909_v17 = vld [vmem:[%s10303_s1 + $0x1ad8] sm:$0xff]  ;;  %v4901_v20 = vpack.c.bf16 %v904_v14, %v900_v12  ;;  %v944_v10 = vld [vmem:[%s10303_s1 + $0x1bf0] sm:$0xff]  ;;  %v951_v12 = vld [vmem:[%s10303_s1 + $0x1c28] sm:$0xff] }
 0x199   :  { %v953_v14 = vld [vmem:[%s10303_s1 + $0x1c38] sm:$0xff] }
 0x19a   :  { %4114 = vmatpush1.bf16.msra.mxu0 %v4113_v23  ;;  %v910_v23 = vld [vmem:[%s10303_s1 + $0x1ae0] sm:$0xff]  ;;  %v973_v51 = vld [vmem:[%s10303_s1 + $0x1cd8] sm:$0xff] }
 0x19b   :  { %4882 = vmatpush1.bf16.msra.mxu1 %v4881_v24  ;;  %4116 = vmatprep.subr.bf16.mxu0 %v4115_v25  ;;  %v908_v24 = vld [vmem:[%s10303_s1 + $0x1ad0] sm:$0xff]  ;;  %v4903_v25 = vpack.c.bf16 %v913_v18, %v909_v17  ;;  %v4137_v31 = vpack.c.bf16 %v910_v23, %v906_v22  ;;  %v4155_v17 = vpack.c.bf16 %v951_v12, %v947_v11  ;;  %v946_v18 = vld [vmem:[%s10303_s1 + $0x1c00] sm:$0xff]  ;;  %v955_v23 = vld [vmem:[%s10303_s1 + $0x1c48] sm:$0xff] }
 0x19c   :  { %4884 = vmatprep.subr.bf16.mxu1 %v4883_v29  ;;  %v917_v29 = vld [vmem:[%s10303_s1 + $0x1b18] sm:$0xff]  ;;  %v4905_v32 = vpack.c.bf16 %v912_v26, %v908_v24  ;;  %v952_v22 = vld [vmem:[%s10303_s1 + $0x1c30] sm:$0xff]  ;;  %v959_v24 = vld [vmem:[%s10303_s1 + $0x1c68] sm:$0xff] }
 0x19d   :  { %v961_v26 = vld [vmem:[%s10303_s1 + $0x1c78] sm:$0xff] }
 0x19e   :  { %4118 = vmatpush1.bf16.msra.mxu0 %v4117_v35  ;;  %v918_v35 = vld [vmem:[%s10303_s1 + $0x1b20] sm:$0xff]  ;;  %v977_v52 = vld [vmem:[%s10303_s1 + $0x1cf8] sm:$0xff] }
 0x19f   :  { %4886 = vmatpush1.bf16.msra.mxu1 %v4885_v36  ;;  %4120 = vmatprep.subr.bf16.mxu0 %v4119_v37  ;;  %v916_v36 = vld [vmem:[%s10303_s1 + $0x1b10] sm:$0xff]  ;;  %v4907_v37 = vpack.c.bf16 %v921_v30, %v917_v29  ;;  %v4141_v43 = vpack.c.bf16 %v918_v35, %v914_v34  ;;  %v4159_v30 = vpack.c.bf16 %v959_v24, %v955_v23  ;;  %v981_v63 = vld [vmem:[%s10303_s1 + $0x1d18] sm:$0xff] }
 0x1a0   :  { %4888 = vmatprep.subr.bf16.mxu1 %v4887_v41  ;;  %v925_v41 = vld [vmem:[%s10303_s1 + $0x1b58] sm:$0xff]  ;;  %v4909_v44 = vpack.c.bf16 %v920_v38, %v916_v36  ;;  %v960_v35 = vld [vmem:[%s10303_s1 + $0x1c70] sm:$0xff]  ;;  %v963_v36 = vld [vmem:[%s10303_s1 + $0x1c88] sm:$0xff] }
 0x1a1   :  { %v965_v38 = vld [vmem:[%s10303_s1 + $0x1c98] sm:$0xff] }
 0x1a2   :  { %4122 = vmatpush1.bf16.msra.mxu0 %v4121_v47  ;;  %v926_v47 = vld [vmem:[%s10303_s1 + $0x1b60] sm:$0xff]  ;;  %v985_v0 = vld [vmem:[%s10303_s1 + $0x1d38] sm:$0xff] }
 0x1a3   :  { %4890 = vmatpush1.bf16.msra.mxu1 %v4889_v48  ;;  %4124 = vmatprep.subr.bf16.mxu0 %v4123_v49  ;;  %v924_v48 = vld [vmem:[%s10303_s1 + $0x1b50] sm:$0xff]  ;;  %v4911_v49 = vpack.c.bf16 %v929_v42, %v925_v41  ;;  %v4145_v55 = vpack.c.bf16 %v926_v47, %v922_v46  ;;  %v4931_v47 = vpack.c.bf16 %v969_v39, %v965_v38  ;;  %v989_v11 = vld [vmem:[%s10303_s1 + $0x1d58] sm:$0xff] }
 0x1a4   :  { %4892 = vmatprep.subr.bf16.mxu1 %v4891_v53  ;;  %v933_v53 = vld [vmem:[%s10303_s1 + $0x1b98] sm:$0xff]  ;;  %v4913_v56 = vpack.c.bf16 %v928_v50, %v924_v48  ;;  %v964_v46 = vld [vmem:[%s10303_s1 + $0x1c90] sm:$0xff]  ;;  %v975_v50 = vld [vmem:[%s10303_s1 + $0x1ce8] sm:$0xff] }
 0x1a5   :  { %v968_v48 = vld [vmem:[%s10303_s1 + $0x1cb0] sm:$0xff]  ;;  %v993_v12 = vld [vmem:[%s10303_s1 + $0x1d78] sm:$0xff] }
 0x1a6   :  { %4126 = vmatpush1.bf16.msra.mxu0 %v4125_v59  ;;  %v934_v59 = vld [vmem:[%s10303_s1 + $0x1ba0] sm:$0xff]  ;;  %v997_v23 = vld [vmem:[%s10303_s1 + $0x1d98] sm:$0xff] }
 0x1a7   :  { %4894 = vmatpush1.bf16.msra.mxu1 %v4893_v60  ;;  %4128 = vmatprep.subr.bf16.mxu0 %v4127_v61  ;;  %v932_v60 = vld [vmem:[%s10303_s1 + $0x1b90] sm:$0xff]  ;;  %v4915_v61 = vpack.c.bf16 %v937_v54, %v933_v53  ;;  %v4149_v3 = vpack.c.bf16 %v934_v59, %v930_v58  ;;  %v4933_v54 = vpack.c.bf16 %v968_v48, %v964_v46  ;;  %v1001_v24 = vld [vmem:[%s10303_s1 + $0x1db8] sm:$0xff]  ;;  %v1015_v46 = vld [vmem:[%s10303_s1 + $0x1e28] sm:$0xff] }
 0x1a8   :  { %4896 = vmatprep.subr.bf16.mxu1 %v4895_v1  ;;  %v941_v1 = vld [vmem:[%s10303_s1 + $0x1bd8] sm:$0xff]  ;;  %v4917_v4 = vpack.c.bf16 %v936_v62, %v932_v60  ;;  %v972_v58 = vld [vmem:[%s10303_s1 + $0x1cd0] sm:$0xff]  ;;  %v4935_v59 = vpack.c.bf16 %v977_v52, %v973_v51  ;;  %v983_v62 = vld [vmem:[%s10303_s1 + $0x1d28] sm:$0xff] }
 0x1a9   :  { %v976_v60 = vld [vmem:[%s10303_s1 + $0x1cf0] sm:$0xff]  ;;  %v1017_v48 = vld [vmem:[%s10303_s1 + $0x1e38] sm:$0xff]  ;;  %v1010_v52 = vld [vmem:[%s10303_s1 + $0x1e00] sm:$0xff] }
 0x1aa   :  { %4130 = vmatpush1.bf16.msra.mxu0 %v4129_v7  ;;  %v942_v7 = vld [vmem:[%s10303_s1 + $0x1be0] sm:$0xff] }
 0x1ab   :  { %4898 = vmatpush1.bf16.msra.mxu1 %v4897_v8  ;;  %4132 = vmatprep.subr.bf16.mxu0 %v4131_v9  ;;  %v940_v8 = vld [vmem:[%s10303_s1 + $0x1bd0] sm:$0xff]  ;;  %v4919_v9 = vpack.c.bf16 %v945_v2, %v941_v1  ;;  %v4153_v15 = vpack.c.bf16 %v942_v7, %v938_v6  ;;  %v4937_v2 = vpack.c.bf16 %v976_v60, %v972_v58  ;;  %v1023_v58 = vld [vmem:[%s10303_s1 + $0x1e68] sm:$0xff]  ;;  %v1025_v60 = vld [vmem:[%s10303_s1 + $0x1e78] sm:$0xff] }
 0x1ac   :  { %4900 = vmatprep.subr.bf16.mxu1 %v4899_v13  ;;  %v949_v13 = vld [vmem:[%s10303_s1 + $0x1c18] sm:$0xff]  ;;  %v4921_v16 = vpack.c.bf16 %v944_v10, %v940_v8  ;;  %v980_v6 = vld [vmem:[%s10303_s1 + $0x1d10] sm:$0xff]  ;;  %v4939_v7 = vpack.c.bf16 %v985_v0, %v981_v63  ;;  %v991_v10 = vld [vmem:[%s10303_s1 + $0x1d68] sm:$0xff] }
 0x1ad   :  { %v984_v8 = vld [vmem:[%s10303_s1 + $0x1d30] sm:$0xff]  ;;  %v1018_v0 = vld [vmem:[%s10303_s1 + $0x1e40] sm:$0xff] }
 0x1ae   :  { %4134 = vmatpush1.bf16.msra.mxu0 %v4133_v19  ;;  %v950_v19 = vld [vmem:[%s10303_s1 + $0x1c20] sm:$0xff] }
 0x1af   :  { %4902 = vmatpush1.bf16.msra.mxu1 %v4901_v20  ;;  %4136 = vmatprep.subr.bf16.mxu0 %v4135_v21  ;;  %v948_v20 = vld [vmem:[%s10303_s1 + $0x1c10] sm:$0xff]  ;;  %v4923_v21 = vpack.c.bf16 %v953_v14, %v949_v13  ;;  %v4157_v28 = vpack.c.bf16 %v950_v19, %v946_v18  ;;  %v4941_v14 = vpack.c.bf16 %v984_v8, %v980_v6  ;;  %v1031_v6 = vld [vmem:[%s10303_s1 + $0x1ea8] sm:$0xff]  ;;  %v1033_v8 = vld [vmem:[%s10303_s1 + $0x1eb8] sm:$0xff] }
 0x1b0   :  { %4904 = vmatprep.subr.bf16.mxu1 %v4903_v25  ;;  %v957_v25 = vld [vmem:[%s10303_s1 + $0x1c58] sm:$0xff]  ;;  %v4925_v29 = vpack.c.bf16 %v952_v22, %v948_v20  ;;  %v988_v18 = vld [vmem:[%s10303_s1 + $0x1d50] sm:$0xff]  ;;  %v4943_v19 = vpack.c.bf16 %v993_v12, %v989_v11  ;;  %v999_v22 = vld [vmem:[%s10303_s1 + $0x1da8] sm:$0xff] }
 0x1b1   :  { %v4927_v34 = vpack.c.bf16 %v961_v26, %v957_v25  ;;  %v992_v20 = vld [vmem:[%s10303_s1 + $0x1d70] sm:$0xff]  ;;  %v1026_v12 = vld [vmem:[%s10303_s1 + $0x1e80] sm:$0xff] }
 0x1b2   :  { %4138 = vmatpush1.bf16.msra.mxu0 %v4137_v31  ;;  %v954_v31 = vld [vmem:[%s10303_s1 + $0x1c40] sm:$0xff]  ;;  %v4945_v26 = vpack.c.bf16 %v992_v20, %v988_v18  ;;  %v1039_v18 = vld [vmem:[%s10303_s1 + $0x1ee8] sm:$0xff]  ;;  %v1041_v20 = vld [vmem:[%s10303_s1 + $0x1ef8] sm:$0xff] }
 0x1b3   :  { %4906 = vmatpush1.bf16.msra.mxu1 %v4905_v32  ;;  %4140 = vmatprep.subr.bf16.mxu0 %v4139_v33  ;;  %v958_v32 = vld [vmem:[%s10303_s1 + $0x1c60] sm:$0xff]  ;;  %v956_v33 = vld [vmem:[%s10303_s1 + $0x1c50] sm:$0xff] }
 0x1b4   :  { %4908 = vmatprep.subr.bf16.mxu1 %v4907_v37  ;;  %v967_v37 = vld [vmem:[%s10303_s1 + $0x1ca8] sm:$0xff]  ;;  %v4161_v41 = vpack.c.bf16 %v958_v32, %v954_v31  ;;  %v4929_v42 = vpack.c.bf16 %v960_v35, %v956_v33  ;;  %v4947_v31 = vpack.c.bf16 %v1001_v24, %v997_v23  ;;  %v1000_v32 = vld [vmem:[%s10303_s1 + $0x1db0] sm:$0xff]  ;;  %v1005_v35 = vld [vmem:[%s10303_s1 + $0x1dd8] sm:$0xff] }
 0x1b5   :  { %v1003_v33 = vld [vmem:[%s10303_s1 + $0x1dc8] sm:$0xff]  ;;  %v1034_v24 = vld [vmem:[%s10303_s1 + $0x1ec0] sm:$0xff] }
 0x1b6   :  { %4142 = vmatpush1.bf16.msra.mxu0 %v4141_v43  ;;  %v4163_v43 = vpack.c.bf16 %v967_v37, %v963_v36  ;;  %v1009_v36 = vld [vmem:[%s10303_s1 + $0x1df8] sm:$0xff] }
 0x1b7   :  { %4910 = vmatpush1.bf16.msra.mxu1 %v4909_v44  ;;  %4144 = vmatprep.subr.bf16.mxu0 %v4143_v45  ;;  %v962_v44 = vld [vmem:[%s10303_s1 + $0x1c80] sm:$0xff] }
 0x1b8   :  { %4912 = vmatprep.subr.bf16.mxu1 %v4911_v49  ;;  %v966_v45 = vld [vmem:[%s10303_s1 + $0x1ca0] sm:$0xff]  ;;  %v971_v49 = vld [vmem:[%s10303_s1 + $0x1cc8] sm:$0xff] }
 0x1b9   :  { %v4165_v53 = vpack.c.bf16 %v966_v45, %v962_v44  ;;  %v1008_v44 = vld [vmem:[%s10303_s1 + $0x1df0] sm:$0xff]  ;;  %v1011_v45 = vld [vmem:[%s10303_s1 + $0x1e08] sm:$0xff] }
 0x1ba   :  { %4146 = vmatpush1.bf16.msra.mxu0 %v4145_v55  ;;  %v4167_v55 = vpack.c.bf16 %v975_v50, %v971_v49  ;;  %v4187_v51 = vpack.c.bf16 %v1015_v46, %v1011_v45 }
 0x1bb   :  { %4914 = vmatpush1.bf16.msra.mxu1 %v4913_v56  ;;  %4148 = vmatprep.subr.bf16.mxu0 %v4147_v57  ;;  %v970_v56 = vld [vmem:[%s10303_s1 + $0x1cc0] sm:$0xff] }
 0x1bc   :  { %4916 = vmatprep.subr.bf16.mxu1 %v4915_v61  ;;  %v974_v57 = vld [vmem:[%s10303_s1 + $0x1ce0] sm:$0xff]  ;;  %v979_v61 = vld [vmem:[%s10303_s1 + $0x1d08] sm:$0xff] }
 0x1bd   :  { %v4169_v1 = vpack.c.bf16 %v974_v57, %v970_v56  ;;  %v1016_v56 = vld [vmem:[%s10303_s1 + $0x1e30] sm:$0xff]  ;;  %v1019_v57 = vld [vmem:[%s10303_s1 + $0x1e48] sm:$0xff] }
 0x1be   :  { %4150 = vmatpush1.bf16.msra.mxu0 %v4149_v3  ;;  %v4171_v3 = vpack.c.bf16 %v983_v62, %v979_v61  ;;  %v4191_v63 = vpack.c.bf16 %v1023_v58, %v1019_v57 }
 0x1bf   :  { %4918 = vmatpush1.bf16.msra.mxu1 %v4917_v4  ;;  %4152 = vmatprep.subr.bf16.mxu0 %v4151_v5  ;;  %v978_v4 = vld [vmem:[%s10303_s1 + $0x1d00] sm:$0xff] }
 0x1c0   :  { %4920 = vmatprep.subr.bf16.mxu1 %v4919_v9  ;;  %v982_v5 = vld [vmem:[%s10303_s1 + $0x1d20] sm:$0xff]  ;;  %v987_v9 = vld [vmem:[%s10303_s1 + $0x1d48] sm:$0xff] }
 0x1c1   :  { %v4173_v13 = vpack.c.bf16 %v982_v5, %v978_v4  ;;  %v1024_v4 = vld [vmem:[%s10303_s1 + $0x1e70] sm:$0xff]  ;;  %v1027_v5 = vld [vmem:[%s10303_s1 + $0x1e88] sm:$0xff] }
 0x1c2   :  { %4154 = vmatpush1.bf16.msra.mxu0 %v4153_v15  ;;  %v4175_v15 = vpack.c.bf16 %v991_v10, %v987_v9  ;;  %v4195_v11 = vpack.c.bf16 %v1031_v6, %v1027_v5 }
 0x1c3   :  { %4922 = vmatpush1.bf16.msra.mxu1 %v4921_v16  ;;  %4156 = vmatprep.subr.bf16.mxu0 %v4155_v17  ;;  %v986_v16 = vld [vmem:[%s10303_s1 + $0x1d40] sm:$0xff] }
 0x1c4   :  { %4924 = vmatprep.subr.bf16.mxu1 %v4923_v21  ;;  %v990_v17 = vld [vmem:[%s10303_s1 + $0x1d60] sm:$0xff]  ;;  %v995_v21 = vld [vmem:[%s10303_s1 + $0x1d88] sm:$0xff] }
 0x1c5   :  { %2099 = vmatmul.mubr.f32.vlgmr.msra.gmra.mrb[0].mxu0 %v38_v27  ;;  %v4177_v25 = vpack.c.bf16 %v990_v17, %v986_v16  ;;  %v1032_v16 = vld [vmem:[%s10303_s1 + $0x1eb0] sm:$0xff]  ;;  %v1035_v17 = vld [vmem:[%s10303_s1 + $0x1ec8] sm:$0xff] }
 0x1c6   :  { %4158 = vmatpush1.bf16.msra.mxu0 %v4157_v28  ;;  %2951 = vmatmul.mubr.f32.vlgmr.msra.gmra.mrb[0].mxu1 %v38_v27  ;;  %v4179_v27 = vpack.c.bf16 %v999_v22, %v995_v21  ;;  %v994_v28 = vld [vmem:[%s10303_s1 + $0x1d80] sm:$0xff]  ;;  %v4199_v23 = vpack.c.bf16 %v1039_v18, %v1035_v17 }
 0x1c7   :  { %4926 = vmatpush1.bf16.msra.mxu1 %v4925_v29  ;;  %4160 = vmatprep.subr.bf16.mxu0 %v4159_v30  ;;  %v998_v29 = vld [vmem:[%s10303_s1 + $0x1da0] sm:$0xff]  ;;  %v996_v30 = vld [vmem:[%s10303_s1 + $0x1d90] sm:$0xff] }
 0x1c8   :  { %4928 = vmatprep.subr.bf16.mxu1 %v4927_v34  ;;  %2169 = vmatprep.mubr.f32.mxu0 %v41_v40  ;;  %v1007_v34 = vld [vmem:[%s10303_s1 + $0x1de8] sm:$0xff]  ;;  %v4181_v37 = vpack.c.bf16 %v998_v29, %v994_v28  ;;  %v4949_v38 = vpack.c.bf16 %v1000_v32, %v996_v30  ;;  %v1040_v28 = vld [vmem:[%s10303_s1 + $0x1ef0] sm:$0xff]  ;;  %v1049_v32 = vld [vmem:[%s10303_s1 + $0x1f38] sm:$0xff] }
 0x1c9   :  { %3021 = vmatprep.mubr.f32.mxu1 %v41_v40  ;;  %v4183_v39 = vpack.c.bf16 %v1007_v34, %v1003_v33  ;;  %v1002_v40 = vld [vmem:[%s10303_s1 + $0x1dc0] sm:$0xff]  ;;  %v1043_v29 = vld [vmem:[%s10303_s1 + $0x1f08] sm:$0xff] }
 0x1ca   :  { %4162 = vmatpush1.bf16.msra.mxu0 %v4161_v41  ;;  %v1006_v41 = vld [vmem:[%s10303_s1 + $0x1de0] sm:$0xff]  ;;  %v1047_v30 = vld [vmem:[%s10303_s1 + $0x1f28] sm:$0xff] }
 0x1cb   :  { %4930 = vmatpush1.bf16.msra.mxu1 %v4929_v42  ;;  %4164 = vmatprep.subr.bf16.mxu0 %v4163_v43  ;;  %v1004_v42 = vld [vmem:[%s10303_s1 + $0x1dd0] sm:$0xff]  ;;  %v4951_v43 = vpack.c.bf16 %v1009_v36, %v1005_v35  ;;  %v4185_v49 = vpack.c.bf16 %v1006_v41, %v1002_v40  ;;  %v4203_v35 = vpack.c.bf16 %v1047_v30, %v1043_v29  ;;  %v1042_v36 = vld [vmem:[%s10303_s1 + $0x1f00] sm:$0xff]  ;;  %v1051_v41 = vld [vmem:[%s10303_s1 + $0x1f48] sm:$0xff] }
 0x1cc   :  { %4932 = vmatprep.subr.bf16.mxu1 %v4931_v47  ;;  %v1013_v47 = vld [vmem:[%s10303_s1 + $0x1e18] sm:$0xff]  ;;  %v4953_v50 = vpack.c.bf16 %v1008_v44, %v1004_v42  ;;  %v1048_v40 = vld [vmem:[%s10303_s1 + $0x1f30] sm:$0xff]  ;;  %v1055_v42 = vld [vmem:[%s10303_s1 + $0x1f68] sm:$0xff] }
 0x1cd   :  { %v1057_v44 = vld [vmem:[%s10303_s1 + $0x1f78] sm:$0xff]  ;;  %v40_v29 = vld [vmem:[%s10304_s0 + $0x70] sm:$0xff] }
 0x1ce   :  { %4166 = vmatpush1.bf16.msra.mxu0 %v4165_v53  ;;  %v1014_v53 = vld [vmem:[%s10303_s1 + $0x1e20] sm:$0xff] }
 0x1cf   :  { %4934 = vmatpush1.bf16.msra.mxu1 %v4933_v54  ;;  %4168 = vmatprep.subr.bf16.mxu0 %v4167_v55  ;;  %v1012_v54 = vld [vmem:[%s10303_s1 + $0x1e10] sm:$0xff]  ;;  %v4955_v55 = vpack.c.bf16 %v1017_v48, %v1013_v47  ;;  %v4189_v61 = vpack.c.bf16 %v1014_v53, %v1010_v52  ;;  %v4207_v47 = vpack.c.bf16 %v1055_v42, %v1051_v41  ;;  %v1050_v48 = vld [vmem:[%s10303_s1 + $0x1f40] sm:$0xff]  ;;  %v1059_v53 = vld [vmem:[%s10303_s1 + $0x1f88] sm:$0xff] }
 0x1d0   :  { %4936 = vmatprep.subr.bf16.mxu1 %v4935_v59  ;;  %v1021_v59 = vld [vmem:[%s10303_s1 + $0x1e58] sm:$0xff]  ;;  %v4957_v62 = vpack.c.bf16 %v1016_v56, %v1012_v54  ;;  %v1056_v52 = vld [vmem:[%s10303_s1 + $0x1f70] sm:$0xff]  ;;  %v1063_v54 = vld [vmem:[%s10303_s1 + $0x1fa8] sm:$0xff] }
 0x1d1   :  { %v1065_v56 = vld [vmem:[%s10303_s1 + $0x1fb8] sm:$0xff]  ;;  %v43_v42 = vld [vmem:[%s10304_s0 + $0x88] sm:$0xff] }
 0x1d2   :  { %4170 = vmatpush1.bf16.msra.mxu0 %v4169_v1  ;;  %v1022_v1 = vld [vmem:[%s10303_s1 + $0x1e60] sm:$0xff]  ;;  %v1097_v41 = vld [vmem:[%s10303_s1 + $0x20b8] sm:$0xff] }
 0x1d3   :  { %4938 = vmatpush1.bf16.msra.mxu1 %v4937_v2  ;;  %4172 = vmatprep.subr.bf16.mxu0 %v4171_v3  ;;  %v1020_v2 = vld [vmem:[%s10303_s1 + $0x1e50] sm:$0xff]  ;;  %v4959_v3 = vpack.c.bf16 %v1025_v60, %v1021_v59  ;;  %v4193_v9 = vpack.c.bf16 %v1022_v1, %v1018_v0  ;;  %v4211_v59 = vpack.c.bf16 %v1063_v54, %v1059_v53  ;;  %v1058_v60 = vld [vmem:[%s10303_s1 + $0x1f80] sm:$0xff]  ;;  %v1067_v1 = vld [vmem:[%s10303_s1 + $0x1fc8] sm:$0xff] }
 0x1d4   :  { %4940 = vmatprep.subr.bf16.mxu1 %v4939_v7  ;;  %v1029_v7 = vld [vmem:[%s10303_s1 + $0x1e98] sm:$0xff]  ;;  %v4961_v10 = vpack.c.bf16 %v1024_v4, %v1020_v2  ;;  %v1064_v0 = vld [vmem:[%s10303_s1 + $0x1fb0] sm:$0xff]  ;;  %v1071_v2 = vld [vmem:[%s10303_s1 + $0x1fe8] sm:$0xff] }
 0x1d5   :  { %v1073_v4 = vld [vmem:[%s10303_s1 + $0x1ff8] sm:$0xff] }
 0x1d6   :  { %4174 = vmatpush1.bf16.msra.mxu0 %v4173_v13  ;;  %v1030_v13 = vld [vmem:[%s10303_s1 + $0x1ea0] sm:$0xff]  ;;  %v1101_v53 = vld [vmem:[%s10303_s1 + $0x20d8] sm:$0xff] }
 0x1d7   :  { %4942 = vmatpush1.bf16.msra.mxu1 %v4941_v14  ;;  %4176 = vmatprep.subr.bf16.mxu0 %v4175_v15  ;;  %v1028_v14 = vld [vmem:[%s10303_s1 + $0x1e90] sm:$0xff]  ;;  %v4963_v15 = vpack.c.bf16 %v1033_v8, %v1029_v7  ;;  %v4197_v21 = vpack.c.bf16 %v1030_v13, %v1026_v12  ;;  %v4215_v7 = vpack.c.bf16 %v1071_v2, %v1067_v1  ;;  %v1066_v8 = vld [vmem:[%s10303_s1 + $0x1fc0] sm:$0xff]  ;;  %v1075_v13 = vld [vmem:[%s10303_s1 + $0x2008] sm:$0xff] }
 0x1d8   :  { %4944 = vmatprep.subr.bf16.mxu1 %v4943_v19  ;;  %v1037_v19 = vld [vmem:[%s10303_s1 + $0x1ed8] sm:$0xff]  ;;  %v4965_v22 = vpack.c.bf16 %v1032_v16, %v1028_v14  ;;  %v1072_v12 = vld [vmem:[%s10303_s1 + $0x1ff0] sm:$0xff]  ;;  %v1079_v14 = vld [vmem:[%s10303_s1 + $0x2028] sm:$0xff] }
 0x1d9   :  { %v1081_v16 = vld [vmem:[%s10303_s1 + $0x2038] sm:$0xff] }
 0x1da   :  { %4178 = vmatpush1.bf16.msra.mxu0 %v4177_v25  ;;  %v1038_v25 = vld [vmem:[%s10303_s1 + $0x1ee0] sm:$0xff]  ;;  %v1105_v54 = vld [vmem:[%s10303_s1 + $0x20f8] sm:$0xff] }
 0x1db   :  { %4946 = vmatpush1.bf16.msra.mxu1 %v4945_v26  ;;  %4180 = vmatprep.subr.bf16.mxu0 %v4179_v27  ;;  %v1036_v26 = vld [vmem:[%s10303_s1 + $0x1ed0] sm:$0xff]  ;;  %v4967_v27 = vpack.c.bf16 %v1041_v20, %v1037_v19  ;;  %v4201_v33 = vpack.c.bf16 %v1038_v25, %v1034_v24  ;;  %v4219_v19 = vpack.c.bf16 %v1079_v14, %v1075_v13  ;;  %v1074_v20 = vld [vmem:[%s10303_s1 + $0x2000] sm:$0xff]  ;;  %v1083_v25 = vld [vmem:[%s10303_s1 + $0x2048] sm:$0xff] }
 0x1dc   :  { %4948 = vmatprep.subr.bf16.mxu1 %v4947_v31  ;;  %v1045_v31 = vld [vmem:[%s10303_s1 + $0x1f18] sm:$0xff]  ;;  %v4969_v34 = vpack.c.bf16 %v1040_v28, %v1036_v26  ;;  %v1080_v24 = vld [vmem:[%s10303_s1 + $0x2030] sm:$0xff]  ;;  %v1087_v26 = vld [vmem:[%s10303_s1 + $0x2068] sm:$0xff] }
 0x1dd   :  { %v1089_v28 = vld [vmem:[%s10303_s1 + $0x2078] sm:$0xff] }
 0x1de   :  { %4182 = vmatpush1.bf16.msra.mxu0 %v4181_v37  ;;  %v1046_v37 = vld [vmem:[%s10303_s1 + $0x1f20] sm:$0xff]  ;;  %v1109_v1 = vld [vmem:[%s10303_s1 + $0x2118] sm:$0xff] }
 0x1df   :  { %4950 = vmatpush1.bf16.msra.mxu1 %v4949_v38  ;;  %4184 = vmatprep.subr.bf16.mxu0 %v4183_v39  ;;  %v1044_v38 = vld [vmem:[%s10303_s1 + $0x1f10] sm:$0xff]  ;;  %v4971_v39 = vpack.c.bf16 %v1049_v32, %v1045_v31  ;;  %v4205_v45 = vpack.c.bf16 %v1046_v37, %v1042_v36  ;;  %v4223_v32 = vpack.c.bf16 %v1087_v26, %v1083_v25  ;;  %v1113_v2 = vld [vmem:[%s10303_s1 + $0x2138] sm:$0xff] }
 0x1e0   :  { %4952 = vmatprep.subr.bf16.mxu1 %v4951_v43  ;;  %v1053_v43 = vld [vmem:[%s10303_s1 + $0x1f58] sm:$0xff]  ;;  %v4973_v46 = vpack.c.bf16 %v1048_v40, %v1044_v38  ;;  %v1088_v37 = vld [vmem:[%s10303_s1 + $0x2070] sm:$0xff]  ;;  %v1091_v38 = vld [vmem:[%s10303_s1 + $0x2088] sm:$0xff] }
 0x1e1   :  { %v1093_v40 = vld [vmem:[%s10303_s1 + $0x2098] sm:$0xff] }
 0x1e2   :  { %4186 = vmatpush1.bf16.msra.mxu0 %v4185_v49  ;;  %v1054_v49 = vld [vmem:[%s10303_s1 + $0x1f60] sm:$0xff]  ;;  %v1117_v13 = vld [vmem:[%s10303_s1 + $0x2158] sm:$0xff] }
 0x1e3   :  { %4954 = vmatpush1.bf16.msra.mxu1 %v4953_v50  ;;  %4188 = vmatprep.subr.bf16.mxu0 %v4187_v51  ;;  %v1052_v50 = vld [vmem:[%s10303_s1 + $0x1f50] sm:$0xff]  ;;  %v4975_v51 = vpack.c.bf16 %v1057_v44, %v1053_v43  ;;  %v4209_v57 = vpack.c.bf16 %v1054_v49, %v1050_v48  ;;  %v4995_v49 = vpack.c.bf16 %v1097_v41, %v1093_v40  ;;  %v1121_v14 = vld [vmem:[%s10303_s1 + $0x2178] sm:$0xff] }
 0x1e4   :  { %4956 = vmatprep.subr.bf16.mxu1 %v4955_v55  ;;  %v1061_v55 = vld [vmem:[%s10303_s1 + $0x1f98] sm:$0xff]  ;;  %v4977_v58 = vpack.c.bf16 %v1056_v52, %v1052_v50  ;;  %v1092_v48 = vld [vmem:[%s10303_s1 + $0x2090] sm:$0xff]  ;;  %v1103_v52 = vld [vmem:[%s10303_s1 + $0x20e8] sm:$0xff] }
 0x1e5   :  { %v1096_v50 = vld [vmem:[%s10303_s1 + $0x20b0] sm:$0xff]  ;;  %v1125_v25 = vld [vmem:[%s10303_s1 + $0x2198] sm:$0xff] }
 0x1e6   :  { %4190 = vmatpush1.bf16.msra.mxu0 %v4189_v61  ;;  %v1062_v61 = vld [vmem:[%s10303_s1 + $0x1fa0] sm:$0xff]  ;;  %v1129_v26 = vld [vmem:[%s10303_s1 + $0x21b8] sm:$0xff] }
 0x1e7   :  { %4958 = vmatpush1.bf16.msra.mxu1 %v4957_v62  ;;  %4192 = vmatprep.subr.bf16.mxu0 %v4191_v63  ;;  %v1060_v62 = vld [vmem:[%s10303_s1 + $0x1f90] sm:$0xff]  ;;  %v4979_v63 = vpack.c.bf16 %v1065_v56, %v1061_v55  ;;  %v4213_v5 = vpack.c.bf16 %v1062_v61, %v1058_v60  ;;  %v4997_v56 = vpack.c.bf16 %v1096_v50, %v1092_v48  ;;  %v1143_v48 = vld [vmem:[%s10303_s1 + $0x2228] sm:$0xff]  ;;  %v1145_v50 = vld [vmem:[%s10303_s1 + $0x2238] sm:$0xff] }
 0x1e8   :  { %4960 = vmatprep.subr.bf16.mxu1 %v4959_v3  ;;  %v1069_v3 = vld [vmem:[%s10303_s1 + $0x1fd8] sm:$0xff]  ;;  %v4981_v6 = vpack.c.bf16 %v1064_v0, %v1060_v62  ;;  %v1100_v60 = vld [vmem:[%s10303_s1 + $0x20d0] sm:$0xff]  ;;  %v4999_v61 = vpack.c.bf16 %v1105_v54, %v1101_v53  ;;  %v1111_v0 = vld [vmem:[%s10303_s1 + $0x2128] sm:$0xff] }
 0x1e9   :  { %v1104_v62 = vld [vmem:[%s10303_s1 + $0x20f0] sm:$0xff]  ;;  %v1138_v54 = vld [vmem:[%s10303_s1 + $0x2200] sm:$0xff] }
 0x1ea   :  { %4194 = vmatpush1.bf16.msra.mxu0 %v4193_v9  ;;  %v1070_v9 = vld [vmem:[%s10303_s1 + $0x1fe0] sm:$0xff] }
 0x1eb   :  { %4962 = vmatpush1.bf16.msra.mxu1 %v4961_v10  ;;  %4196 = vmatprep.subr.bf16.mxu0 %v4195_v11  ;;  %v1068_v10 = vld [vmem:[%s10303_s1 + $0x1fd0] sm:$0xff]  ;;  %v4983_v11 = vpack.c.bf16 %v1073_v4, %v1069_v3  ;;  %v4217_v17 = vpack.c.bf16 %v1070_v9, %v1066_v8  ;;  %v5001_v4 = vpack.c.bf16 %v1104_v62, %v1100_v60  ;;  %v1151_v60 = vld [vmem:[%s10303_s1 + $0x2268] sm:$0xff]  ;;  %v1153_v62 = vld [vmem:[%s10303_s1 + $0x2278] sm:$0xff] }
 0x1ec   :  { %4964 = vmatprep.subr.bf16.mxu1 %v4963_v15  ;;  %v1077_v15 = vld [vmem:[%s10303_s1 + $0x2018] sm:$0xff]  ;;  %v4985_v18 = vpack.c.bf16 %v1072_v12, %v1068_v10  ;;  %v1108_v8 = vld [vmem:[%s10303_s1 + $0x2110] sm:$0xff]  ;;  %v5003_v9 = vpack.c.bf16 %v1113_v2, %v1109_v1  ;;  %v1119_v12 = vld [vmem:[%s10303_s1 + $0x2168] sm:$0xff] }
 0x1ed   :  { %v1112_v10 = vld [vmem:[%s10303_s1 + $0x2130] sm:$0xff]  ;;  %v1146_v2 = vld [vmem:[%s10303_s1 + $0x2240] sm:$0xff] }
 0x1ee   :  { %4198 = vmatpush1.bf16.msra.mxu0 %v4197_v21  ;;  %v1078_v21 = vld [vmem:[%s10303_s1 + $0x2020] sm:$0xff] }
 0x1ef   :  { %4966 = vmatpush1.bf16.msra.mxu1 %v4965_v22  ;;  %4200 = vmatprep.subr.bf16.mxu0 %v4199_v23  ;;  %v1076_v22 = vld [vmem:[%s10303_s1 + $0x2010] sm:$0xff]  ;;  %v4987_v23 = vpack.c.bf16 %v1081_v16, %v1077_v15  ;;  %v4221_v30 = vpack.c.bf16 %v1078_v21, %v1074_v20  ;;  %v5005_v16 = vpack.c.bf16 %v1112_v10, %v1108_v8  ;;  %v1159_v8 = vld [vmem:[%s10303_s1 + $0x22a8] sm:$0xff]  ;;  %v1161_v10 = vld [vmem:[%s10303_s1 + $0x22b8] sm:$0xff] }
 0x1f0   :  { %4968 = vmatprep.subr.bf16.mxu1 %v4967_v27  ;;  %v1085_v27 = vld [vmem:[%s10303_s1 + $0x2058] sm:$0xff]  ;;  %v4989_v31 = vpack.c.bf16 %v1080_v24, %v1076_v22  ;;  %v1116_v20 = vld [vmem:[%s10303_s1 + $0x2150] sm:$0xff]  ;;  %v5007_v21 = vpack.c.bf16 %v1121_v14, %v1117_v13  ;;  %v1127_v24 = vld [vmem:[%s10303_s1 + $0x21a8] sm:$0xff] }
 0x1f1   :  { %v4991_v36 = vpack.c.bf16 %v1089_v28, %v1085_v27  ;;  %v1120_v22 = vld [vmem:[%s10303_s1 + $0x2170] sm:$0xff]  ;;  %v1154_v14 = vld [vmem:[%s10303_s1 + $0x2280] sm:$0xff] }
 0x1f2   :  { %4202 = vmatpush1.bf16.msra.mxu0 %v4201_v33  ;;  %v1082_v33 = vld [vmem:[%s10303_s1 + $0x2040] sm:$0xff]  ;;  %v5009_v28 = vpack.c.bf16 %v1120_v22, %v1116_v20  ;;  %v1167_v20 = vld [vmem:[%s10303_s1 + $0x22e8] sm:$0xff]  ;;  %v1169_v22 = vld [vmem:[%s10303_s1 + $0x22f8] sm:$0xff] }
 0x1f3   :  { %4970 = vmatpush1.bf16.msra.mxu1 %v4969_v34  ;;  %4204 = vmatprep.subr.bf16.mxu0 %v4203_v35  ;;  %v1086_v34 = vld [vmem:[%s10303_s1 + $0x2060] sm:$0xff]  ;;  %v1084_v35 = vld [vmem:[%s10303_s1 + $0x2050] sm:$0xff] }
 0x1f4   :  { %4972 = vmatprep.subr.bf16.mxu1 %v4971_v39  ;;  %v1095_v39 = vld [vmem:[%s10303_s1 + $0x20a8] sm:$0xff]  ;;  %v4225_v43 = vpack.c.bf16 %v1086_v34, %v1082_v33  ;;  %v4993_v44 = vpack.c.bf16 %v1088_v37, %v1084_v35  ;;  %v5011_v33 = vpack.c.bf16 %v1129_v26, %v1125_v25  ;;  %v1128_v34 = vld [vmem:[%s10303_s1 + $0x21b0] sm:$0xff]  ;;  %v1133_v37 = vld [vmem:[%s10303_s1 + $0x21d8] sm:$0xff] }
 0x1f5   :  { %v1131_v35 = vld [vmem:[%s10303_s1 + $0x21c8] sm:$0xff]  ;;  %v1162_v26 = vld [vmem:[%s10303_s1 + $0x22c0] sm:$0xff] }
 0x1f6   :  { %4206 = vmatpush1.bf16.msra.mxu0 %v4205_v45  ;;  %v4227_v45 = vpack.c.bf16 %v1095_v39, %v1091_v38  ;;  %v1137_v38 = vld [vmem:[%s10303_s1 + $0x21f8] sm:$0xff] }
 0x1f7   :  { %4974 = vmatpush1.bf16.msra.mxu1 %v4973_v46  ;;  %4208 = vmatprep.subr.bf16.mxu0 %v4207_v47  ;;  %v1090_v46 = vld [vmem:[%s10303_s1 + $0x2080] sm:$0xff] }
 0x1f8   :  { %4976 = vmatprep.subr.bf16.mxu1 %v4975_v51  ;;  %v1094_v47 = vld [vmem:[%s10303_s1 + $0x20a0] sm:$0xff]  ;;  %v1099_v51 = vld [vmem:[%s10303_s1 + $0x20c8] sm:$0xff] }
 0x1f9   :  { %v4229_v55 = vpack.c.bf16 %v1094_v47, %v1090_v46  ;;  %v1136_v46 = vld [vmem:[%s10303_s1 + $0x21f0] sm:$0xff]  ;;  %v1139_v47 = vld [vmem:[%s10303_s1 + $0x2208] sm:$0xff] }
 0x1fa   :  { %4210 = vmatpush1.bf16.msra.mxu0 %v4209_v57  ;;  %v4231_v57 = vpack.c.bf16 %v1103_v52, %v1099_v51  ;;  %v4251_v53 = vpack.c.bf16 %v1143_v48, %v1139_v47 }
 0x1fb   :  { %4978 = vmatpush1.bf16.msra.mxu1 %v4977_v58  ;;  %4212 = vmatprep.subr.bf16.mxu0 %v4211_v59  ;;  %v1098_v58 = vld [vmem:[%s10303_s1 + $0x20c0] sm:$0xff] }
 0x1fc   :  { %4980 = vmatprep.subr.bf16.mxu1 %v4979_v63  ;;  %v1102_v59 = vld [vmem:[%s10303_s1 + $0x20e0] sm:$0xff]  ;;  %v1107_v63 = vld [vmem:[%s10303_s1 + $0x2108] sm:$0xff] }
 0x1fd   :  { %v4233_v3 = vpack.c.bf16 %v1102_v59, %v1098_v58  ;;  %v1144_v58 = vld [vmem:[%s10303_s1 + $0x2230] sm:$0xff]  ;;  %v1147_v59 = vld [vmem:[%s10303_s1 + $0x2248] sm:$0xff] }
 0x1fe   :  { %4214 = vmatpush1.bf16.msra.mxu0 %v4213_v5  ;;  %v4235_v5 = vpack.c.bf16 %v1111_v0, %v1107_v63  ;;  %v4255_v1 = vpack.c.bf16 %v1151_v60, %v1147_v59 }
 0x1ff   :  { %4982 = vmatpush1.bf16.msra.mxu1 %v4981_v6  ;;  %4216 = vmatprep.subr.bf16.mxu0 %v4215_v7  ;;  %v1106_v6 = vld [vmem:[%s10303_s1 + $0x2100] sm:$0xff] }
 0x200   :  { %4984 = vmatprep.subr.bf16.mxu1 %v4983_v11  ;;  %v1110_v7 = vld [vmem:[%s10303_s1 + $0x2120] sm:$0xff]  ;;  %v1115_v11 = vld [vmem:[%s10303_s1 + $0x2148] sm:$0xff] }
 0x201   :  { %v4237_v15 = vpack.c.bf16 %v1110_v7, %v1106_v6  ;;  %v1152_v6 = vld [vmem:[%s10303_s1 + $0x2270] sm:$0xff]  ;;  %v1155_v7 = vld [vmem:[%s10303_s1 + $0x2288] sm:$0xff] }
 0x202   :  { %4218 = vmatpush1.bf16.msra.mxu0 %v4217_v17  ;;  %v4239_v17 = vpack.c.bf16 %v1119_v12, %v1115_v11  ;;  %v4259_v13 = vpack.c.bf16 %v1159_v8, %v1155_v7 }
 0x203   :  { %4986 = vmatpush1.bf16.msra.mxu1 %v4985_v18  ;;  %4220 = vmatprep.subr.bf16.mxu0 %v4219_v19  ;;  %v1114_v18 = vld [vmem:[%s10303_s1 + $0x2140] sm:$0xff] }
 0x204   :  { %4988 = vmatprep.subr.bf16.mxu1 %v4987_v23  ;;  %v1118_v19 = vld [vmem:[%s10303_s1 + $0x2160] sm:$0xff]  ;;  %v1123_v23 = vld [vmem:[%s10303_s1 + $0x2188] sm:$0xff] }
 0x205   :  { %2170 = vmatmul.mubr.f32.vlgmr.msra.gmra.mrb[0].mxu0 %v40_v29  ;;  %v4241_v27 = vpack.c.bf16 %v1118_v19, %v1114_v18  ;;  %v1160_v18 = vld [vmem:[%s10303_s1 + $0x22b0] sm:$0xff]  ;;  %v1163_v19 = vld [vmem:[%s10303_s1 + $0x22c8] sm:$0xff] }
 0x206   :  { %4222 = vmatpush1.bf16.msra.mxu0 %v4221_v30  ;;  %3022 = vmatmul.mubr.f32.vlgmr.msra.gmra.mrb[0].mxu1 %v40_v29  ;;  %v4243_v29 = vpack.c.bf16 %v1127_v24, %v1123_v23  ;;  %v1122_v30 = vld [vmem:[%s10303_s1 + $0x2180] sm:$0xff]  ;;  %v4263_v25 = vpack.c.bf16 %v1167_v20, %v1163_v19 }
 0x207   :  { %4990 = vmatpush1.bf16.msra.mxu1 %v4989_v31  ;;  %4224 = vmatprep.subr.bf16.mxu0 %v4223_v32  ;;  %v1126_v31 = vld [vmem:[%s10303_s1 + $0x21a0] sm:$0xff]  ;;  %v1124_v32 = vld [vmem:[%s10303_s1 + $0x2190] sm:$0xff] }
 0x208   :  { %4992 = vmatprep.subr.bf16.mxu1 %v4991_v36  ;;  %2240 = vmatprep.mubr.f32.mxu0 %v43_v42  ;;  %v1135_v36 = vld [vmem:[%s10303_s1 + $0x21e8] sm:$0xff]  ;;  %v4245_v39 = vpack.c.bf16 %v1126_v31, %v1122_v30  ;;  %v5013_v40 = vpack.c.bf16 %v1128_v34, %v1124_v32  ;;  %v1168_v30 = vld [vmem:[%s10303_s1 + $0x22f0] sm:$0xff]  ;;  %v1177_v34 = vld [vmem:[%s10303_s1 + $0x2338] sm:$0xff] }
 0x209   :  { %3092 = vmatprep.mubr.f32.mxu1 %v43_v42  ;;  %v4247_v41 = vpack.c.bf16 %v1135_v36, %v1131_v35  ;;  %v1130_v42 = vld [vmem:[%s10303_s1 + $0x21c0] sm:$0xff]  ;;  %v1171_v31 = vld [vmem:[%s10303_s1 + $0x2308] sm:$0xff] }
 0x20a   :  { %4226 = vmatpush1.bf16.msra.mxu0 %v4225_v43  ;;  %v1134_v43 = vld [vmem:[%s10303_s1 + $0x21e0] sm:$0xff]  ;;  %v1175_v32 = vld [vmem:[%s10303_s1 + $0x2328] sm:$0xff] }
 0x20b   :  { %4994 = vmatpush1.bf16.msra.mxu1 %v4993_v44  ;;  %4228 = vmatprep.subr.bf16.mxu0 %v4227_v45  ;;  %v1132_v44 = vld [vmem:[%s10303_s1 + $0x21d0] sm:$0xff]  ;;  %v5015_v45 = vpack.c.bf16 %v1137_v38, %v1133_v37  ;;  %v4249_v51 = vpack.c.bf16 %v1134_v43, %v1130_v42  ;;  %v4267_v37 = vpack.c.bf16 %v1175_v32, %v1171_v31  ;;  %v1170_v38 = vld [vmem:[%s10303_s1 + $0x2300] sm:$0xff]  ;;  %v1179_v43 = vld [vmem:[%s10303_s1 + $0x2348] sm:$0xff] }
 0x20c   :  { %4996 = vmatprep.subr.bf16.mxu1 %v4995_v49  ;;  %v1141_v49 = vld [vmem:[%s10303_s1 + $0x2218] sm:$0xff]  ;;  %v5017_v52 = vpack.c.bf16 %v1136_v46, %v1132_v44  ;;  %v1176_v42 = vld [vmem:[%s10303_s1 + $0x2330] sm:$0xff]  ;;  %v1183_v44 = vld [vmem:[%s10303_s1 + $0x2368] sm:$0xff] }
 0x20d   :  { %v1185_v46 = vld [vmem:[%s10303_s1 + $0x2378] sm:$0xff]  ;;  %v42_v31 = vld [vmem:[%s10304_s0 + $0x80] sm:$0xff] }
 0x20e   :  { %4230 = vmatpush1.bf16.msra.mxu0 %v4229_v55  ;;  %v1142_v55 = vld [vmem:[%s10303_s1 + $0x2220] sm:$0xff] }
 0x20f   :  { %4998 = vmatpush1.bf16.msra.mxu1 %v4997_v56  ;;  %4232 = vmatprep.subr.bf16.mxu0 %v4231_v57  ;;  %v1140_v56 = vld [vmem:[%s10303_s1 + $0x2210] sm:$0xff]  ;;  %v5019_v57 = vpack.c.bf16 %v1145_v50, %v1141_v49  ;;  %v4253_v63 = vpack.c.bf16 %v1142_v55, %v1138_v54  ;;  %v4271_v49 = vpack.c.bf16 %v1183_v44, %v1179_v43  ;;  %v1178_v50 = vld [vmem:[%s10303_s1 + $0x2340] sm:$0xff]  ;;  %v1187_v55 = vld [vmem:[%s10303_s1 + $0x2388] sm:$0xff] }
 0x210   :  { %5000 = vmatprep.subr.bf16.mxu1 %v4999_v61  ;;  %v1149_v61 = vld [vmem:[%s10303_s1 + $0x2258] sm:$0xff]  ;;  %v5021_v0 = vpack.c.bf16 %v1144_v58, %v1140_v56  ;;  %v1184_v54 = vld [vmem:[%s10303_s1 + $0x2370] sm:$0xff]  ;;  %v1191_v56 = vld [vmem:[%s10303_s1 + $0x23a8] sm:$0xff] }
 0x211   :  { %v1193_v58 = vld [vmem:[%s10303_s1 + $0x23b8] sm:$0xff] }
 0x212   :  { %4234 = vmatpush1.bf16.msra.mxu0 %v4233_v3  ;;  %v1150_v3 = vld [vmem:[%s10303_s1 + $0x2260] sm:$0xff]  ;;  %v1225_v43 = vld [vmem:[%s10303_s1 + $0x24b8] sm:$0xff] }
 0x213   :  { %5002 = vmatpush1.bf16.msra.mxu1 %v5001_v4  ;;  %4236 = vmatprep.subr.bf16.mxu0 %v4235_v5  ;;  %v1148_v4 = vld [vmem:[%s10303_s1 + $0x2250] sm:$0xff]  ;;  %v5023_v5 = vpack.c.bf16 %v1153_v62, %v1149_v61  ;;  %v4257_v11 = vpack.c.bf16 %v1150_v3, %v1146_v2  ;;  %v4275_v61 = vpack.c.bf16 %v1191_v56, %v1187_v55  ;;  %v1186_v62 = vld [vmem:[%s10303_s1 + $0x2380] sm:$0xff]  ;;  %v1195_v3 = vld [vmem:[%s10303_s1 + $0x23c8] sm:$0xff] }
 0x214   :  { %5004 = vmatprep.subr.bf16.mxu1 %v5003_v9  ;;  %v1157_v9 = vld [vmem:[%s10303_s1 + $0x2298] sm:$0xff]  ;;  %v5025_v12 = vpack.c.bf16 %v1152_v6, %v1148_v4  ;;  %v1192_v2 = vld [vmem:[%s10303_s1 + $0x23b0] sm:$0xff]  ;;  %v1199_v4 = vld [vmem:[%s10303_s1 + $0x23e8] sm:$0xff] }
 0x215   :  { %v1201_v6 = vld [vmem:[%s10303_s1 + $0x23f8] sm:$0xff] }
 0x216   :  { %4238 = vmatpush1.bf16.msra.mxu0 %v4237_v15  ;;  %v1158_v15 = vld [vmem:[%s10303_s1 + $0x22a0] sm:$0xff]  ;;  %v45_v44 = vld [vmem:[%s10304_s0 + $0x98] sm:$0xff] }
 0x217   :  { %5006 = vmatpush1.bf16.msra.mxu1 %v5005_v16  ;;  %4240 = vmatprep.subr.bf16.mxu0 %v4239_v17  ;;  %v1156_v16 = vld [vmem:[%s10303_s1 + $0x2290] sm:$0xff]  ;;  %v5027_v17 = vpack.c.bf16 %v1161_v10, %v1157_v9  ;;  %v4261_v23 = vpack.c.bf16 %v1158_v15, %v1154_v14  ;;  %v4279_v9 = vpack.c.bf16 %v1199_v4, %v1195_v3  ;;  %v1194_v10 = vld [vmem:[%s10303_s1 + $0x23c0] sm:$0xff]  ;;  %v1203_v15 = vld [vmem:[%s10303_s1 + $0x2408] sm:$0xff] }
 0x218   :  { %5008 = vmatprep.subr.bf16.mxu1 %v5007_v21  ;;  %v1165_v21 = vld [vmem:[%s10303_s1 + $0x22d8] sm:$0xff]  ;;  %v5029_v24 = vpack.c.bf16 %v1160_v18, %v1156_v16  ;;  %v1200_v14 = vld [vmem:[%s10303_s1 + $0x23f0] sm:$0xff]  ;;  %v1207_v16 = vld [vmem:[%s10303_s1 + $0x2428] sm:$0xff] }
 0x219   :  { %v1209_v18 = vld [vmem:[%s10303_s1 + $0x2438] sm:$0xff] }
 0x21a   :  { %4242 = vmatpush1.bf16.msra.mxu0 %v4241_v27  ;;  %v1166_v27 = vld [vmem:[%s10303_s1 + $0x22e0] sm:$0xff]  ;;  %v1229_v55 = vld [vmem:[%s10303_s1 + $0x24d8] sm:$0xff] }
 0x21b   :  { %5010 = vmatpush1.bf16.msra.mxu1 %v5009_v28  ;;  %4244 = vmatprep.subr.bf16.mxu0 %v4243_v29  ;;  %v1164_v28 = vld [vmem:[%s10303_s1 + $0x22d0] sm:$0xff]  ;;  %v5031_v29 = vpack.c.bf16 %v1169_v22, %v1165_v21  ;;  %v4265_v35 = vpack.c.bf16 %v1166_v27, %v1162_v26  ;;  %v4283_v21 = vpack.c.bf16 %v1207_v16, %v1203_v15  ;;  %v1202_v22 = vld [vmem:[%s10303_s1 + $0x2400] sm:$0xff]  ;;  %v1211_v27 = vld [vmem:[%s10303_s1 + $0x2448] sm:$0xff] }
 0x21c   :  { %5012 = vmatprep.subr.bf16.mxu1 %v5011_v33  ;;  %v1173_v33 = vld [vmem:[%s10303_s1 + $0x2318] sm:$0xff]  ;;  %v5033_v36 = vpack.c.bf16 %v1168_v30, %v1164_v28  ;;  %v1208_v26 = vld [vmem:[%s10303_s1 + $0x2430] sm:$0xff]  ;;  %v1215_v28 = vld [vmem:[%s10303_s1 + $0x2468] sm:$0xff] }
 0x21d   :  { %v1217_v30 = vld [vmem:[%s10303_s1 + $0x2478] sm:$0xff] }
 0x21e   :  { %4246 = vmatpush1.bf16.msra.mxu0 %v4245_v39  ;;  %v1174_v39 = vld [vmem:[%s10303_s1 + $0x2320] sm:$0xff]  ;;  %v1233_v56 = vld [vmem:[%s10303_s1 + $0x24f8] sm:$0xff] }
 0x21f   :  { %5014 = vmatpush1.bf16.msra.mxu1 %v5013_v40  ;;  %4248 = vmatprep.subr.bf16.mxu0 %v4247_v41  ;;  %v1172_v40 = vld [vmem:[%s10303_s1 + $0x2310] sm:$0xff]  ;;  %v5035_v41 = vpack.c.bf16 %v1177_v34, %v1173_v33  ;;  %v4269_v47 = vpack.c.bf16 %v1174_v39, %v1170_v38  ;;  %v4287_v34 = vpack.c.bf16 %v1215_v28, %v1211_v27  ;;  %v1237_v3 = vld [vmem:[%s10303_s1 + $0x2518] sm:$0xff] }
 0x220   :  { %5016 = vmatprep.subr.bf16.mxu1 %v5015_v45  ;;  %v1181_v45 = vld [vmem:[%s10303_s1 + $0x2358] sm:$0xff]  ;;  %v5037_v48 = vpack.c.bf16 %v1176_v42, %v1172_v40  ;;  %v1216_v39 = vld [vmem:[%s10303_s1 + $0x2470] sm:$0xff]  ;;  %v1219_v40 = vld [vmem:[%s10303_s1 + $0x2488] sm:$0xff] }
 0x221   :  { %v1221_v42 = vld [vmem:[%s10303_s1 + $0x2498] sm:$0xff] }
 0x222   :  { %4250 = vmatpush1.bf16.msra.mxu0 %v4249_v51  ;;  %v1182_v51 = vld [vmem:[%s10303_s1 + $0x2360] sm:$0xff]  ;;  %v1241_v4 = vld [vmem:[%s10303_s1 + $0x2538] sm:$0xff] }
 0x223   :  { %5018 = vmatpush1.bf16.msra.mxu1 %v5017_v52  ;;  %4252 = vmatprep.subr.bf16.mxu0 %v4251_v53  ;;  %v1180_v52 = vld [vmem:[%s10303_s1 + $0x2350] sm:$0xff]  ;;  %v5039_v53 = vpack.c.bf16 %v1185_v46, %v1181_v45  ;;  %v4273_v59 = vpack.c.bf16 %v1182_v51, %v1178_v50  ;;  %v5059_v51 = vpack.c.bf16 %v1225_v43, %v1221_v42  ;;  %v1245_v15 = vld [vmem:[%s10303_s1 + $0x2558] sm:$0xff] }
 0x224   :  { %5020 = vmatprep.subr.bf16.mxu1 %v5019_v57  ;;  %v1189_v57 = vld [vmem:[%s10303_s1 + $0x2398] sm:$0xff]  ;;  %v5041_v60 = vpack.c.bf16 %v1184_v54, %v1180_v52  ;;  %v1220_v50 = vld [vmem:[%s10303_s1 + $0x2490] sm:$0xff]  ;;  %v1231_v54 = vld [vmem:[%s10303_s1 + $0x24e8] sm:$0xff] }
 0x225   :  { %v1224_v52 = vld [vmem:[%s10303_s1 + $0x24b0] sm:$0xff]  ;;  %v1249_v16 = vld [vmem:[%s10303_s1 + $0x2578] sm:$0xff] }
 0x226   :  { %4254 = vmatpush1.bf16.msra.mxu0 %v4253_v63  ;;  %v1190_v63 = vld [vmem:[%s10303_s1 + $0x23a0] sm:$0xff]  ;;  %v1253_v27 = vld [vmem:[%s10303_s1 + $0x2598] sm:$0xff] }
 0x227   :  { %5022 = vmatpush1.bf16.msra.mxu1 %v5021_v0  ;;  %4256 = vmatprep.subr.bf16.mxu0 %v4255_v1  ;;  %v1188_v0 = vld [vmem:[%s10303_s1 + $0x2390] sm:$0xff]  ;;  %v5043_v1 = vpack.c.bf16 %v1193_v58, %v1189_v57  ;;  %v4277_v7 = vpack.c.bf16 %v1190_v63, %v1186_v62  ;;  %v5061_v58 = vpack.c.bf16 %v1224_v52, %v1220_v50  ;;  %v1257_v28 = vld [vmem:[%s10303_s1 + $0x25b8] sm:$0xff]  ;;  %v1271_v50 = vld [vmem:[%s10303_s1 + $0x2628] sm:$0xff] }
 0x228   :  { %5024 = vmatprep.subr.bf16.mxu1 %v5023_v5  ;;  %v1197_v5 = vld [vmem:[%s10303_s1 + $0x23d8] sm:$0xff]  ;;  %v5045_v8 = vpack.c.bf16 %v1192_v2, %v1188_v0  ;;  %v1228_v62 = vld [vmem:[%s10303_s1 + $0x24d0] sm:$0xff]  ;;  %v5063_v63 = vpack.c.bf16 %v1233_v56, %v1229_v55  ;;  %v1239_v2 = vld [vmem:[%s10303_s1 + $0x2528] sm:$0xff] }
 0x229   :  { %v1232_v0 = vld [vmem:[%s10303_s1 + $0x24f0] sm:$0xff]  ;;  %v1273_v52 = vld [vmem:[%s10303_s1 + $0x2638] sm:$0xff]  ;;  %v1266_v56 = vld [vmem:[%s10303_s1 + $0x2600] sm:$0xff] }
 0x22a   :  { %4258 = vmatpush1.bf16.msra.mxu0 %v4257_v11  ;;  %v1198_v11 = vld [vmem:[%s10303_s1 + $0x23e0] sm:$0xff] }
 0x22b   :  { %5026 = vmatpush1.bf16.msra.mxu1 %v5025_v12  ;;  %4260 = vmatprep.subr.bf16.mxu0 %v4259_v13  ;;  %v1196_v12 = vld [vmem:[%s10303_s1 + $0x23d0] sm:$0xff]  ;;  %v5047_v13 = vpack.c.bf16 %v1201_v6, %v1197_v5  ;;  %v4281_v19 = vpack.c.bf16 %v1198_v11, %v1194_v10  ;;  %v5065_v6 = vpack.c.bf16 %v1232_v0, %v1228_v62  ;;  %v1279_v62 = vld [vmem:[%s10303_s1 + $0x2668] sm:$0xff]  ;;  %v1281_v0 = vld [vmem:[%s10303_s1 + $0x2678] sm:$0xff] }
 0x22c   :  { %5028 = vmatprep.subr.bf16.mxu1 %v5027_v17  ;;  %v1205_v17 = vld [vmem:[%s10303_s1 + $0x2418] sm:$0xff]  ;;  %v5049_v20 = vpack.c.bf16 %v1200_v14, %v1196_v12  ;;  %v1236_v10 = vld [vmem:[%s10303_s1 + $0x2510] sm:$0xff]  ;;  %v5067_v11 = vpack.c.bf16 %v1241_v4, %v1237_v3  ;;  %v1247_v14 = vld [vmem:[%s10303_s1 + $0x2568] sm:$0xff] }
 0x22d   :  { %v1240_v12 = vld [vmem:[%s10303_s1 + $0x2530] sm:$0xff]  ;;  %v1274_v4 = vld [vmem:[%s10303_s1 + $0x2640] sm:$0xff] }
 0x22e   :  { %4262 = vmatpush1.bf16.msra.mxu0 %v4261_v23  ;;  %v1206_v23 = vld [vmem:[%s10303_s1 + $0x2420] sm:$0xff] }
 0x22f   :  { %5030 = vmatpush1.bf16.msra.mxu1 %v5029_v24  ;;  %4264 = vmatprep.subr.bf16.mxu0 %v4263_v25  ;;  %v1204_v24 = vld [vmem:[%s10303_s1 + $0x2410] sm:$0xff]  ;;  %v5051_v25 = vpack.c.bf16 %v1209_v18, %v1205_v17  ;;  %v4285_v32 = vpack.c.bf16 %v1206_v23, %v1202_v22  ;;  %v5069_v18 = vpack.c.bf16 %v1240_v12, %v1236_v10  ;;  %v1287_v10 = vld [vmem:[%s10303_s1 + $0x26a8] sm:$0xff]  ;;  %v1289_v12 = vld [vmem:[%s10303_s1 + $0x26b8] sm:$0xff] }
 0x230   :  { %5032 = vmatprep.subr.bf16.mxu1 %v5031_v29  ;;  %v1213_v29 = vld [vmem:[%s10303_s1 + $0x2458] sm:$0xff]  ;;  %v5053_v33 = vpack.c.bf16 %v1208_v26, %v1204_v24  ;;  %v1244_v22 = vld [vmem:[%s10303_s1 + $0x2550] sm:$0xff]  ;;  %v5071_v23 = vpack.c.bf16 %v1249_v16, %v1245_v15  ;;  %v1255_v26 = vld [vmem:[%s10303_s1 + $0x25a8] sm:$0xff] }
 0x231   :  { %v5055_v38 = vpack.c.bf16 %v1217_v30, %v1213_v29  ;;  %v1248_v24 = vld [vmem:[%s10303_s1 + $0x2570] sm:$0xff]  ;;  %v1282_v16 = vld [vmem:[%s10303_s1 + $0x2680] sm:$0xff] }
 0x232   :  { %4266 = vmatpush1.bf16.msra.mxu0 %v4265_v35  ;;  %v1210_v35 = vld [vmem:[%s10303_s1 + $0x2440] sm:$0xff]  ;;  %v5073_v30 = vpack.c.bf16 %v1248_v24, %v1244_v22  ;;  %v1295_v22 = vld [vmem:[%s10303_s1 + $0x26e8] sm:$0xff]  ;;  %v1297_v24 = vld [vmem:[%s10303_s1 + $0x26f8] sm:$0xff] }
 0x233   :  { %5034 = vmatpush1.bf16.msra.mxu1 %v5033_v36  ;;  %4268 = vmatprep.subr.bf16.mxu0 %v4267_v37  ;;  %v1214_v36 = vld [vmem:[%s10303_s1 + $0x2460] sm:$0xff]  ;;  %v1212_v37 = vld [vmem:[%s10303_s1 + $0x2450] sm:$0xff] }
 0x234   :  { %5036 = vmatprep.subr.bf16.mxu1 %v5035_v41  ;;  %v1223_v41 = vld [vmem:[%s10303_s1 + $0x24a8] sm:$0xff]  ;;  %v4289_v45 = vpack.c.bf16 %v1214_v36, %v1210_v35  ;;  %v5057_v46 = vpack.c.bf16 %v1216_v39, %v1212_v37  ;;  %v5075_v35 = vpack.c.bf16 %v1257_v28, %v1253_v27  ;;  %v1256_v36 = vld [vmem:[%s10303_s1 + $0x25b0] sm:$0xff]  ;;  %v1261_v39 = vld [vmem:[%s10303_s1 + $0x25d8] sm:$0xff] }
 0x235   :  { %v1259_v37 = vld [vmem:[%s10303_s1 + $0x25c8] sm:$0xff]  ;;  %v1290_v28 = vld [vmem:[%s10303_s1 + $0x26c0] sm:$0xff] }
 0x236   :  { %4270 = vmatpush1.bf16.msra.mxu0 %v4269_v47  ;;  %v4291_v47 = vpack.c.bf16 %v1223_v41, %v1219_v40  ;;  %v1265_v40 = vld [vmem:[%s10303_s1 + $0x25f8] sm:$0xff] }
 0x237   :  { %5038 = vmatpush1.bf16.msra.mxu1 %v5037_v48  ;;  %4272 = vmatprep.subr.bf16.mxu0 %v4271_v49  ;;  %v1218_v48 = vld [vmem:[%s10303_s1 + $0x2480] sm:$0xff] }
 0x238   :  { %5040 = vmatprep.subr.bf16.mxu1 %v5039_v53  ;;  %v1222_v49 = vld [vmem:[%s10303_s1 + $0x24a0] sm:$0xff]  ;;  %v1227_v53 = vld [vmem:[%s10303_s1 + $0x24c8] sm:$0xff] }
 0x239   :  { %v4293_v57 = vpack.c.bf16 %v1222_v49, %v1218_v48  ;;  %v1264_v48 = vld [vmem:[%s10303_s1 + $0x25f0] sm:$0xff]  ;;  %v1267_v49 = vld [vmem:[%s10303_s1 + $0x2608] sm:$0xff] }
 0x23a   :  { %4274 = vmatpush1.bf16.msra.mxu0 %v4273_v59  ;;  %v4295_v59 = vpack.c.bf16 %v1231_v54, %v1227_v53  ;;  %v4315_v55 = vpack.c.bf16 %v1271_v50, %v1267_v49 }
 0x23b   :  { %5042 = vmatpush1.bf16.msra.mxu1 %v5041_v60  ;;  %4276 = vmatprep.subr.bf16.mxu0 %v4275_v61  ;;  %v1226_v60 = vld [vmem:[%s10303_s1 + $0x24c0] sm:$0xff] }
 0x23c   :  { %5044 = vmatprep.subr.bf16.mxu1 %v5043_v1  ;;  %v1230_v61 = vld [vmem:[%s10303_s1 + $0x24e0] sm:$0xff]  ;;  %v1235_v1 = vld [vmem:[%s10303_s1 + $0x2508] sm:$0xff] }
 0x23d   :  { %v4297_v5 = vpack.c.bf16 %v1230_v61, %v1226_v60  ;;  %v1272_v60 = vld [vmem:[%s10303_s1 + $0x2630] sm:$0xff]  ;;  %v1275_v61 = vld [vmem:[%s10303_s1 + $0x2648] sm:$0xff] }
 0x23e   :  { %4278 = vmatpush1.bf16.msra.mxu0 %v4277_v7  ;;  %v4299_v7 = vpack.c.bf16 %v1239_v2, %v1235_v1  ;;  %v4319_v3 = vpack.c.bf16 %v1279_v62, %v1275_v61 }
 0x23f   :  { %5046 = vmatpush1.bf16.msra.mxu1 %v5045_v8  ;;  %4280 = vmatprep.subr.bf16.mxu0 %v4279_v9  ;;  %v1234_v8 = vld [vmem:[%s10303_s1 + $0x2500] sm:$0xff] }
 0x240   :  { %5048 = vmatprep.subr.bf16.mxu1 %v5047_v13  ;;  %v1238_v9 = vld [vmem:[%s10303_s1 + $0x2520] sm:$0xff]  ;;  %v1243_v13 = vld [vmem:[%s10303_s1 + $0x2548] sm:$0xff] }
 0x241   :  { %v4301_v17 = vpack.c.bf16 %v1238_v9, %v1234_v8  ;;  %v1280_v8 = vld [vmem:[%s10303_s1 + $0x2670] sm:$0xff]  ;;  %v1283_v9 = vld [vmem:[%s10303_s1 + $0x2688] sm:$0xff] }
 0x242   :  { %4282 = vmatpush1.bf16.msra.mxu0 %v4281_v19  ;;  %v4303_v19 = vpack.c.bf16 %v1247_v14, %v1243_v13  ;;  %v4323_v15 = vpack.c.bf16 %v1287_v10, %v1283_v9 }
 0x243   :  { %5050 = vmatpush1.bf16.msra.mxu1 %v5049_v20  ;;  %4284 = vmatprep.subr.bf16.mxu0 %v4283_v21  ;;  %v1242_v20 = vld [vmem:[%s10303_s1 + $0x2540] sm:$0xff] }
 0x244   :  { %5052 = vmatprep.subr.bf16.mxu1 %v5051_v25  ;;  %v1246_v21 = vld [vmem:[%s10303_s1 + $0x2560] sm:$0xff]  ;;  %v1251_v25 = vld [vmem:[%s10303_s1 + $0x2588] sm:$0xff] }
 0x245   :  { %2241 = vmatmul.mubr.f32.vlgmr.msra.gmra.mrb[0].mxu0 %v42_v31  ;;  %v4305_v29 = vpack.c.bf16 %v1246_v21, %v1242_v20  ;;  %v1288_v20 = vld [vmem:[%s10303_s1 + $0x26b0] sm:$0xff]  ;;  %v1291_v21 = vld [vmem:[%s10303_s1 + $0x26c8] sm:$0xff] }
 0x246   :  { %4286 = vmatpush1.bf16.msra.mxu0 %v4285_v32  ;;  %3093 = vmatmul.mubr.f32.vlgmr.msra.gmra.mrb[0].mxu1 %v42_v31  ;;  %v4307_v31 = vpack.c.bf16 %v1255_v26, %v1251_v25  ;;  %v1250_v32 = vld [vmem:[%s10303_s1 + $0x2580] sm:$0xff]  ;;  %v4327_v27 = vpack.c.bf16 %v1295_v22, %v1291_v21 }
 0x247   :  { %5054 = vmatpush1.bf16.msra.mxu1 %v5053_v33  ;;  %4288 = vmatprep.subr.bf16.mxu0 %v4287_v34  ;;  %v1254_v33 = vld [vmem:[%s10303_s1 + $0x25a0] sm:$0xff]  ;;  %v1252_v34 = vld [vmem:[%s10303_s1 + $0x2590] sm:$0xff] }
 0x248   :  { %5056 = vmatprep.subr.bf16.mxu1 %v5055_v38  ;;  %2311 = vmatprep.mubr.f32.mxu0 %v45_v44  ;;  %v1263_v38 = vld [vmem:[%s10303_s1 + $0x25e8] sm:$0xff]  ;;  %v4309_v41 = vpack.c.bf16 %v1254_v33, %v1250_v32  ;;  %v5077_v42 = vpack.c.bf16 %v1256_v36, %v1252_v34  ;;  %v1296_v32 = vld [vmem:[%s10303_s1 + $0x26f0] sm:$0xff]  ;;  %v1305_v36 = vld [vmem:[%s10303_s1 + $0x2738] sm:$0xff] }
 0x249   :  { %3163 = vmatprep.mubr.f32.mxu1 %v45_v44  ;;  %v4311_v43 = vpack.c.bf16 %v1263_v38, %v1259_v37  ;;  %v1258_v44 = vld [vmem:[%s10303_s1 + $0x25c0] sm:$0xff]  ;;  %v1299_v33 = vld [vmem:[%s10303_s1 + $0x2708] sm:$0xff] }
 0x24a   :  { %4290 = vmatpush1.bf16.msra.mxu0 %v4289_v45  ;;  %v1262_v45 = vld [vmem:[%s10303_s1 + $0x25e0] sm:$0xff]  ;;  %v1303_v34 = vld [vmem:[%s10303_s1 + $0x2728] sm:$0xff] }
 0x24b   :  { %5058 = vmatpush1.bf16.msra.mxu1 %v5057_v46  ;;  %4292 = vmatprep.subr.bf16.mxu0 %v4291_v47  ;;  %v1260_v46 = vld [vmem:[%s10303_s1 + $0x25d0] sm:$0xff]  ;;  %v5079_v47 = vpack.c.bf16 %v1265_v40, %v1261_v39  ;;  %v4313_v53 = vpack.c.bf16 %v1262_v45, %v1258_v44  ;;  %v4331_v39 = vpack.c.bf16 %v1303_v34, %v1299_v33  ;;  %v1298_v40 = vld [vmem:[%s10303_s1 + $0x2700] sm:$0xff]  ;;  %v1307_v45 = vld [vmem:[%s10303_s1 + $0x2748] sm:$0xff] }
 0x24c   :  { %5060 = vmatprep.subr.bf16.mxu1 %v5059_v51  ;;  %v1269_v51 = vld [vmem:[%s10303_s1 + $0x2618] sm:$0xff]  ;;  %v5081_v54 = vpack.c.bf16 %v1264_v48, %v1260_v46  ;;  %v1304_v44 = vld [vmem:[%s10303_s1 + $0x2730] sm:$0xff]  ;;  %v1311_v46 = vld [vmem:[%s10303_s1 + $0x2768] sm:$0xff] }
 0x24d   :  { %v1313_v48 = vld [vmem:[%s10303_s1 + $0x2778] sm:$0xff]  ;;  %v44_v33 = vld [vmem:[%s10304_s0 + $0x90] sm:$0xff] }
 0x24e   :  { %4294 = vmatpush1.bf16.msra.mxu0 %v4293_v57  ;;  %v1270_v57 = vld [vmem:[%s10303_s1 + $0x2620] sm:$0xff] }
 0x24f   :  { %5062 = vmatpush1.bf16.msra.mxu1 %v5061_v58  ;;  %4296 = vmatprep.subr.bf16.mxu0 %v4295_v59  ;;  %v1268_v58 = vld [vmem:[%s10303_s1 + $0x2610] sm:$0xff]  ;;  %v5083_v59 = vpack.c.bf16 %v1273_v52, %v1269_v51  ;;  %v4317_v1 = vpack.c.bf16 %v1270_v57, %v1266_v56  ;;  %v4335_v51 = vpack.c.bf16 %v1311_v46, %v1307_v45  ;;  %v1306_v52 = vld [vmem:[%s10303_s1 + $0x2740] sm:$0xff]  ;;  %v1315_v57 = vld [vmem:[%s10303_s1 + $0x2788] sm:$0xff] }
 0x250   :  { %5064 = vmatprep.subr.bf16.mxu1 %v5063_v63  ;;  %v1277_v63 = vld [vmem:[%s10303_s1 + $0x2658] sm:$0xff]  ;;  %v5085_v2 = vpack.c.bf16 %v1272_v60, %v1268_v58  ;;  %v1312_v56 = vld [vmem:[%s10303_s1 + $0x2770] sm:$0xff]  ;;  %v1319_v58 = vld [vmem:[%s10303_s1 + $0x27a8] sm:$0xff] }
 0x251   :  { %v1321_v60 = vld [vmem:[%s10303_s1 + $0x27b8] sm:$0xff]  ;;  %v47_v46 = vld [vmem:[%s10304_s0 + $0xa8] sm:$0xff] }
 0x252   :  { %4298 = vmatpush1.bf16.msra.mxu0 %v4297_v5  ;;  %v1278_v5 = vld [vmem:[%s10303_s1 + $0x2660] sm:$0xff]  ;;  %v1353_v45 = vld [vmem:[%s10303_s1 + $0x28b8] sm:$0xff] }
 0x253   :  { %5066 = vmatpush1.bf16.msra.mxu1 %v5065_v6  ;;  %4300 = vmatprep.subr.bf16.mxu0 %v4299_v7  ;;  %v1276_v6 = vld [vmem:[%s10303_s1 + $0x2650] sm:$0xff]  ;;  %v5087_v7 = vpack.c.bf16 %v1281_v0, %v1277_v63  ;;  %v4321_v13 = vpack.c.bf16 %v1278_v5, %v1274_v4  ;;  %v4339_v63 = vpack.c.bf16 %v1319_v58, %v1315_v57  ;;  %v1314_v0 = vld [vmem:[%s10303_s1 + $0x2780] sm:$0xff]  ;;  %v1323_v5 = vld [vmem:[%s10303_s1 + $0x27c8] sm:$0xff] }
 0x254   :  { %5068 = vmatprep.subr.bf16.mxu1 %v5067_v11  ;;  %v1285_v11 = vld [vmem:[%s10303_s1 + $0x2698] sm:$0xff]  ;;  %v5089_v14 = vpack.c.bf16 %v1280_v8, %v1276_v6  ;;  %v1320_v4 = vld [vmem:[%s10303_s1 + $0x27b0] sm:$0xff]  ;;  %v1327_v6 = vld [vmem:[%s10303_s1 + $0x27e8] sm:$0xff] }
 0x255   :  { %v1329_v8 = vld [vmem:[%s10303_s1 + $0x27f8] sm:$0xff] }
 0x256   :  { %4302 = vmatpush1.bf16.msra.mxu0 %v4301_v17  ;;  %v1286_v17 = vld [vmem:[%s10303_s1 + $0x26a0] sm:$0xff]  ;;  %v1357_v57 = vld [vmem:[%s10303_s1 + $0x28d8] sm:$0xff] }
 0x257   :  { %5070 = vmatpush1.bf16.msra.mxu1 %v5069_v18  ;;  %4304 = vmatprep.subr.bf16.mxu0 %v4303_v19  ;;  %v1284_v18 = vld [vmem:[%s10303_s1 + $0x2690] sm:$0xff]  ;;  %v5091_v19 = vpack.c.bf16 %v1289_v12, %v1285_v11  ;;  %v4325_v25 = vpack.c.bf16 %v1286_v17, %v1282_v16  ;;  %v4343_v11 = vpack.c.bf16 %v1327_v6, %v1323_v5  ;;  %v1322_v12 = vld [vmem:[%s10303_s1 + $0x27c0] sm:$0xff]  ;;  %v1331_v17 = vld [vmem:[%s10303_s1 + $0x2808] sm:$0xff] }
 0x258   :  { %5072 = vmatprep.subr.bf16.mxu1 %v5071_v23  ;;  %v1293_v23 = vld [vmem:[%s10303_s1 + $0x26d8] sm:$0xff]  ;;  %v5093_v26 = vpack.c.bf16 %v1288_v20, %v1284_v18  ;;  %v1328_v16 = vld [vmem:[%s10303_s1 + $0x27f0] sm:$0xff]  ;;  %v1335_v18 = vld [vmem:[%s10303_s1 + $0x2828] sm:$0xff] }
 0x259   :  { %v1337_v20 = vld [vmem:[%s10303_s1 + $0x2838] sm:$0xff] }
 0x25a   :  { %4306 = vmatpush1.bf16.msra.mxu0 %v4305_v29  ;;  %v1294_v29 = vld [vmem:[%s10303_s1 + $0x26e0] sm:$0xff]  ;;  %v1361_v58 = vld [vmem:[%s10303_s1 + $0x28f8] sm:$0xff] }
 0x25b   :  { %5074 = vmatpush1.bf16.msra.mxu1 %v5073_v30  ;;  %4308 = vmatprep.subr.bf16.mxu0 %v4307_v31  ;;  %v1292_v30 = vld [vmem:[%s10303_s1 + $0x26d0] sm:$0xff]  ;;  %v5095_v31 = vpack.c.bf16 %v1297_v24, %v1293_v23  ;;  %v4329_v37 = vpack.c.bf16 %v1294_v29, %v1290_v28  ;;  %v4347_v23 = vpack.c.bf16 %v1335_v18, %v1331_v17  ;;  %v1330_v24 = vld [vmem:[%s10303_s1 + $0x2800] sm:$0xff]  ;;  %v1339_v29 = vld [vmem:[%s10303_s1 + $0x2848] sm:$0xff] }
 0x25c   :  { %5076 = vmatprep.subr.bf16.mxu1 %v5075_v35  ;;  %v1301_v35 = vld [vmem:[%s10303_s1 + $0x2718] sm:$0xff]  ;;  %v5097_v38 = vpack.c.bf16 %v1296_v32, %v1292_v30  ;;  %v1336_v28 = vld [vmem:[%s10303_s1 + $0x2830] sm:$0xff]  ;;  %v1343_v30 = vld [vmem:[%s10303_s1 + $0x2868] sm:$0xff] }
 0x25d   :  { %v1345_v32 = vld [vmem:[%s10303_s1 + $0x2878] sm:$0xff] }
 0x25e   :  { %4310 = vmatpush1.bf16.msra.mxu0 %v4309_v41  ;;  %v1302_v41 = vld [vmem:[%s10303_s1 + $0x2720] sm:$0xff]  ;;  %v1365_v5 = vld [vmem:[%s10303_s1 + $0x2918] sm:$0xff] }
 0x25f   :  { %5078 = vmatpush1.bf16.msra.mxu1 %v5077_v42  ;;  %4312 = vmatprep.subr.bf16.mxu0 %v4311_v43  ;;  %v1300_v42 = vld [vmem:[%s10303_s1 + $0x2710] sm:$0xff]  ;;  %v5099_v43 = vpack.c.bf16 %v1305_v36, %v1301_v35  ;;  %v4333_v49 = vpack.c.bf16 %v1302_v41, %v1298_v40  ;;  %v4351_v36 = vpack.c.bf16 %v1343_v30, %v1339_v29  ;;  %v1369_v6 = vld [vmem:[%s10303_s1 + $0x2938] sm:$0xff] }
 0x260   :  { %5080 = vmatprep.subr.bf16.mxu1 %v5079_v47  ;;  %v1309_v47 = vld [vmem:[%s10303_s1 + $0x2758] sm:$0xff]  ;;  %v5101_v50 = vpack.c.bf16 %v1304_v44, %v1300_v42  ;;  %v1344_v41 = vld [vmem:[%s10303_s1 + $0x2870] sm:$0xff]  ;;  %v1347_v42 = vld [vmem:[%s10303_s1 + $0x2888] sm:$0xff] }
 0x261   :  { %v1349_v44 = vld [vmem:[%s10303_s1 + $0x2898] sm:$0xff] }
 0x262   :  { %4314 = vmatpush1.bf16.msra.mxu0 %v4313_v53  ;;  %v1310_v53 = vld [vmem:[%s10303_s1 + $0x2760] sm:$0xff]  ;;  %v1373_v17 = vld [vmem:[%s10303_s1 + $0x2958] sm:$0xff] }
 0x263   :  { %5082 = vmatpush1.bf16.msra.mxu1 %v5081_v54  ;;  %4316 = vmatprep.subr.bf16.mxu0 %v4315_v55  ;;  %v1308_v54 = vld [vmem:[%s10303_s1 + $0x2750] sm:$0xff]  ;;  %v5103_v55 = vpack.c.bf16 %v1313_v48, %v1309_v47  ;;  %v4337_v61 = vpack.c.bf16 %v1310_v53, %v1306_v52  ;;  %v5123_v53 = vpack.c.bf16 %v1353_v45, %v1349_v44  ;;  %v1377_v18 = vld [vmem:[%s10303_s1 + $0x2978] sm:$0xff] }
 0x264   :  { %5084 = vmatprep.subr.bf16.mxu1 %v5083_v59  ;;  %v1317_v59 = vld [vmem:[%s10303_s1 + $0x2798] sm:$0xff]  ;;  %v5105_v62 = vpack.c.bf16 %v1312_v56, %v1308_v54  ;;  %v1348_v52 = vld [vmem:[%s10303_s1 + $0x2890] sm:$0xff]  ;;  %v1359_v56 = vld [vmem:[%s10303_s1 + $0x28e8] sm:$0xff] }
 0x265   :  { %v1352_v54 = vld [vmem:[%s10303_s1 + $0x28b0] sm:$0xff]  ;;  %v1381_v29 = vld [vmem:[%s10303_s1 + $0x2998] sm:$0xff] }
 0x266   :  { %4318 = vmatpush1.bf16.msra.mxu0 %v4317_v1  ;;  %v1318_v1 = vld [vmem:[%s10303_s1 + $0x27a0] sm:$0xff]  ;;  %v1385_v30 = vld [vmem:[%s10303_s1 + $0x29b8] sm:$0xff] }
 0x267   :  { %5086 = vmatpush1.bf16.msra.mxu1 %v5085_v2  ;;  %4320 = vmatprep.subr.bf16.mxu0 %v4319_v3  ;;  %v1316_v2 = vld [vmem:[%s10303_s1 + $0x2790] sm:$0xff]  ;;  %v5107_v3 = vpack.c.bf16 %v1321_v60, %v1317_v59  ;;  %v4341_v9 = vpack.c.bf16 %v1318_v1, %v1314_v0  ;;  %v5125_v60 = vpack.c.bf16 %v1352_v54, %v1348_v52  ;;  %v1399_v52 = vld [vmem:[%s10303_s1 + $0x2a28] sm:$0xff]  ;;  %v1401_v54 = vld [vmem:[%s10303_s1 + $0x2a38] sm:$0xff] }
 0x268   :  { %5088 = vmatprep.subr.bf16.mxu1 %v5087_v7  ;;  %v1325_v7 = vld [vmem:[%s10303_s1 + $0x27d8] sm:$0xff]  ;;  %v5109_v10 = vpack.c.bf16 %v1320_v4, %v1316_v2  ;;  %v1356_v0 = vld [vmem:[%s10303_s1 + $0x28d0] sm:$0xff]  ;;  %v5127_v1 = vpack.c.bf16 %v1361_v58, %v1357_v57  ;;  %v1367_v4 = vld [vmem:[%s10303_s1 + $0x2928] sm:$0xff] }
 0x269   :  { %v1360_v2 = vld [vmem:[%s10303_s1 + $0x28f0] sm:$0xff]  ;;  %v1394_v58 = vld [vmem:[%s10303_s1 + $0x2a00] sm:$0xff] }
 0x26a   :  { %4322 = vmatpush1.bf16.msra.mxu0 %v4321_v13  ;;  %v1326_v13 = vld [vmem:[%s10303_s1 + $0x27e0] sm:$0xff] }
 0x26b   :  { %5090 = vmatpush1.bf16.msra.mxu1 %v5089_v14  ;;  %4324 = vmatprep.subr.bf16.mxu0 %v4323_v15  ;;  %v1324_v14 = vld [vmem:[%s10303_s1 + $0x27d0] sm:$0xff]  ;;  %v5111_v15 = vpack.c.bf16 %v1329_v8, %v1325_v7  ;;  %v4345_v21 = vpack.c.bf16 %v1326_v13, %v1322_v12  ;;  %v5129_v8 = vpack.c.bf16 %v1360_v2, %v1356_v0  ;;  %v1407_v0 = vld [vmem:[%s10303_s1 + $0x2a68] sm:$0xff]  ;;  %v1409_v2 = vld [vmem:[%s10303_s1 + $0x2a78] sm:$0xff] }
 0x26c   :  { %5092 = vmatprep.subr.bf16.mxu1 %v5091_v19  ;;  %v1333_v19 = vld [vmem:[%s10303_s1 + $0x2818] sm:$0xff]  ;;  %v5113_v22 = vpack.c.bf16 %v1328_v16, %v1324_v14  ;;  %v1364_v12 = vld [vmem:[%s10303_s1 + $0x2910] sm:$0xff]  ;;  %v5131_v13 = vpack.c.bf16 %v1369_v6, %v1365_v5  ;;  %v1375_v16 = vld [vmem:[%s10303_s1 + $0x2968] sm:$0xff] }
 0x26d   :  { %v1368_v14 = vld [vmem:[%s10303_s1 + $0x2930] sm:$0xff]  ;;  %v1402_v6 = vld [vmem:[%s10303_s1 + $0x2a40] sm:$0xff] }
 0x26e   :  { %4326 = vmatpush1.bf16.msra.mxu0 %v4325_v25  ;;  %v1334_v25 = vld [vmem:[%s10303_s1 + $0x2820] sm:$0xff] }
 0x26f   :  { %5094 = vmatpush1.bf16.msra.mxu1 %v5093_v26  ;;  %4328 = vmatprep.subr.bf16.mxu0 %v4327_v27  ;;  %v1332_v26 = vld [vmem:[%s10303_s1 + $0x2810] sm:$0xff]  ;;  %v5115_v27 = vpack.c.bf16 %v1337_v20, %v1333_v19  ;;  %v4349_v34 = vpack.c.bf16 %v1334_v25, %v1330_v24  ;;  %v5133_v20 = vpack.c.bf16 %v1368_v14, %v1364_v12  ;;  %v1415_v12 = vld [vmem:[%s10303_s1 + $0x2aa8] sm:$0xff]  ;;  %v1417_v14 = vld [vmem:[%s10303_s1 + $0x2ab8] sm:$0xff] }
 0x270   :  { %5096 = vmatprep.subr.bf16.mxu1 %v5095_v31  ;;  %v1341_v31 = vld [vmem:[%s10303_s1 + $0x2858] sm:$0xff]  ;;  %v5117_v35 = vpack.c.bf16 %v1336_v28, %v1332_v26  ;;  %v1372_v24 = vld [vmem:[%s10303_s1 + $0x2950] sm:$0xff]  ;;  %v5135_v25 = vpack.c.bf16 %v1377_v18, %v1373_v17  ;;  %v1383_v28 = vld [vmem:[%s10303_s1 + $0x29a8] sm:$0xff] }
 0x271   :  { %v5119_v40 = vpack.c.bf16 %v1345_v32, %v1341_v31  ;;  %v1376_v26 = vld [vmem:[%s10303_s1 + $0x2970] sm:$0xff]  ;;  %v1410_v18 = vld [vmem:[%s10303_s1 + $0x2a80] sm:$0xff] }
 0x272   :  { %4330 = vmatpush1.bf16.msra.mxu0 %v4329_v37  ;;  %v1338_v37 = vld [vmem:[%s10303_s1 + $0x2840] sm:$0xff]  ;;  %v5137_v32 = vpack.c.bf16 %v1376_v26, %v1372_v24  ;;  %v1423_v24 = vld [vmem:[%s10303_s1 + $0x2ae8] sm:$0xff]  ;;  %v1425_v26 = vld [vmem:[%s10303_s1 + $0x2af8] sm:$0xff] }
 0x273   :  { %5098 = vmatpush1.bf16.msra.mxu1 %v5097_v38  ;;  %4332 = vmatprep.subr.bf16.mxu0 %v4331_v39  ;;  %v1342_v38 = vld [vmem:[%s10303_s1 + $0x2860] sm:$0xff]  ;;  %v1340_v39 = vld [vmem:[%s10303_s1 + $0x2850] sm:$0xff] }
 0x274   :  { %5100 = vmatprep.subr.bf16.mxu1 %v5099_v43  ;;  %v1351_v43 = vld [vmem:[%s10303_s1 + $0x28a8] sm:$0xff]  ;;  %v4353_v47 = vpack.c.bf16 %v1342_v38, %v1338_v37  ;;  %v5121_v48 = vpack.c.bf16 %v1344_v41, %v1340_v39  ;;  %v5139_v37 = vpack.c.bf16 %v1385_v30, %v1381_v29  ;;  %v1384_v38 = vld [vmem:[%s10303_s1 + $0x29b0] sm:$0xff]  ;;  %v1389_v41 = vld [vmem:[%s10303_s1 + $0x29d8] sm:$0xff] }
 0x275   :  { %v1387_v39 = vld [vmem:[%s10303_s1 + $0x29c8] sm:$0xff]  ;;  %v1418_v30 = vld [vmem:[%s10303_s1 + $0x2ac0] sm:$0xff] }
 0x276   :  { %4334 = vmatpush1.bf16.msra.mxu0 %v4333_v49  ;;  %v4355_v49 = vpack.c.bf16 %v1351_v43, %v1347_v42  ;;  %v1393_v42 = vld [vmem:[%s10303_s1 + $0x29f8] sm:$0xff] }
 0x277   :  { %5102 = vmatpush1.bf16.msra.mxu1 %v5101_v50  ;;  %4336 = vmatprep.subr.bf16.mxu0 %v4335_v51  ;;  %v1346_v50 = vld [vmem:[%s10303_s1 + $0x2880] sm:$0xff] }
 0x278   :  { %5104 = vmatprep.subr.bf16.mxu1 %v5103_v55  ;;  %v1350_v51 = vld [vmem:[%s10303_s1 + $0x28a0] sm:$0xff]  ;;  %v1355_v55 = vld [vmem:[%s10303_s1 + $0x28c8] sm:$0xff] }
 0x279   :  { %v4357_v59 = vpack.c.bf16 %v1350_v51, %v1346_v50  ;;  %v1392_v50 = vld [vmem:[%s10303_s1 + $0x29f0] sm:$0xff]  ;;  %v1395_v51 = vld [vmem:[%s10303_s1 + $0x2a08] sm:$0xff] }
 0x27a   :  { %4338 = vmatpush1.bf16.msra.mxu0 %v4337_v61  ;;  %v4359_v61 = vpack.c.bf16 %v1359_v56, %v1355_v55  ;;  %v4379_v57 = vpack.c.bf16 %v1399_v52, %v1395_v51 }
 0x27b   :  { %5106 = vmatpush1.bf16.msra.mxu1 %v5105_v62  ;;  %4340 = vmatprep.subr.bf16.mxu0 %v4339_v63  ;;  %v1354_v62 = vld [vmem:[%s10303_s1 + $0x28c0] sm:$0xff] }
 0x27c   :  { %5108 = vmatprep.subr.bf16.mxu1 %v5107_v3  ;;  %v1358_v63 = vld [vmem:[%s10303_s1 + $0x28e0] sm:$0xff]  ;;  %v1363_v3 = vld [vmem:[%s10303_s1 + $0x2908] sm:$0xff] }
 0x27d   :  { %v4361_v7 = vpack.c.bf16 %v1358_v63, %v1354_v62  ;;  %v1400_v62 = vld [vmem:[%s10303_s1 + $0x2a30] sm:$0xff]  ;;  %v1403_v63 = vld [vmem:[%s10303_s1 + $0x2a48] sm:$0xff] }
 0x27e   :  { %4342 = vmatpush1.bf16.msra.mxu0 %v4341_v9  ;;  %v4363_v9 = vpack.c.bf16 %v1367_v4, %v1363_v3  ;;  %v4383_v5 = vpack.c.bf16 %v1407_v0, %v1403_v63 }
 0x27f   :  { %5110 = vmatpush1.bf16.msra.mxu1 %v5109_v10  ;;  %4344 = vmatprep.subr.bf16.mxu0 %v4343_v11  ;;  %v1362_v10 = vld [vmem:[%s10303_s1 + $0x2900] sm:$0xff] }
 0x280   :  { %5112 = vmatprep.subr.bf16.mxu1 %v5111_v15  ;;  %v1366_v11 = vld [vmem:[%s10303_s1 + $0x2920] sm:$0xff]  ;;  %v1371_v15 = vld [vmem:[%s10303_s1 + $0x2948] sm:$0xff] }
 0x281   :  { %v4365_v19 = vpack.c.bf16 %v1366_v11, %v1362_v10  ;;  %v1408_v10 = vld [vmem:[%s10303_s1 + $0x2a70] sm:$0xff]  ;;  %v1411_v11 = vld [vmem:[%s10303_s1 + $0x2a88] sm:$0xff] }
 0x282   :  { %4346 = vmatpush1.bf16.msra.mxu0 %v4345_v21  ;;  %v4367_v21 = vpack.c.bf16 %v1375_v16, %v1371_v15  ;;  %v4387_v17 = vpack.c.bf16 %v1415_v12, %v1411_v11 }
 0x283   :  { %5114 = vmatpush1.bf16.msra.mxu1 %v5113_v22  ;;  %4348 = vmatprep.subr.bf16.mxu0 %v4347_v23  ;;  %v1370_v22 = vld [vmem:[%s10303_s1 + $0x2940] sm:$0xff] }
 0x284   :  { %5116 = vmatprep.subr.bf16.mxu1 %v5115_v27  ;;  %v1374_v23 = vld [vmem:[%s10303_s1 + $0x2960] sm:$0xff]  ;;  %v1379_v27 = vld [vmem:[%s10303_s1 + $0x2988] sm:$0xff] }
 0x285   :  { %2312 = vmatmul.mubr.f32.vlgmr.msra.gmra.mrb[0].mxu0 %v44_v33  ;;  %v4369_v31 = vpack.c.bf16 %v1374_v23, %v1370_v22  ;;  %v1416_v22 = vld [vmem:[%s10303_s1 + $0x2ab0] sm:$0xff]  ;;  %v1419_v23 = vld [vmem:[%s10303_s1 + $0x2ac8] sm:$0xff] }
 0x286   :  { %4350 = vmatpush1.bf16.msra.mxu0 %v4349_v34  ;;  %3164 = vmatmul.mubr.f32.vlgmr.msra.gmra.mrb[0].mxu1 %v44_v33  ;;  %v4371_v33 = vpack.c.bf16 %v1383_v28, %v1379_v27  ;;  %v1378_v34 = vld [vmem:[%s10303_s1 + $0x2980] sm:$0xff]  ;;  %v4391_v29 = vpack.c.bf16 %v1423_v24, %v1419_v23 }
 0x287   :  { %5118 = vmatpush1.bf16.msra.mxu1 %v5117_v35  ;;  %4352 = vmatprep.subr.bf16.mxu0 %v4351_v36  ;;  %v1382_v35 = vld [vmem:[%s10303_s1 + $0x29a0] sm:$0xff]  ;;  %v1380_v36 = vld [vmem:[%s10303_s1 + $0x2990] sm:$0xff] }
 0x288   :  { %5120 = vmatprep.subr.bf16.mxu1 %v5119_v40  ;;  %2382 = vmatprep.mubr.f32.mxu0 %v47_v46  ;;  %v1391_v40 = vld [vmem:[%s10303_s1 + $0x29e8] sm:$0xff]  ;;  %v4373_v43 = vpack.c.bf16 %v1382_v35, %v1378_v34  ;;  %v5141_v44 = vpack.c.bf16 %v1384_v38, %v1380_v36  ;;  %v1424_v34 = vld [vmem:[%s10303_s1 + $0x2af0] sm:$0xff]  ;;  %v1433_v38 = vld [vmem:[%s10303_s1 + $0x2b38] sm:$0xff] }
 0x289   :  { %3234 = vmatprep.mubr.f32.mxu1 %v47_v46  ;;  %v4375_v45 = vpack.c.bf16 %v1391_v40, %v1387_v39  ;;  %v1386_v46 = vld [vmem:[%s10303_s1 + $0x29c0] sm:$0xff]  ;;  %v1427_v35 = vld [vmem:[%s10303_s1 + $0x2b08] sm:$0xff] }
 0x28a   :  { %4354 = vmatpush1.bf16.msra.mxu0 %v4353_v47  ;;  %v1390_v47 = vld [vmem:[%s10303_s1 + $0x29e0] sm:$0xff]  ;;  %v1431_v36 = vld [vmem:[%s10303_s1 + $0x2b28] sm:$0xff] }
 0x28b   :  { %5122 = vmatpush1.bf16.msra.mxu1 %v5121_v48  ;;  %4356 = vmatprep.subr.bf16.mxu0 %v4355_v49  ;;  %v1388_v48 = vld [vmem:[%s10303_s1 + $0x29d0] sm:$0xff]  ;;  %v5143_v49 = vpack.c.bf16 %v1393_v42, %v1389_v41  ;;  %v4377_v55 = vpack.c.bf16 %v1390_v47, %v1386_v46  ;;  %v4395_v41 = vpack.c.bf16 %v1431_v36, %v1427_v35  ;;  %v1426_v42 = vld [vmem:[%s10303_s1 + $0x2b00] sm:$0xff]  ;;  %v1435_v47 = vld [vmem:[%s10303_s1 + $0x2b48] sm:$0xff] }
 0x28c   :  { %5124 = vmatprep.subr.bf16.mxu1 %v5123_v53  ;;  %v1397_v53 = vld [vmem:[%s10303_s1 + $0x2a18] sm:$0xff]  ;;  %v5145_v56 = vpack.c.bf16 %v1392_v50, %v1388_v48  ;;  %v1432_v46 = vld [vmem:[%s10303_s1 + $0x2b30] sm:$0xff]  ;;  %v1439_v48 = vld [vmem:[%s10303_s1 + $0x2b68] sm:$0xff] }
 0x28d   :  { %v1441_v50 = vld [vmem:[%s10303_s1 + $0x2b78] sm:$0xff]  ;;  %v46_v35 = vld [vmem:[%s10304_s0 + $0xa0] sm:$0xff] }
 0x28e   :  { %4358 = vmatpush1.bf16.msra.mxu0 %v4357_v59  ;;  %v1398_v59 = vld [vmem:[%s10303_s1 + $0x2a20] sm:$0xff] }
 0x28f   :  { %5126 = vmatpush1.bf16.msra.mxu1 %v5125_v60  ;;  %4360 = vmatprep.subr.bf16.mxu0 %v4359_v61  ;;  %v1396_v60 = vld [vmem:[%s10303_s1 + $0x2a10] sm:$0xff]  ;;  %v5147_v61 = vpack.c.bf16 %v1401_v54, %v1397_v53  ;;  %v4381_v3 = vpack.c.bf16 %v1398_v59, %v1394_v58  ;;  %v4399_v53 = vpack.c.bf16 %v1439_v48, %v1435_v47  ;;  %v1434_v54 = vld [vmem:[%s10303_s1 + $0x2b40] sm:$0xff]  ;;  %v1443_v59 = vld [vmem:[%s10303_s1 + $0x2b88] sm:$0xff] }
 0x290   :  { %5128 = vmatprep.subr.bf16.mxu1 %v5127_v1  ;;  %v1405_v1 = vld [vmem:[%s10303_s1 + $0x2a58] sm:$0xff]  ;;  %v5149_v4 = vpack.c.bf16 %v1400_v62, %v1396_v60  ;;  %v1440_v58 = vld [vmem:[%s10303_s1 + $0x2b70] sm:$0xff]  ;;  %v1447_v60 = vld [vmem:[%s10303_s1 + $0x2ba8] sm:$0xff] }
 0x291   :  { %v1449_v62 = vld [vmem:[%s10303_s1 + $0x2bb8] sm:$0xff] }
 0x292   :  { %4362 = vmatpush1.bf16.msra.mxu0 %v4361_v7  ;;  %v1406_v7 = vld [vmem:[%s10303_s1 + $0x2a60] sm:$0xff]  ;;  %v1481_v47 = vld [vmem:[%s10303_s1 + $0x2cb8] sm:$0xff] }
 0x293   :  { %5130 = vmatpush1.bf16.msra.mxu1 %v5129_v8  ;;  %4364 = vmatprep.subr.bf16.mxu0 %v4363_v9  ;;  %v1404_v8 = vld [vmem:[%s10303_s1 + $0x2a50] sm:$0xff]  ;;  %v5151_v9 = vpack.c.bf16 %v1409_v2, %v1405_v1  ;;  %v4385_v15 = vpack.c.bf16 %v1406_v7, %v1402_v6  ;;  %v4403_v1 = vpack.c.bf16 %v1447_v60, %v1443_v59  ;;  %v1442_v2 = vld [vmem:[%s10303_s1 + $0x2b80] sm:$0xff]  ;;  %v1451_v7 = vld [vmem:[%s10303_s1 + $0x2bc8] sm:$0xff] }
 0x294   :  { %5132 = vmatprep.subr.bf16.mxu1 %v5131_v13  ;;  %v1413_v13 = vld [vmem:[%s10303_s1 + $0x2a98] sm:$0xff]  ;;  %v5153_v16 = vpack.c.bf16 %v1408_v10, %v1404_v8  ;;  %v1448_v6 = vld [vmem:[%s10303_s1 + $0x2bb0] sm:$0xff]  ;;  %v1455_v8 = vld [vmem:[%s10303_s1 + $0x2be8] sm:$0xff] }
 0x295   :  { %v1457_v10 = vld [vmem:[%s10303_s1 + $0x2bf8] sm:$0xff] }
 0x296   :  { %4366 = vmatpush1.bf16.msra.mxu0 %v4365_v19  ;;  %v1414_v19 = vld [vmem:[%s10303_s1 + $0x2aa0] sm:$0xff]  ;;  %v49_v48 = vld [vmem:[%s10304_s0 + $0xb8] sm:$0xff] }
 0x297   :  { %5134 = vmatpush1.bf16.msra.mxu1 %v5133_v20  ;;  %4368 = vmatprep.subr.bf16.mxu0 %v4367_v21  ;;  %v1412_v20 = vld [vmem:[%s10303_s1 + $0x2a90] sm:$0xff]  ;;  %v5155_v21 = vpack.c.bf16 %v1417_v14, %v1413_v13  ;;  %v4389_v27 = vpack.c.bf16 %v1414_v19, %v1410_v18  ;;  %v4407_v13 = vpack.c.bf16 %v1455_v8, %v1451_v7  ;;  %v1450_v14 = vld [vmem:[%s10303_s1 + $0x2bc0] sm:$0xff]  ;;  %v1459_v19 = vld [vmem:[%s10303_s1 + $0x2c08] sm:$0xff] }
 0x298   :  { %5136 = vmatprep.subr.bf16.mxu1 %v5135_v25  ;;  %v1421_v25 = vld [vmem:[%s10303_s1 + $0x2ad8] sm:$0xff]  ;;  %v5157_v28 = vpack.c.bf16 %v1416_v22, %v1412_v20  ;;  %v1456_v18 = vld [vmem:[%s10303_s1 + $0x2bf0] sm:$0xff]  ;;  %v1463_v20 = vld [vmem:[%s10303_s1 + $0x2c28] sm:$0xff] }
 0x299   :  { %v1465_v22 = vld [vmem:[%s10303_s1 + $0x2c38] sm:$0xff] }
 0x29a   :  { %4370 = vmatpush1.bf16.msra.mxu0 %v4369_v31  ;;  %v1422_v31 = vld [vmem:[%s10303_s1 + $0x2ae0] sm:$0xff]  ;;  %v1485_v59 = vld [vmem:[%s10303_s1 + $0x2cd8] sm:$0xff] }
 0x29b   :  { %5138 = vmatpush1.bf16.msra.mxu1 %v5137_v32  ;;  %4372 = vmatprep.subr.bf16.mxu0 %v4371_v33  ;;  %v1420_v32 = vld [vmem:[%s10303_s1 + $0x2ad0] sm:$0xff]  ;;  %v5159_v33 = vpack.c.bf16 %v1425_v26, %v1421_v25  ;;  %v4393_v39 = vpack.c.bf16 %v1422_v31, %v1418_v30  ;;  %v4411_v25 = vpack.c.bf16 %v1463_v20, %v1459_v19  ;;  %v1458_v26 = vld [vmem:[%s10303_s1 + $0x2c00] sm:$0xff]  ;;  %v1467_v31 = vld [vmem:[%s10303_s1 + $0x2c48] sm:$0xff] }
 0x29c   :  { %5140 = vmatprep.subr.bf16.mxu1 %v5139_v37  ;;  %v1429_v37 = vld [vmem:[%s10303_s1 + $0x2b18] sm:$0xff]  ;;  %v5161_v40 = vpack.c.bf16 %v1424_v34, %v1420_v32  ;;  %v1464_v30 = vld [vmem:[%s10303_s1 + $0x2c30] sm:$0xff]  ;;  %v1471_v32 = vld [vmem:[%s10303_s1 + $0x2c68] sm:$0xff] }
 0x29d   :  { %v1473_v34 = vld [vmem:[%s10303_s1 + $0x2c78] sm:$0xff] }
 0x29e   :  { %4374 = vmatpush1.bf16.msra.mxu0 %v4373_v43  ;;  %v1430_v43 = vld [vmem:[%s10303_s1 + $0x2b20] sm:$0xff]  ;;  %v1489_v60 = vld [vmem:[%s10303_s1 + $0x2cf8] sm:$0xff] }
 0x29f   :  { %5142 = vmatpush1.bf16.msra.mxu1 %v5141_v44  ;;  %4376 = vmatprep.subr.bf16.mxu0 %v4375_v45  ;;  %v1428_v44 = vld [vmem:[%s10303_s1 + $0x2b10] sm:$0xff]  ;;  %v5163_v45 = vpack.c.bf16 %v1433_v38, %v1429_v37  ;;  %v4397_v51 = vpack.c.bf16 %v1430_v43, %v1426_v42  ;;  %v4415_v38 = vpack.c.bf16 %v1471_v32, %v1467_v31  ;;  %v1493_v7 = vld [vmem:[%s10303_s1 + $0x2d18] sm:$0xff] }
 0x2a0   :  { %5144 = vmatprep.subr.bf16.mxu1 %v5143_v49  ;;  %v1437_v49 = vld [vmem:[%s10303_s1 + $0x2b58] sm:$0xff]  ;;  %v5165_v52 = vpack.c.bf16 %v1432_v46, %v1428_v44  ;;  %v1472_v43 = vld [vmem:[%s10303_s1 + $0x2c70] sm:$0xff]  ;;  %v1475_v44 = vld [vmem:[%s10303_s1 + $0x2c88] sm:$0xff] }
 0x2a1   :  { %v1477_v46 = vld [vmem:[%s10303_s1 + $0x2c98] sm:$0xff] }
 0x2a2   :  { %4378 = vmatpush1.bf16.msra.mxu0 %v4377_v55  ;;  %v1438_v55 = vld [vmem:[%s10303_s1 + $0x2b60] sm:$0xff]  ;;  %v1497_v8 = vld [vmem:[%s10303_s1 + $0x2d38] sm:$0xff] }
 0x2a3   :  { %5146 = vmatpush1.bf16.msra.mxu1 %v5145_v56  ;;  %4380 = vmatprep.subr.bf16.mxu0 %v4379_v57  ;;  %v1436_v56 = vld [vmem:[%s10303_s1 + $0x2b50] sm:$0xff]  ;;  %v5167_v57 = vpack.c.bf16 %v1441_v50, %v1437_v49  ;;  %v4401_v63 = vpack.c.bf16 %v1438_v55, %v1434_v54  ;;  %v5187_v55 = vpack.c.bf16 %v1481_v47, %v1477_v46  ;;  %v1501_v19 = vld [vmem:[%s10303_s1 + $0x2d58] sm:$0xff] }
 0x2a4   :  { %5148 = vmatprep.subr.bf16.mxu1 %v5147_v61  ;;  %v1445_v61 = vld [vmem:[%s10303_s1 + $0x2b98] sm:$0xff]  ;;  %v5169_v0 = vpack.c.bf16 %v1440_v58, %v1436_v56  ;;  %v1476_v54 = vld [vmem:[%s10303_s1 + $0x2c90] sm:$0xff]  ;;  %v1487_v58 = vld [vmem:[%s10303_s1 + $0x2ce8] sm:$0xff] }
 0x2a5   :  { %v1480_v56 = vld [vmem:[%s10303_s1 + $0x2cb0] sm:$0xff]  ;;  %v1505_v20 = vld [vmem:[%s10303_s1 + $0x2d78] sm:$0xff] }
 0x2a6   :  { %4382 = vmatpush1.bf16.msra.mxu0 %v4381_v3  ;;  %v1446_v3 = vld [vmem:[%s10303_s1 + $0x2ba0] sm:$0xff]  ;;  %v1509_v31 = vld [vmem:[%s10303_s1 + $0x2d98] sm:$0xff] }
 0x2a7   :  { %5150 = vmatpush1.bf16.msra.mxu1 %v5149_v4  ;;  %4384 = vmatprep.subr.bf16.mxu0 %v4383_v5  ;;  %v1444_v4 = vld [vmem:[%s10303_s1 + $0x2b90] sm:$0xff]  ;;  %v5171_v5 = vpack.c.bf16 %v1449_v62, %v1445_v61  ;;  %v4405_v11 = vpack.c.bf16 %v1446_v3, %v1442_v2  ;;  %v5189_v62 = vpack.c.bf16 %v1480_v56, %v1476_v54  ;;  %v1513_v32 = vld [vmem:[%s10303_s1 + $0x2db8] sm:$0xff]  ;;  %v1527_v54 = vld [vmem:[%s10303_s1 + $0x2e28] sm:$0xff] }
 0x2a8   :  { %5152 = vmatprep.subr.bf16.mxu1 %v5151_v9  ;;  %v1453_v9 = vld [vmem:[%s10303_s1 + $0x2bd8] sm:$0xff]  ;;  %v5173_v12 = vpack.c.bf16 %v1448_v6, %v1444_v4  ;;  %v1484_v2 = vld [vmem:[%s10303_s1 + $0x2cd0] sm:$0xff]  ;;  %v5191_v3 = vpack.c.bf16 %v1489_v60, %v1485_v59  ;;  %v1495_v6 = vld [vmem:[%s10303_s1 + $0x2d28] sm:$0xff] }
 0x2a9   :  { %v1488_v4 = vld [vmem:[%s10303_s1 + $0x2cf0] sm:$0xff]  ;;  %v1529_v56 = vld [vmem:[%s10303_s1 + $0x2e38] sm:$0xff]  ;;  %v1522_v60 = vld [vmem:[%s10303_s1 + $0x2e00] sm:$0xff] }
 0x2aa   :  { %4386 = vmatpush1.bf16.msra.mxu0 %v4385_v15  ;;  %v1454_v15 = vld [vmem:[%s10303_s1 + $0x2be0] sm:$0xff] }
 0x2ab   :  { %5154 = vmatpush1.bf16.msra.mxu1 %v5153_v16  ;;  %4388 = vmatprep.subr.bf16.mxu0 %v4387_v17  ;;  %v1452_v16 = vld [vmem:[%s10303_s1 + $0x2bd0] sm:$0xff]  ;;  %v5175_v17 = vpack.c.bf16 %v1457_v10, %v1453_v9  ;;  %v4409_v23 = vpack.c.bf16 %v1454_v15, %v1450_v14  ;;  %v5193_v10 = vpack.c.bf16 %v1488_v4, %v1484_v2  ;;  %v1535_v2 = vld [vmem:[%s10303_s1 + $0x2e68] sm:$0xff]  ;;  %v1537_v4 = vld [vmem:[%s10303_s1 + $0x2e78] sm:$0xff] }
 0x2ac   :  { %5156 = vmatprep.subr.bf16.mxu1 %v5155_v21  ;;  %v1461_v21 = vld [vmem:[%s10303_s1 + $0x2c18] sm:$0xff]  ;;  %v5177_v24 = vpack.c.bf16 %v1456_v18, %v1452_v16  ;;  %v1492_v14 = vld [vmem:[%s10303_s1 + $0x2d10] sm:$0xff]  ;;  %v5195_v15 = vpack.c.bf16 %v1497_v8, %v1493_v7  ;;  %v1503_v18 = vld [vmem:[%s10303_s1 + $0x2d68] sm:$0xff] }
 0x2ad   :  { %v1496_v16 = vld [vmem:[%s10303_s1 + $0x2d30] sm:$0xff]  ;;  %v1530_v8 = vld [vmem:[%s10303_s1 + $0x2e40] sm:$0xff] }
 0x2ae   :  { %4390 = vmatpush1.bf16.msra.mxu0 %v4389_v27  ;;  %v1462_v27 = vld [vmem:[%s10303_s1 + $0x2c20] sm:$0xff] }
 0x2af   :  { %5158 = vmatpush1.bf16.msra.mxu1 %v5157_v28  ;;  %4392 = vmatprep.subr.bf16.mxu0 %v4391_v29  ;;  %v1460_v28 = vld [vmem:[%s10303_s1 + $0x2c10] sm:$0xff]  ;;  %v5179_v29 = vpack.c.bf16 %v1465_v22, %v1461_v21  ;;  %v4413_v36 = vpack.c.bf16 %v1462_v27, %v1458_v26  ;;  %v5197_v22 = vpack.c.bf16 %v1496_v16, %v1492_v14  ;;  %v1543_v14 = vld [vmem:[%s10303_s1 + $0x2ea8] sm:$0xff]  ;;  %v1545_v16 = vld [vmem:[%s10303_s1 + $0x2eb8] sm:$0xff] }
 0x2b0   :  { %5160 = vmatprep.subr.bf16.mxu1 %v5159_v33  ;;  %v1469_v33 = vld [vmem:[%s10303_s1 + $0x2c58] sm:$0xff]  ;;  %v5181_v37 = vpack.c.bf16 %v1464_v30, %v1460_v28  ;;  %v1500_v26 = vld [vmem:[%s10303_s1 + $0x2d50] sm:$0xff]  ;;  %v5199_v27 = vpack.c.bf16 %v1505_v20, %v1501_v19  ;;  %v1511_v30 = vld [vmem:[%s10303_s1 + $0x2da8] sm:$0xff] }
 0x2b1   :  { %v5183_v42 = vpack.c.bf16 %v1473_v34, %v1469_v33  ;;  %v1504_v28 = vld [vmem:[%s10303_s1 + $0x2d70] sm:$0xff]  ;;  %v1538_v20 = vld [vmem:[%s10303_s1 + $0x2e80] sm:$0xff] }
 0x2b2   :  { %4394 = vmatpush1.bf16.msra.mxu0 %v4393_v39  ;;  %v1466_v39 = vld [vmem:[%s10303_s1 + $0x2c40] sm:$0xff]  ;;  %v5201_v34 = vpack.c.bf16 %v1504_v28, %v1500_v26  ;;  %v1551_v26 = vld [vmem:[%s10303_s1 + $0x2ee8] sm:$0xff]  ;;  %v1553_v28 = vld [vmem:[%s10303_s1 + $0x2ef8] sm:$0xff] }
 0x2b3   :  { %5162 = vmatpush1.bf16.msra.mxu1 %v5161_v40  ;;  %4396 = vmatprep.subr.bf16.mxu0 %v4395_v41  ;;  %v1470_v40 = vld [vmem:[%s10303_s1 + $0x2c60] sm:$0xff]  ;;  %v1468_v41 = vld [vmem:[%s10303_s1 + $0x2c50] sm:$0xff] }
 0x2b4   :  { %5164 = vmatprep.subr.bf16.mxu1 %v5163_v45  ;;  %v1479_v45 = vld [vmem:[%s10303_s1 + $0x2ca8] sm:$0xff]  ;;  %v4417_v49 = vpack.c.bf16 %v1470_v40, %v1466_v39  ;;  %v5185_v50 = vpack.c.bf16 %v1472_v43, %v1468_v41  ;;  %v5203_v39 = vpack.c.bf16 %v1513_v32, %v1509_v31  ;;  %v1512_v40 = vld [vmem:[%s10303_s1 + $0x2db0] sm:$0xff]  ;;  %v1517_v43 = vld [vmem:[%s10303_s1 + $0x2dd8] sm:$0xff] }
 0x2b5   :  { %v1515_v41 = vld [vmem:[%s10303_s1 + $0x2dc8] sm:$0xff]  ;;  %v1546_v32 = vld [vmem:[%s10303_s1 + $0x2ec0] sm:$0xff] }
 0x2b6   :  { %4398 = vmatpush1.bf16.msra.mxu0 %v4397_v51  ;;  %v4419_v51 = vpack.c.bf16 %v1479_v45, %v1475_v44  ;;  %v1521_v44 = vld [vmem:[%s10303_s1 + $0x2df8] sm:$0xff] }
 0x2b7   :  { %5166 = vmatpush1.bf16.msra.mxu1 %v5165_v52  ;;  %4400 = vmatprep.subr.bf16.mxu0 %v4399_v53  ;;  %v1474_v52 = vld [vmem:[%s10303_s1 + $0x2c80] sm:$0xff] }
 0x2b8   :  { %5168 = vmatprep.subr.bf16.mxu1 %v5167_v57  ;;  %v1478_v53 = vld [vmem:[%s10303_s1 + $0x2ca0] sm:$0xff]  ;;  %v1483_v57 = vld [vmem:[%s10303_s1 + $0x2cc8] sm:$0xff] }
 0x2b9   :  { %v4421_v61 = vpack.c.bf16 %v1478_v53, %v1474_v52  ;;  %v1520_v52 = vld [vmem:[%s10303_s1 + $0x2df0] sm:$0xff]  ;;  %v1523_v53 = vld [vmem:[%s10303_s1 + $0x2e08] sm:$0xff] }
 0x2ba   :  { %4402 = vmatpush1.bf16.msra.mxu0 %v4401_v63  ;;  %v4423_v63 = vpack.c.bf16 %v1487_v58, %v1483_v57  ;;  %v4443_v59 = vpack.c.bf16 %v1527_v54, %v1523_v53 }
 0x2bb   :  { %5170 = vmatpush1.bf16.msra.mxu1 %v5169_v0  ;;  %4404 = vmatprep.subr.bf16.mxu0 %v4403_v1  ;;  %v1482_v0 = vld [vmem:[%s10303_s1 + $0x2cc0] sm:$0xff] }
 0x2bc   :  { %5172 = vmatprep.subr.bf16.mxu1 %v5171_v5  ;;  %v1486_v1 = vld [vmem:[%s10303_s1 + $0x2ce0] sm:$0xff]  ;;  %v1491_v5 = vld [vmem:[%s10303_s1 + $0x2d08] sm:$0xff] }
 0x2bd   :  { %v4425_v9 = vpack.c.bf16 %v1486_v1, %v1482_v0  ;;  %v1528_v0 = vld [vmem:[%s10303_s1 + $0x2e30] sm:$0xff]  ;;  %v1531_v1 = vld [vmem:[%s10303_s1 + $0x2e48] sm:$0xff] }
 0x2be   :  { %4406 = vmatpush1.bf16.msra.mxu0 %v4405_v11  ;;  %v4427_v11 = vpack.c.bf16 %v1495_v6, %v1491_v5  ;;  %v4447_v7 = vpack.c.bf16 %v1535_v2, %v1531_v1 }
 0x2bf   :  { %5174 = vmatpush1.bf16.msra.mxu1 %v5173_v12  ;;  %4408 = vmatprep.subr.bf16.mxu0 %v4407_v13  ;;  %v1490_v12 = vld [vmem:[%s10303_s1 + $0x2d00] sm:$0xff] }
 0x2c0   :  { %5176 = vmatprep.subr.bf16.mxu1 %v5175_v17  ;;  %v1494_v13 = vld [vmem:[%s10303_s1 + $0x2d20] sm:$0xff]  ;;  %v1499_v17 = vld [vmem:[%s10303_s1 + $0x2d48] sm:$0xff] }
 0x2c1   :  { %v4429_v21 = vpack.c.bf16 %v1494_v13, %v1490_v12  ;;  %v1536_v12 = vld [vmem:[%s10303_s1 + $0x2e70] sm:$0xff]  ;;  %v1539_v13 = vld [vmem:[%s10303_s1 + $0x2e88] sm:$0xff] }
 0x2c2   :  { %4410 = vmatpush1.bf16.msra.mxu0 %v4409_v23  ;;  %v4431_v23 = vpack.c.bf16 %v1503_v18, %v1499_v17  ;;  %v4451_v19 = vpack.c.bf16 %v1543_v14, %v1539_v13 }
 0x2c3   :  { %5178 = vmatpush1.bf16.msra.mxu1 %v5177_v24  ;;  %4412 = vmatprep.subr.bf16.mxu0 %v4411_v25  ;;  %v1498_v24 = vld [vmem:[%s10303_s1 + $0x2d40] sm:$0xff] }
 0x2c4   :  { %5180 = vmatprep.subr.bf16.mxu1 %v5179_v29  ;;  %v1502_v25 = vld [vmem:[%s10303_s1 + $0x2d60] sm:$0xff]  ;;  %v1507_v29 = vld [vmem:[%s10303_s1 + $0x2d88] sm:$0xff] }
 0x2c5   :  { %2383 = vmatmul.mubr.f32.vlgmr.msra.gmra.mrb[0].mxu0 %v46_v35  ;;  %v4433_v33 = vpack.c.bf16 %v1502_v25, %v1498_v24  ;;  %v1544_v24 = vld [vmem:[%s10303_s1 + $0x2eb0] sm:$0xff]  ;;  %v1547_v25 = vld [vmem:[%s10303_s1 + $0x2ec8] sm:$0xff] }
 0x2c6   :  { %4414 = vmatpush1.bf16.msra.mxu0 %v4413_v36  ;;  %3235 = vmatmul.mubr.f32.vlgmr.msra.gmra.mrb[0].mxu1 %v46_v35  ;;  %v4435_v35 = vpack.c.bf16 %v1511_v30, %v1507_v29  ;;  %v1506_v36 = vld [vmem:[%s10303_s1 + $0x2d80] sm:$0xff]  ;;  %v4455_v31 = vpack.c.bf16 %v1551_v26, %v1547_v25 }
 0x2c7   :  { %5182 = vmatpush1.bf16.msra.mxu1 %v5181_v37  ;;  %4416 = vmatprep.subr.bf16.mxu0 %v4415_v38  ;;  %v1510_v37 = vld [vmem:[%s10303_s1 + $0x2da0] sm:$0xff]  ;;  %v1508_v38 = vld [vmem:[%s10303_s1 + $0x2d90] sm:$0xff] }
 0x2c8   :  { %5184 = vmatprep.subr.bf16.mxu1 %v5183_v42  ;;  %2453 = vmatprep.mubr.f32.mxu0 %v49_v48  ;;  %v1519_v42 = vld [vmem:[%s10303_s1 + $0x2de8] sm:$0xff]  ;;  %v4437_v45 = vpack.c.bf16 %v1510_v37, %v1506_v36  ;;  %v5205_v46 = vpack.c.bf16 %v1512_v40, %v1508_v38  ;;  %v1552_v36 = vld [vmem:[%s10303_s1 + $0x2ef0] sm:$0xff]  ;;  %v1561_v40 = vld [vmem:[%s10303_s1 + $0x2f38] sm:$0xff] }
 0x2c9   :  { %3305 = vmatprep.mubr.f32.mxu1 %v49_v48  ;;  %v4439_v47 = vpack.c.bf16 %v1519_v42, %v1515_v41  ;;  %v1514_v48 = vld [vmem:[%s10303_s1 + $0x2dc0] sm:$0xff]  ;;  %v1555_v37 = vld [vmem:[%s10303_s1 + $0x2f08] sm:$0xff] }
 0x2ca   :  { %4418 = vmatpush1.bf16.msra.mxu0 %v4417_v49  ;;  %v1518_v49 = vld [vmem:[%s10303_s1 + $0x2de0] sm:$0xff]  ;;  %v1559_v38 = vld [vmem:[%s10303_s1 + $0x2f28] sm:$0xff] }
 0x2cb   :  { %5186 = vmatpush1.bf16.msra.mxu1 %v5185_v50  ;;  %4420 = vmatprep.subr.bf16.mxu0 %v4419_v51  ;;  %v1516_v50 = vld [vmem:[%s10303_s1 + $0x2dd0] sm:$0xff]  ;;  %v5207_v51 = vpack.c.bf16 %v1521_v44, %v1517_v43  ;;  %v4441_v57 = vpack.c.bf16 %v1518_v49, %v1514_v48  ;;  %v4459_v43 = vpack.c.bf16 %v1559_v38, %v1555_v37  ;;  %v1554_v44 = vld [vmem:[%s10303_s1 + $0x2f00] sm:$0xff]  ;;  %v1563_v49 = vld [vmem:[%s10303_s1 + $0x2f48] sm:$0xff] }
 0x2cc   :  { %5188 = vmatprep.subr.bf16.mxu1 %v5187_v55  ;;  %v1525_v55 = vld [vmem:[%s10303_s1 + $0x2e18] sm:$0xff]  ;;  %v5209_v58 = vpack.c.bf16 %v1520_v52, %v1516_v50  ;;  %v1560_v48 = vld [vmem:[%s10303_s1 + $0x2f30] sm:$0xff]  ;;  %v1567_v50 = vld [vmem:[%s10303_s1 + $0x2f68] sm:$0xff] }
 0x2cd   :  { %v1569_v52 = vld [vmem:[%s10303_s1 + $0x2f78] sm:$0xff]  ;;  %v48_v37 = vld [vmem:[%s10304_s0 + $0xb0] sm:$0xff] }
 0x2ce   :  { %4422 = vmatpush1.bf16.msra.mxu0 %v4421_v61  ;;  %v1526_v61 = vld [vmem:[%s10303_s1 + $0x2e20] sm:$0xff] }
 0x2cf   :  { %5190 = vmatpush1.bf16.msra.mxu1 %v5189_v62  ;;  %4424 = vmatprep.subr.bf16.mxu0 %v4423_v63  ;;  %v1524_v62 = vld [vmem:[%s10303_s1 + $0x2e10] sm:$0xff]  ;;  %v5211_v63 = vpack.c.bf16 %v1529_v56, %v1525_v55  ;;  %v4445_v5 = vpack.c.bf16 %v1526_v61, %v1522_v60  ;;  %v4463_v55 = vpack.c.bf16 %v1567_v50, %v1563_v49  ;;  %v1562_v56 = vld [vmem:[%s10303_s1 + $0x2f40] sm:$0xff]  ;;  %v1571_v61 = vld [vmem:[%s10303_s1 + $0x2f88] sm:$0xff] }
 0x2d0   :  { %5192 = vmatprep.subr.bf16.mxu1 %v5191_v3  ;;  %v1533_v3 = vld [vmem:[%s10303_s1 + $0x2e58] sm:$0xff]  ;;  %v5213_v6 = vpack.c.bf16 %v1528_v0, %v1524_v62  ;;  %v1568_v60 = vld [vmem:[%s10303_s1 + $0x2f70] sm:$0xff]  ;;  %v1575_v62 = vld [vmem:[%s10303_s1 + $0x2fa8] sm:$0xff] }
 0x2d1   :  { %v1577_v0 = vld [vmem:[%s10303_s1 + $0x2fb8] sm:$0xff]  ;;  %v3369_v49 = vld [vmem:[%s10305_s3 + $0x1a8] sm:$0xff] }
 0x2d2   :  { %4426 = vmatpush1.bf16.msra.mxu0 %v4425_v9  ;;  %v1534_v9 = vld [vmem:[%s10303_s1 + $0x2e60] sm:$0xff] }
 0x2d3   :  { %5194 = vmatpush1.bf16.msra.mxu1 %v5193_v10  ;;  %4428 = vmatprep.subr.bf16.mxu0 %v4427_v11  ;;  %v1532_v10 = vld [vmem:[%s10303_s1 + $0x2e50] sm:$0xff]  ;;  %v5215_v11 = vpack.c.bf16 %v1537_v4, %v1533_v3  ;;  %v4449_v17 = vpack.c.bf16 %v1534_v9, %v1530_v8  ;;  %v4467_v3 = vpack.c.bf16 %v1575_v62, %v1571_v61  ;;  %v1570_v4 = vld [vmem:[%s10303_s1 + $0x2f80] sm:$0xff]  ;;  %v1579_v9 = vld [vmem:[%s10303_s1 + $0x2fc8] sm:$0xff] }
 0x2d4   :  { %5196 = vmatprep.subr.bf16.mxu1 %v5195_v15  ;;  %v1541_v15 = vld [vmem:[%s10303_s1 + $0x2e98] sm:$0xff]  ;;  %v5217_v18 = vpack.c.bf16 %v1536_v12, %v1532_v10  ;;  %v1576_v8 = vld [vmem:[%s10303_s1 + $0x2fb0] sm:$0xff]  ;;  %v1583_v10 = vld [vmem:[%s10303_s1 + $0x2fe8] sm:$0xff] }
 0x2d5   :  { %v1585_v12 = vld [vmem:[%s10303_s1 + $0x2ff8] sm:$0xff] }
 0x2d6   :  { %4430 = vmatpush1.bf16.msra.mxu0 %v4429_v21  ;;  %v1542_v21 = vld [vmem:[%s10303_s1 + $0x2ea0] sm:$0xff]  ;;  %v3371_v61 = vld [vmem:[%s10305_s3 + $0x1b8] sm:$0xff] }
 0x2d7   :  { %5198 = vmatpush1.bf16.msra.mxu1 %v5197_v22  ;;  %4432 = vmatprep.subr.bf16.mxu0 %v4431_v23  ;;  %v1540_v22 = vld [vmem:[%s10303_s1 + $0x2e90] sm:$0xff]  ;;  %v5219_v23 = vpack.c.bf16 %v1545_v16, %v1541_v15  ;;  %v4453_v29 = vpack.c.bf16 %v1542_v21, %v1538_v20  ;;  %v4471_v15 = vpack.c.bf16 %v1583_v10, %v1579_v9  ;;  %v1578_v16 = vld [vmem:[%s10303_s1 + $0x2fc0] sm:$0xff]  ;;  %v3373_v9 = vld [vmem:[%s10305_s3 + $0x1c8] sm:$0xff] }
 0x2d8   :  { %5200 = vmatprep.subr.bf16.mxu1 %v5199_v27  ;;  %v1549_v27 = vld [vmem:[%s10303_s1 + $0x2ed8] sm:$0xff]  ;;  %v5221_v30 = vpack.c.bf16 %v1544_v24, %v1540_v22  ;;  %v1584_v20 = vld [vmem:[%s10303_s1 + $0x2ff0] sm:$0xff]  ;;  %v3332_v21 = vld [vmem:[%s10305_s3 + $0x80] sm:$0xff] }
 0x2d9   :  { %v3333_v22 = vld [vmem:[%s10305_s3 + $0x88] sm:$0xff] }
 0x2da   :  { %4434 = vmatpush1.bf16.msra.mxu0 %v4433_v33  ;;  %v1550_v33 = vld [vmem:[%s10303_s1 + $0x2ee0] sm:$0xff]  ;;  %v3365_v24 = vld [vmem:[%s10305_s3 + $0x188] sm:$0xff] }
 0x2db   :  { %5202 = vmatpush1.bf16.msra.mxu1 %v5201_v34  ;;  %4436 = vmatprep.subr.bf16.mxu0 %v4435_v35  ;;  %v1548_v34 = vld [vmem:[%s10303_s1 + $0x2ed0] sm:$0xff]  ;;  %v5223_v35 = vpack.c.bf16 %v1553_v28, %v1549_v27  ;;  %v4457_v41 = vpack.c.bf16 %v1550_v33, %v1546_v32  ;;  %v5243_v27 = vpack.c.bf16 %v3333_v22, %v3332_v21  ;;  %v3316_v28 = vld [vmem:[%s10305_s3] sm:$0xff]  ;;  %v3349_v32 = vld [vmem:[%s10305_s3 + $0x108] sm:$0xff] }
 0x2dc   :  { %5204 = vmatprep.subr.bf16.mxu1 %v5203_v39  ;;  %v1557_v39 = vld [vmem:[%s10303_s1 + $0x2f18] sm:$0xff]  ;;  %v5225_v42 = vpack.c.bf16 %v1552_v36, %v1548_v34  ;;  %v3334_v33 = vld [vmem:[%s10305_s3 + $0x90] sm:$0xff] }
 0x2dd   :  { %v3335_v34 = vld [vmem:[%s10305_s3 + $0x98] sm:$0xff] }
 0x2de   :  { %4438 = vmatpush1.bf16.msra.mxu0 %v4437_v45  ;;  %v1558_v45 = vld [vmem:[%s10303_s1 + $0x2f20] sm:$0xff]  ;;  %v3367_v36 = vld [vmem:[%s10305_s3 + $0x198] sm:$0xff] }
 0x2df   :  { %5206 = vmatpush1.bf16.msra.mxu1 %v5205_v46  ;;  %4440 = vmatprep.subr.bf16.mxu0 %v4439_v47  ;;  %v1556_v46 = vld [vmem:[%s10303_s1 + $0x2f10] sm:$0xff]  ;;  %v5227_v47 = vpack.c.bf16 %v1561_v40, %v1557_v39  ;;  %v4461_v53 = vpack.c.bf16 %v1558_v45, %v1554_v44  ;;  %v5247_v40 = vpack.c.bf16 %v3335_v34, %v3334_v33  ;;  %v3351_v45 = vld [vmem:[%s10305_s3 + $0x118] sm:$0xff]  ;;  %v3377_v33 = vld [vmem:[%s10305_s3 + $0x1e8] sm:$0xff] }
 0x2e0   :  { %5208 = vmatprep.subr.bf16.mxu1 %v5207_v51  ;;  %v1565_v51 = vld [vmem:[%s10303_s1 + $0x2f58] sm:$0xff]  ;;  %v5229_v54 = vpack.c.bf16 %v1560_v48, %v1556_v46  ;;  %v3336_v46 = vld [vmem:[%s10305_s3 + $0xa0] sm:$0xff] }
 0x2e1   :  { %v3368_v48 = vld [vmem:[%s10305_s3 + $0x1a0] sm:$0xff]  ;;  %v3375_v21 = vld [vmem:[%s10305_s3 + $0x1d8] sm:$0xff] }
 0x2e2   :  { %4442 = vmatpush1.bf16.msra.mxu0 %v4441_v57  ;;  %v1566_v57 = vld [vmem:[%s10303_s1 + $0x2f60] sm:$0xff] }
 0x2e3   :  { %5210 = vmatpush1.bf16.msra.mxu1 %v5209_v58  ;;  %4444 = vmatprep.subr.bf16.mxu0 %v4443_v59  ;;  %v1564_v58 = vld [vmem:[%s10303_s1 + $0x2f50] sm:$0xff]  ;;  %v5231_v59 = vpack.c.bf16 %v1569_v52, %v1565_v51  ;;  %v4465_v1 = vpack.c.bf16 %v1566_v57, %v1562_v56  ;;  %v5283_v56 = vpack.c.bf16 %v3369_v49, %v3368_v48  ;;  %v3353_v57 = vld [vmem:[%s10305_s3 + $0x128] sm:$0xff]  ;;  %v3379_v48 = vld [vmem:[%s10305_s3 + $0x1f8] sm:$0xff] }
 0x2e4   :  { %5212 = vmatprep.subr.bf16.mxu1 %v5211_v63  ;;  %v1573_v63 = vld [vmem:[%s10303_s1 + $0x2f98] sm:$0xff]  ;;  %v5233_v2 = vpack.c.bf16 %v1568_v60, %v1564_v58  ;;  %v3338_v58 = vld [vmem:[%s10305_s3 + $0xb0] sm:$0xff] }
 0x2e5   :  { %v3370_v60 = vld [vmem:[%s10305_s3 + $0x1b0] sm:$0xff] }
 0x2e6   :  { %4446 = vmatpush1.bf16.msra.mxu0 %v4445_v5  ;;  %v1574_v5 = vld [vmem:[%s10303_s1 + $0x2fa0] sm:$0xff]  ;;  %v3330_v49 = vld [vmem:[%s10305_s3 + $0x70] sm:$0xff] }
 0x2e7   :  { %5214 = vmatpush1.bf16.msra.mxu1 %v5213_v6  ;;  %4448 = vmatprep.subr.bf16.mxu0 %v4447_v7  ;;  %v1572_v6 = vld [vmem:[%s10303_s1 + $0x2f90] sm:$0xff]  ;;  %v5235_v7 = vpack.c.bf16 %v1577_v0, %v1573_v63  ;;  %v4469_v13 = vpack.c.bf16 %v1574_v5, %v1570_v4  ;;  %v5287_v4 = vpack.c.bf16 %v3371_v61, %v3370_v60  ;;  %v3355_v5 = vld [vmem:[%s10305_s3 + $0x138] sm:$0xff] }
 0x2e8   :  { %5216 = vmatprep.subr.bf16.mxu1 %v5215_v11  ;;  %v1581_v11 = vld [vmem:[%s10303_s1 + $0x2fd8] sm:$0xff]  ;;  %v5237_v14 = vpack.c.bf16 %v1576_v8, %v1572_v6  ;;  %v3340_v6 = vld [vmem:[%s10305_s3 + $0xc0] sm:$0xff] }
 0x2e9   :  { %v3372_v8 = vld [vmem:[%s10305_s3 + $0x1c0] sm:$0xff] }
 0x2ea   :  { %4450 = vmatpush1.bf16.msra.mxu0 %v4449_v17  ;;  %v1582_v17 = vld [vmem:[%s10303_s1 + $0x2fe0] sm:$0xff] }
 0x2eb   :  { %5218 = vmatpush1.bf16.msra.mxu1 %v5217_v18  ;;  %4452 = vmatprep.subr.bf16.mxu0 %v4451_v19  ;;  %v1580_v18 = vld [vmem:[%s10303_s1 + $0x2fd0] sm:$0xff]  ;;  %v5239_v19 = vpack.c.bf16 %v1585_v12, %v1581_v11  ;;  %v4473_v25 = vpack.c.bf16 %v1582_v17, %v1578_v16  ;;  %v5291_v16 = vpack.c.bf16 %v3373_v9, %v3372_v8  ;;  %v3357_v17 = vld [vmem:[%s10305_s3 + $0x148] sm:$0xff] }
 0x2ec   :  { %5220 = vmatprep.subr.bf16.mxu1 %v5219_v23  ;;  %v3364_v23 = vld [vmem:[%s10305_s3 + $0x180] sm:$0xff]  ;;  %v5241_v26 = vpack.c.bf16 %v1584_v20, %v1580_v18  ;;  %v3342_v18 = vld [vmem:[%s10305_s3 + $0xd0] sm:$0xff] }
 0x2ed   :  { %v3374_v20 = vld [vmem:[%s10305_s3 + $0x1d0] sm:$0xff] }
 0x2ee   :  { %4454 = vmatpush1.bf16.msra.mxu0 %v4453_v29  ;;  %v3317_v29 = vld [vmem:[%s10305_s3 + $0x8] sm:$0xff] }
 0x2ef   :  { %5222 = vmatpush1.bf16.msra.mxu1 %v5221_v30  ;;  %4456 = vmatprep.subr.bf16.mxu0 %v4455_v31  ;;  %v3348_v30 = vld [vmem:[%s10305_s3 + $0x100] sm:$0xff]  ;;  %v5275_v31 = vpack.c.bf16 %v3365_v24, %v3364_v23  ;;  %v5245_v38 = vpack.c.bf16 %v3317_v29, %v3316_v28  ;;  %v5295_v28 = vpack.c.bf16 %v3375_v21, %v3374_v20  ;;  %v3359_v29 = vld [vmem:[%s10305_s3 + $0x158] sm:$0xff] }
 0x2f0   :  { %5224 = vmatprep.subr.bf16.mxu1 %v5223_v35  ;;  %v3366_v35 = vld [vmem:[%s10305_s3 + $0x190] sm:$0xff]  ;;  %v5277_v39 = vpack.c.bf16 %v3349_v32, %v3348_v30  ;;  %v3344_v30 = vld [vmem:[%s10305_s3 + $0xe0] sm:$0xff]  ;;  %v3531_v20 = vld [vmem:[%s10307_s5 + $0x18] sm:$0xff] }
 0x2f1   :  { %v5279_v44 = vpack.c.bf16 %v3367_v36, %v3366_v35  ;;  %v3376_v32 = vld [vmem:[%s10305_s3 + $0x1e0] sm:$0xff] }
 0x2f2   :  { %4458 = vmatpush1.bf16.msra.mxu0 %v4457_v41  ;;  %v3318_v41 = vld [vmem:[%s10305_s3 + $0x10] sm:$0xff] }
 0x2f3   :  { %5226 = vmatpush1.bf16.msra.mxu1 %v5225_v42  ;;  %4460 = vmatprep.subr.bf16.mxu0 %v4459_v43  ;;  %v3319_v42 = vld [vmem:[%s10305_s3 + $0x18] sm:$0xff]  ;;  %v3350_v43 = vld [vmem:[%s10305_s3 + $0x110] sm:$0xff] }
 0x2f4   :  { %5228 = vmatprep.subr.bf16.mxu1 %v5227_v47  ;;  %v3337_v47 = vld [vmem:[%s10305_s3 + $0xa8] sm:$0xff]  ;;  %v5249_v50 = vpack.c.bf16 %v3319_v42, %v3318_v41  ;;  %v5281_v51 = vpack.c.bf16 %v3351_v45, %v3350_v43  ;;  %v3347_v45 = vld [vmem:[%s10305_s3 + $0xf8] sm:$0xff] }
 0x2f5   :  { %v5251_v52 = vpack.c.bf16 %v3337_v47, %v3336_v46  ;;  %v3361_v42 = vld [vmem:[%s10305_s3 + $0x168] sm:$0xff]  ;;  %v3378_v46 = vld [vmem:[%s10305_s3 + $0x1f0] sm:$0xff] }
 0x2f6   :  { %4462 = vmatpush1.bf16.msra.mxu0 %v4461_v53  ;;  %v3320_v53 = vld [vmem:[%s10305_s3 + $0x20] sm:$0xff] }
 0x2f7   :  { %5230 = vmatpush1.bf16.msra.mxu1 %v5229_v54  ;;  %4464 = vmatprep.subr.bf16.mxu0 %v4463_v55  ;;  %v3321_v54 = vld [vmem:[%s10305_s3 + $0x28] sm:$0xff]  ;;  %v3352_v55 = vld [vmem:[%s10305_s3 + $0x120] sm:$0xff] }
 0x2f8   :  { %5232 = vmatprep.subr.bf16.mxu1 %v5231_v59  ;;  %v3339_v59 = vld [vmem:[%s10305_s3 + $0xb8] sm:$0xff]  ;;  %v5253_v62 = vpack.c.bf16 %v3321_v54, %v3320_v53  ;;  %v5285_v63 = vpack.c.bf16 %v3353_v57, %v3352_v55  ;;  %v3362_v53 = vld [vmem:[%s10305_s3 + $0x170] sm:$0xff] }
 0x2f9   :  { %v5255_v0 = vpack.c.bf16 %v3339_v59, %v3338_v58  ;;  %v3363_v54 = vld [vmem:[%s10305_s3 + $0x178] sm:$0xff]  ;;  %v1586_v59 = vld [vmem:[%s10306_s2] sm:$0xf] }
 0x2fa   :  { %4466 = vmatpush1.bf16.msra.mxu0 %v4465_v1  ;;  %v3322_v1 = vld [vmem:[%s10305_s3 + $0x30] sm:$0xff]  ;;  %v5305_v55 = vpack.c.bf16 %v3363_v54, %v3362_v53 }
 0x2fb   :  { %5234 = vmatpush1.bf16.msra.mxu1 %v5233_v2  ;;  %4468 = vmatprep.subr.bf16.mxu0 %v4467_v3  ;;  %v3323_v2 = vld [vmem:[%s10305_s3 + $0x38] sm:$0xff]  ;;  %v3354_v3 = vld [vmem:[%s10305_s3 + $0x130] sm:$0xff] }
 0x2fc   :  { %5236 = vmatprep.subr.bf16.mxu1 %v5235_v7  ;;  %v3341_v7 = vld [vmem:[%s10305_s3 + $0xc8] sm:$0xff]  ;;  %v5257_v10 = vpack.c.bf16 %v3323_v2, %v3322_v1  ;;  %v5289_v11 = vpack.c.bf16 %v3355_v5, %v3354_v3 }
 0x2fd   :  { %v5259_v12 = vpack.c.bf16 %v3341_v7, %v3340_v6 }
 0x2fe   :  { %4470 = vmatpush1.bf16.msra.mxu0 %v4469_v13  ;;  %v3324_v13 = vld [vmem:[%s10305_s3 + $0x40] sm:$0xff] }
 0x2ff   :  { %5238 = vmatpush1.bf16.msra.mxu1 %v5237_v14  ;;  %4472 = vmatprep.subr.bf16.mxu0 %v4471_v15  ;;  %v3325_v14 = vld [vmem:[%s10305_s3 + $0x48] sm:$0xff]  ;;  %v3356_v15 = vld [vmem:[%s10305_s3 + $0x140] sm:$0xff] }
 0x300   :  { %5240 = vmatprep.subr.bf16.mxu1 %v5239_v19  ;;  %v3343_v19 = vld [vmem:[%s10305_s3 + $0xd8] sm:$0xff]  ;;  %v5261_v22 = vpack.c.bf16 %v3325_v14, %v3324_v13  ;;  %v5293_v23 = vpack.c.bf16 %v3357_v17, %v3356_v15  ;;  %v3528_v15 = vld [vmem:[%s10307_s5] sm:$0xff] }
 0x301   :  { %v5263_v24 = vpack.c.bf16 %v3343_v19, %v3342_v18  ;;  %v5364_v18 = vmov 0.0|0.0   ;;  %v3530_v19 = vld [vmem:[%s10307_s5 + $0x10] sm:$0xff] }
 0x302   :  { %4474 = vmatpush1.bf16.msra.mxu0 %v4473_v25  ;;  %v3326_v25 = vld [vmem:[%s10305_s3 + $0x50] sm:$0xff]  ;;  %v5311_v21 = vpack.c.bf16 %v3531_v20, %v3530_v19 }
 0x303   :  { %5242 = vmatpush1.bf16.msra.mxu1 %v5241_v26  ;;  %5244 = vmatprep.subr.bf16.mxu0 %v5243_v27  ;;  %v3327_v26 = vld [vmem:[%s10305_s3 + $0x58] sm:$0xff]  ;;  %v3358_v27 = vld [vmem:[%s10305_s3 + $0x150] sm:$0xff] }
 0x304   :  { %5276 = vmatprep.subr.bf16.mxu1 %v5275_v31  ;;  %v3345_v31 = vld [vmem:[%s10305_s3 + $0xe8] sm:$0xff]  ;;  %v5265_v34 = vpack.c.bf16 %v3327_v26, %v3326_v25  ;;  %v5297_v35 = vpack.c.bf16 %v3359_v29, %v3358_v27  ;;  %v3618_v25 = vld [vmem:[%s10308_s4] ss:$0 sm:$0xff] }
 0x305   :  { %2454 = vmatmul.mubr.f32.vlgmr.msra.gmra.mrb[0].mxu0 %v48_v37  ;;  %v5267_v36 = vpack.c.bf16 %v3345_v31, %v3344_v30 }
 0x306   :  { %3306 = vmatmul.mubr.f32.vlgmr.msra.gmra.mrb[0].mxu1 %v48_v37  ;;  %5246 = vmatpush3.bf16.msra.mxu0 %v5245_v38  ;;  %v5299_v37 = vpack.c.bf16 %v3377_v33, %v3376_v32  ;;  %v3328_v38 = vld [vmem:[%s10305_s3 + $0x60] sm:$0xff] }
 0x307   :  { %5278 = vmatpush3.bf16.msra.mxu1 %v5277_v39  ;;  %5248 = vmatprep.subr.bf16.mxu0 %v5247_v40  ;;  %v3329_v39 = vld [vmem:[%s10305_s3 + $0x68] sm:$0xff]  ;;  %v3360_v40 = vld [vmem:[%s10305_s3 + $0x160] sm:$0xff] }
 0x308   :  { %5280 = vmatprep.subr.bf16.mxu1 %v5279_v44  ;;  %v5269_v41 = vpack.c.bf16 %v3329_v39, %v3328_v38  ;;  %v5301_v43 = vpack.c.bf16 %v3361_v42, %v3360_v40  ;;  %v3346_v44 = vld [vmem:[%s10305_s3 + $0xf0] sm:$0xff]  ;;  %v3619_v33 = vld [vmem:[%s10309_s6] ss:$0 sm:$0xff] }
 0x309   :  { %v5271_v47 = vpack.c.bf16 %v3347_v45, %v3346_v44 }
 0x30a   :  { %5250 = vmatpush3.bf16.msra.mxu0 %v5249_v50  ;;  %v3331_v50 = vld [vmem:[%s10305_s3 + $0x78] sm:$0xff] }
 0x30b   :  { %5282 = vmatpush3.bf16.msra.mxu1 %v5281_v51  ;;  %5252 = vmatprep.subr.bf16.mxu0 %v5251_v52  ;;  %v5303_v51 = vpack.c.bf16 %v3379_v48, %v3378_v46  ;;  %v5273_v52 = vpack.c.bf16 %v3331_v50, %v3330_v49 }
 0x30c   :  { %5284 = vmatprep.subr.bf16.mxu1 %v5283_v56  ;;  %v1588_v56 = vlaneseq }
 0x30e   :  { %5254 = vmatpush3.bf16.msra.mxu0 %v5253_v62  ;;  %v1589_v57 = vshrl.u32 %v1588_v56, 7 }
 0x30f   :  { %5286 = vmatpush3.bf16.msra.mxu1 %v5285_v63  ;;  %5256 = vmatprep.subr.bf16.mxu0 %v5255_v0 }
 0x310   :  { %5288 = vmatprep.subr.bf16.mxu1 %v5287_v4  ;;  %v1590_v58 = vsub.s32 0, %v1589_v57  ;;  %v1598_v60 = vsub.s32 2, %v1589_v57  ;;  %v1594_v61 = vsub.s32 1, %v1589_v57  ;;  %v1602_v62 = vsub.s32 3, %v1589_v57 }
 0x312   :  { %5258 = vmatpush3.bf16.msra.mxu0 %v5257_v10  ;;  %v1591_v63 = vrot.slane %v1586_v59, %v1590_v58  ;;  %v1599_v0 = vrot.slane %v1586_v59, %v1598_v60  ;;  %v1595_v1 = vrot.slane %v1586_v59, %v1594_v61  ;;  %v1603_v2 = vrot.slane %v1586_v59, %v1602_v62 }
 0x313   :  { %5290 = vmatpush3.bf16.msra.mxu1 %v5289_v11  ;;  %5260 = vmatprep.subr.bf16.mxu0 %v5259_v12 }
 0x314   :  { %5292 = vmatprep.subr.bf16.mxu1 %v5291_v16  ;;  %v3529_v16 = vld [vmem:[%s10307_s5 + $0x8] sm:$0xff] }
 0x315   :  { %v5308_v17 = vpack.c.bf16 %v3529_v16, %v3528_v15 }
 0x316   :  { %5262 = vmatpush3.bf16.msra.mxu0 %v5261_v22  ;;  %v5366_v22 = vmov 0.0  }
 0x317   :  { %5294 = vmatpush3.bf16.msra.mxu1 %v5293_v23  ;;  %5264 = vmatprep.subr.bf16.mxu0 %v5263_v24 }
 0x318   :  { %5296 = vmatprep.subr.bf16.mxu1 %v5295_v28 }
 0x31a   :  { %5266 = vmatpush3.bf16.msra.mxu0 %v5265_v34 }
 0x31b   :  { %5298 = vmatpush3.bf16.msra.mxu1 %v5297_v35  ;;  %5268 = vmatprep.subr.bf16.mxu0 %v5267_v36 }
 0x31c   :  { %5300 = vmatprep.subr.bf16.mxu1 %v5299_v37 }
 0x31e   :  { %5270 = vmatpush3.bf16.msra.mxu0 %v5269_v41 }
 0x31f   :  { %5302 = vmatpush3.bf16.msra.mxu1 %v5301_v43  ;;  %5272 = vmatprep.subr.bf16.mxu0 %v5271_v47 }
 0x320   :  { %5304 = vmatprep.subr.bf16.mxu1 %v5303_v51 }
 0x322   :  { %5274 = vmatpush3.bf16.msra.mxu0 %v5273_v52 }
 0x323   :  { %5306 = vmatpush3.bf16.msra.mxu1 %v5305_v55  ;;  %5307 = vmatprep.subr.bf16.mxu0 %v5364_v18 }
 0x3d8   :  { %v2455_v3 = vpop.f32.mrb[0].mxu0 }
 0x3d9   :  { %v5313_v4 = vadd.f32 %v2455_v3, %v1591_v63  ;;  %v3307_v5 = vpop.f32.mrb[0].mxu1  ;;  %v2457_v6 = vpop.f32.mrb[1].mxu0 }
 0x3da   :  { %v5315_v7 = vadd.f32 %v3307_v5, %v1599_v0  ;;  %v5314_v8 = vadd.f32 %v2457_v6, %v1595_v1  ;;  %v3309_v9 = vpop.f32.mrb[1].mxu1 }
 0x3db   :  { %v5316_v10 = vadd.f32 %v3309_v9, %v1603_v2  ;;  %v3312_v12 = vmax.f32 %v5313_v4, 0.0 }
 0x3dc   :  { %v3313_v11 = vmax.f32 %v5314_v8, 0.0  ;;  %v3314_v14 = vmax.f32 %v5315_v7, 0.0 }
 0x3dd   :  { %v3315_v13 = vmax.f32 %v5316_v10, 0.0 }
 0x3de   :  { %3451 = vmatprep.mubr.f32.mxu0 %v3313_v11 }
 0x3df   :  { %3521 = vmatprep.mubr.f32.mxu1 %v3315_v13  ;;  %3452 = vmatmul.mubr.f32.vlgmr.msra.gmra.mrb[2].mxu0 %v3312_v12 }
 0x3e0   :  { %3522 = vmatmul.mubr.f32.vlgmr.msra.gmra.mrb[2].mxu1 %v3314_v14  ;;  %5309 = vmatpush3.bf16.msra.mxu0 %v5308_v17 }
 0x3e1   :  { %5310 = vmatprep.subr.bf16.mxu0 %v5364_v18  ;;  %3704 = vmatprep.mubr.msk.f32.mxu0 %vm5365_vm0, %v5366_v22 }
 0x3e4   :  { %5312 = vmatpush3.bf16.msra.mxu0 %v5311_v21 }
 0x4b2   :  { %v3653_v23 = vpop.f32.mrb[2].mxu0 }
 0x4b3   :  { %v3688_v24 = vpop.f32.mrb[2].mxu1  ;;  %v3654_v26 = vpop.f32.mrb[3].mxu0 }
 0x4b4   :  { %v3655_v27 = vadd.f32 %v3654_v26, %v3653_v23  ;;  %v3689_v28 = vpop.f32.mrb[3].mxu1 }
 0x4b5   :  { %v3690_v29 = vadd.f32 %v3689_v28, %v3688_v24 }
 0x4b6   :  { %v3454_v30 = vadd.f32 %v3655_v27, %v3618_v25 }
 0x4b8   :  { %v3524_v31 = vadd.f32 %v3690_v29, %v3454_v30 }
 0x4ba   :  { %v3527_v32 = vmax.f32 %v3524_v31, 0.0 }
 0x4bc   :  { %3705 = vmatmul.mubr.msk.f32.vlgmr.msra.gmra.mrb[4].mxu0 %vm3539_vm1, %v3527_v32 }
 0x58f   :  { %v3609_v34 = vpop.f32.mrb[4].mxu0 }
 0x590   :  { %v3610_v35 = vadd.f32 %v3619_v33, %v3609_v34  ;;  %v3706_v36 = vpop.f32.mrb[5].mxu0 }
 0x592   :  { %3613 = vst [vmem:[%s10310_s7] sm:$0xff] %v3610_v35 }

</bundles_post_ra>
